<compile_context>
chip_gen: v7x
topology: tpu7x:2x2x1
jax: 0.10.0
libtpu: 0.0.40
codegen_flags: <defaults>
</compile_context>

<pallas_src>
import functools

import jax
import jax.numpy as jnp
from jax import lax
from jax.experimental import pallas as pl
from jax.experimental.pallas import tpu as pltpu

VMEM_LIMIT_BYTES = 32 * 1024 * 1024   # explicit, leaves headroom on v7x (64 MiB phys)
REL_TKR = 256                         # reference-patch tile (fills 256-wide MXU N dim)

# Flipped to False at runtime if this Mosaic version rejects the lane-merging
# (H*W, C) -> (H, W*C) reshape / minor-dim concat used by the fast conv path.
_FAST_CONV = True


# ----------------------------------------------------------------------------
# Pallas kernel 1: fused 3x3 conv (in-VMEM zero pad + single K=9*Cin bf16 dot)
# ----------------------------------------------------------------------------
def _zero_border(p_sc, H, W, Cin):
    """Zero only the 1-px border; interior is always fully overwritten per step."""
    zrow = jnp.zeros((1, W + 2, Cin), p_sc.dtype)
    zcol = jnp.zeros((H + 2, 1, Cin), p_sc.dtype)
    p_sc[0:1, :, :] = zrow
    p_sc[H + 1:H + 2, :, :] = zrow
    p_sc[:, 0:1, :] = zcol
    p_sc[:, W + 1:W + 2, :] = zcol


def _conv_accum(p_sc, w, H, W, Cin, fast):
    """p_sc: (H+2, W+2, Cin) bf16 zero-bordered scratch; w: (9*Cin, Cout) bf16.

    fast=True : build the (H*W, 9*Cin) im2col slab in registers (9 shifted taps
                concatenated along K) and run ONE MXU matmul with K = 9*Cin.
    fast=False: conservative 9 dots of K = Cin (guaranteed lowering)."""
    if fast:
        taps = [p_sc[dy:dy + H, dx:dx + W, :].reshape(H * W, Cin)
                for dy in range(3) for dx in range(3)]
        im2col = jnp.concatenate(taps, axis=-1)              # (H*W, 9*Cin)
        return jnp.dot(im2col, w, preferred_element_type=jnp.float32)
    acc = jnp.zeros((H * W, w.shape[-1]), jnp.float32)
    for t, (dy, dx) in enumerate([(a, b) for a in range(3) for b in range(3)]):
        xs = p_sc[dy:dy + H, dx:dx + W, :].reshape(H * W, Cin)
        acc = acc + jnp.dot(xs, w[t * Cin:(t + 1) * Cin, :],
                            preferred_element_type=jnp.float32)
    return acc


def _conv_kernel(x_ref, w_ref, b_ref, o_ref, p_sc, *, H, W, Cin, Cout, relu, fast):
    # x_ref: (1, H, W, Cin) f32   p_sc: (H+2, W+2, Cin) bf16 scratch
    _zero_border(p_sc, H, W, Cin)
    p_sc[1:1 + H, 1:1 + W, :] = x_ref[0].astype(p_sc.dtype)
    acc = _conv_accum(p_sc, w_ref[...], H, W, Cin, fast) + b_ref[...]
    if relu:
        acc = jnp.maximum(acc, 0.0)
    if fast:
        o_ref[...] = acc.reshape(1, H, W * Cout)      # lane-dense (unmasked) store
    else:
        o_ref[...] = acc.reshape(1, H, W, Cout)


def _resblock_chain_kernel(x_ref, w1_ref, b1_ref, w2_ref, b2_ref, o_ref, p_sc,
                           *, H, W, C, nblk, fast):
    _zero_border(p_sc, H, W, C)
    x = x_ref[0]                                          # (H, W, C) f32
    for blk in range(nblk):                               # static, fused chain
        p_sc[1:1 + H, 1:1 + W, :] = x.astype(p_sc.dtype)
        a1 = _conv_accum(p_sc, w1_ref[blk], H, W, C, fast) + b1_ref[blk]
        a1 = jnp.maximum(a1, 0.0)
        p_sc[1:1 + H, 1:1 + W, :] = a1.reshape(H, W, C).astype(p_sc.dtype)
        a2 = _conv_accum(p_sc, w2_ref[blk], H, W, C, fast) + b2_ref[blk]
        x = x + a2.reshape(H, W, C)                       # residual, f32 epilogue
    if fast:
        o_ref[...] = x.reshape(1, H, W * C)
    else:
        o_ref[...] = x.reshape(1, H, W, C)


def _prep_w(w):
    """torch (Cout, Cin, 3, 3) -> (9*Cin, Cout) bf16 (row = (dy*3+dx)*Cin + ci)."""
    cout, cin = w.shape[0], w.shape[1]
    return jnp.transpose(w, (2, 3, 1, 0)).reshape(9 * cin, cout).astype(jnp.bfloat16)


def _prep_b(b):
    return b.reshape(1, -1).astype(jnp.float32)


def prep_conv(wb):
    w, b = wb
    return _prep_w(w), _prep_b(b)


def conv3x3(x, wb, relu=False):
    """x: (N,H,W,Cin) f32 NHWC; wb: prepped ((9*Cin,Cout) bf16, (1,Cout) f32)."""
    w, b = wb
    N, H, W, Cin = x.shape
    Cout = w.shape[1]
    fast = _FAST_CONV
    if fast:
        out_shape = jax.ShapeDtypeStruct((N, H, W * Cout), jnp.float32)
        out_spec = pl.BlockSpec((1, H, W * Cout), lambda n: (n, 0, 0))
    else:
        out_shape = jax.ShapeDtypeStruct((N, H, W, Cout), jnp.float32)
        out_spec = pl.BlockSpec((1, H, W, Cout), lambda n: (n, 0, 0, 0))
    out = pl.pallas_call(
        functools.partial(_conv_kernel, H=H, W=W, Cin=Cin, Cout=Cout,
                          relu=relu, fast=fast),
        out_shape=out_shape,
        grid_spec=pltpu.PrefetchScalarGridSpec(
            num_scalar_prefetch=0,
            grid=(N,),
            in_specs=[
                pl.BlockSpec((1, H, W, Cin), lambda n: (n, 0, 0, 0)),
                pl.BlockSpec((9 * Cin, Cout), lambda n: (0, 0)),
                pl.BlockSpec((1, Cout), lambda n: (0, 0)),
            ],
            out_specs=out_spec,
            scratch_shapes=[pltpu.VMEM((H + 2, W + 2, Cin), jnp.bfloat16)],
        ),
        compiler_params=pltpu.CompilerParams(
            dimension_semantics=("parallel",),
            vmem_limit_bytes=VMEM_LIMIT_BYTES,
        ),
    )(x, w, b)
    if fast:
        out = out.reshape(N, H, W, Cout)
    return out


def resblock_chain(stage, x):
    """All resblocks of a stage fused in one pallas_call.  x: (N,H,W,C) f32."""
    w1, b1, w2, b2 = stage
    nblk = int(w1.shape[0])
    N, H, W, C = x.shape
    fast = _FAST_CONV
    if fast:
        out_shape = jax.ShapeDtypeStruct((N, H, W * C), jnp.float32)
        out_spec = pl.BlockSpec((1, H, W * C), lambda n: (n, 0, 0))
    else:
        out_shape = jax.ShapeDtypeStruct((N, H, W, C), jnp.float32)
        out_spec = pl.BlockSpec((1, H, W, C), lambda n: (n, 0, 0, 0))
    out = pl.pallas_call(
        functools.partial(_resblock_chain_kernel, H=H, W=W, C=C, nblk=nblk, fast=fast),
        out_shape=out_shape,
        grid_spec=pltpu.PrefetchScalarGridSpec(
            num_scalar_prefetch=0,
            grid=(N,),
            in_specs=[
                pl.BlockSpec((1, H, W, C), lambda n: (n, 0, 0, 0)),
                pl.BlockSpec((nblk, 9 * C, C), lambda n: (0, 0, 0)),
                pl.BlockSpec((nblk, 1, C), lambda n: (0, 0, 0)),
                pl.BlockSpec((nblk, 9 * C, C), lambda n: (0, 0, 0)),
                pl.BlockSpec((nblk, 1, C), lambda n: (0, 0, 0)),
            ],
            out_specs=out_spec,
            scratch_shapes=[pltpu.VMEM((H + 2, W + 2, C), jnp.bfloat16)],
        ),
        compiler_params=pltpu.CompilerParams(
            dimension_semantics=("parallel",),
            vmem_limit_bytes=VMEM_LIMIT_BYTES,
        ),
    )(x, w1, b1, w2, b2)
    if fast:
        out = out.reshape(N, H, W, C)
    return out


def _detect_fast_conv():
    """Probe the fast conv path once; fall back to conservative lowering on failure."""
    global _FAST_CONV
    try:
        _FAST_CONV = True
        x = jnp.zeros((1, 8, 8, 8), jnp.float32)
        w = jnp.zeros((72, 16), jnp.bfloat16)
        b = jnp.zeros((1, 16), jnp.float32)
        jax.block_until_ready(conv3x3(x, (w, b), relu=False))
    except Exception:
        _FAST_CONV = False


# ----------------------------------------------------------------------------
# Pallas kernel 2: streamed relevance — online max/argmax over reference patches
# of the normalized patch correlation (flash-style, tie-break = first index).
# ----------------------------------------------------------------------------
def _rel_kernel(q_ref, k_ref, s_ref, i_ref, m_sc, a_sc, *, pr_actual, tkr):
    kr = pl.program_id(2)

    @pl.when(kr == 0)
    def _():
        m_sc[...] = jnp.full_like(m_sc, -jnp.inf)
        a_sc[...] = jnp.zeros_like(a_sc)

    # bf16 operands, f32 accumulation on the MXU.
    scores = lax.dot_general(q_ref[0], k_ref[0], (((1,), (1,)), ((), ())),
                             preferred_element_type=jnp.float32)   # (tq, tkr)
    col = kr * tkr + lax.broadcasted_iota(jnp.int32, scores.shape, 1)
    scores = jnp.where(col < pr_actual, scores, -jnp.inf)          # mask padded refs

    # Column layout (tq, 1): natural output of the lane reduction, no per-step relayout.
    bm = jnp.max(scores, axis=-1, keepdims=True)                   # (tq, 1)
    ba = jnp.min(jnp.where(scores == bm, col, pr_actual), axis=-1, keepdims=True)
    better = bm > m_sc[...]          # strict > keeps earlier block => first-index ties
    a_sc[...] = jnp.where(better, ba, a_sc[...])
    m_sc[...] = jnp.where(better, bm, m_sc[...])

    @pl.when(kr == pl.num_programs(2) - 1)
    def _():
        s_ref[...] = m_sc[...].reshape(s_ref.shape)
        i_ref[...] = a_sc[...].reshape(i_ref.shape)


def relevance(qn, kn):
    """qn: (N,Pq,D), kn: (N,Pr,D) f32 normalized -> (S (N,Pq) f32, idx (N,Pq) int32)."""
    N, Pq, D = qn.shape
    _, Pr, _ = kn.shape
    pq_pad = -(-Pq // 128) * 128
    tq = 256 if pq_pad % 256 == 0 else 128          # query tile ("parallel" axis)
    tkr = REL_TKR
    pr_pad = -(-Pr // tkr) * tkr
    qp = jnp.pad(qn, ((0, 0), (0, pq_pad - Pq), (0, 0))).astype(jnp.bfloat16)
    kp = jnp.pad(kn, ((0, 0), (0, pr_pad - Pr), (0, 0))).astype(jnp.bfloat16)
    s, idx = pl.pallas_call(
        functools.partial(_rel_kernel, pr_actual=Pr, tkr=tkr),
        out_shape=(
            jax.ShapeDtypeStruct((N, pq_pad, 1), jnp.float32),
            jax.ShapeDtypeStruct((N, pq_pad, 1), jnp.int32),
        ),
        grid_spec=pltpu.PrefetchScalarGridSpec(
            num_scalar_prefetch=0,
            grid=(N, pq_pad // tq, pr_pad // tkr),
            in_specs=[
                pl.BlockSpec((1, tq, D), lambda n, q, r: (n, q, 0)),
                pl.BlockSpec((1, tkr, D), lambda n, q, r: (n, r, 0)),
            ],
            out_specs=(
                pl.BlockSpec((1, tq, 1), lambda n, q, r: (n, q, 0)),
                pl.BlockSpec((1, tq, 1), lambda n, q, r: (n, q, 0)),
            ),
            scratch_shapes=[
                pltpu.VMEM((tq, 1), jnp.float32),
                pltpu.VMEM((tq, 1), jnp.int32),
            ],
        ),
        compiler_params=pltpu.CompilerParams(
            dimension_semantics=("parallel", "parallel", "arbitrary"),
            vmem_limit_bytes=VMEM_LIMIT_BYTES,
        ),
    )(qp, kp)
    return s.reshape(N, pq_pad)[:, :Pq], idx.reshape(N, pq_pad)[:, :Pq]


# ----------------------------------------------------------------------------
# JAX glue (NHWC layout): patch extract/fold (shifted slices, no gather/scatter),
# pooling, shuffle, layout converts
# ----------------------------------------------------------------------------
def nchw_to_nhwc(x):
    return jnp.transpose(x, (0, 2, 3, 1))


def nhwc_to_nchw(x):
    return jnp.transpose(x, (0, 3, 1, 2))


def extract_patches(x, k, stride, pad):
    """x: (N,H,W,C) -> (N, L, k*k*C); patch feature order = (ky, kx, C)."""
    N, H, W, C = x.shape
    xp = jnp.pad(x, ((0, 0), (pad, pad), (pad, pad), (0, 0)))
    oh = (H + 2 * pad - k) // stride + 1
    ow = (W + 2 * pad - k) // stride + 1
    pieces = []
    for ky in range(k):
        for kx in range(k):
            sl = lax.slice(xp, (0, ky, kx, 0),
                           (N, ky + (oh - 1) * stride + 1,
                            kx + (ow - 1) * stride + 1, C),
                           (1, stride, stride, 1))                 # (N, oh, ow, C)
            pieces.append(sl)
    p = jnp.stack(pieces, axis=3)                                  # (N, oh, ow, k*k, C)
    return p.reshape(N, oh * ow, k * k * C)


def fold_patches(p, out_h, out_w, C, k, stride, pad):
    """Inverse of extract_patches with overlap-add (F.fold sum semantics, no divisor)."""
    N, L, _ = p.shape
    oh = (out_h + 2 * pad - k) // stride + 1
    ow = (out_w + 2 * pad - k) // stride + 1
    assert oh * ow == L
    Hp, Wp = out_h + 2 * pad, out_w + 2 * pad
    p = p.reshape(N, oh, ow, k, k, C)
    span_h = (oh - 1) * stride + 1
    span_w = (ow - 1) * stride + 1
    out = jnp.zeros((N, Hp, Wp, C), p.dtype)
    zero = jnp.zeros((), p.dtype)
    for ky in range(k):
        for kx in range(k):
            piece = p[:, :, :, ky, kx, :]                          # (N, oh, ow, C)
            cfg = ((0, 0, 0),
                   (ky, Hp - ky - span_h, stride - 1),
                   (kx, Wp - kx - span_w, stride - 1),
                   (0, 0, 0))
            out = out + lax.pad(piece, zero, cfg)
    return out[:, pad:pad + out_h, pad:pad + out_w, :]


def avg_pool2(x):
    N, H, W, C = x.shape
    return x.reshape(N, H // 2, 2, W // 2, 2, C).mean(axis=(2, 4))


def pixel_shuffle(x, r=2):
    N, H, W, C = x.shape
    Co = C // (r * r)
    x = x.reshape(N, H, W, Co, r, r).transpose(0, 1, 4, 2, 5, 3)
    return x.reshape(N, H * r, W * r, Co)


def upsample_nearest(x, r):
    return jnp.repeat(jnp.repeat(x, r, axis=1), r, axis=2)


# ----------------------------------------------------------------------------
# Sub-modules (NHWC internally, prepped weights)
# ----------------------------------------------------------------------------
def FE(pp, x):
    lv1 = conv3x3(x, pp["fe_conv1"], relu=True)                 # full res
    lv2 = conv3x3(avg_pool2(lv1), pp["fe_conv2"], relu=True)    # 1/2
    lv3 = conv3x3(avg_pool2(lv2), pp["fe_conv3"], relu=True)    # 1/4
    return lv1, lv2, lv3


def search_transfer(lrsr_lv3, refsr_lv3, ref_lv1, ref_lv2, ref_lv3):
    N, h, w, C3 = lrsr_lv3.shape
    C2, C1 = ref_lv2.shape[-1], ref_lv1.shape[-1]
    q = extract_patches(lrsr_lv3, 3, 1, 1)       # (N, h*w, 9*C3)
    k = extract_patches(refsr_lv3, 3, 1, 1)      # (N, hr*wr, 9*C3)
    qn = q / jnp.maximum(jnp.linalg.norm(q, axis=-1, keepdims=True), 1e-12)
    kn = k / jnp.maximum(jnp.linalg.norm(k, axis=-1, keepdims=True), 1e-12)
    S_flat, idx = relevance(qn, kn)              # Pallas: streamed max/argmax

    ref3_p = extract_patches(ref_lv3, 3, 1, 1)
    ref2_p = extract_patches(ref_lv2, 6, 2, 2)
    ref1_p = extract_patches(ref_lv1, 12, 4, 4)

    def gather(u):
        # TODO(synk): move to a scalar-prefetch Pallas gather (idx in SMEM) at scale.
        return jnp.take_along_axis(u, idx[:, :, None], axis=1)

    # NOTE: constant /9.0 divisor (not a true F.fold divisor map) matches the TTSR
    # reference code; border patches are intentionally under-weighted.
    T_lv3 = fold_patches(gather(ref3_p), h, w, C3, 3, 1, 1) / 9.0
    T_lv2 = fold_patches(gather(ref2_p), 2 * h, 2 * w, C2, 6, 2, 2) / 9.0
    T_lv1 = fold_patches(gather(ref1_p), 4 * h, 4 * w, C1, 12, 4, 4) / 9.0
    S = S_flat.reshape(N, h, w, 1)
    return S, T_lv3, T_lv2, T_lv1


def CSFI(pp, lr, S, T_lv3, T_lv2, T_lv1):
    x = conv3x3(lr, pp["csfi_head"], relu=True)
    f3 = conv3x3(jnp.concatenate([x, T_lv3], axis=-1), pp["csfi_fuse3"])
    x = x + f3 * S
    x = resblock_chain(pp["csfi_rb3"], x)
    x = pixel_shuffle(conv3x3(x, pp["csfi_up2"], relu=True), 2)
    f2 = conv3x3(jnp.concatenate([x, T_lv2], axis=-1), pp["csfi_fuse2"])
    x = x + f2 * upsample_nearest(S, 2)
    x = resblock_chain(pp["csfi_rb2"], x)
    x = pixel_shuffle(conv3x3(x, pp["csfi_up1"], relu=True), 2)
    f1 = conv3x3(jnp.concatenate([x, T_lv1], axis=-1), pp["csfi_fuse1"])
    x = x + f1 * upsample_nearest(S, 4)
    x = resblock_chain(pp["csfi_rb1"], x)
    return x, T_lv3, T_lv2, T_lv1


def GDE(pp, lr, x_tt, T3, T2, T1):
    dx = lr - jnp.roll(lr, 1, axis=2)
    dy = lr - jnp.roll(lr, 1, axis=1)
    g = jnp.sqrt(dx * dx + dy * dy + 1e-6)
    gx = conv3x3(g, pp["gde_head"], relu=True)
    gx = resblock_chain(pp["gde_rbA"], gx)
    gx = pixel_shuffle(conv3x3(gx, pp["gde_up1"], relu=True), 2)
    gx = resblock_chain(pp["gde_rbB"], gx)
    gx = pixel_shuffle(conv3x3(gx, pp["gde_up2"], relu=True), 2)
    fused = conv3x3(jnp.concatenate([x_tt, gx, T1], axis=-1), pp["gde_fuse"], relu=True)
    sr = conv3x3(fused, pp["gde_tail"])
    return sr


def extracter_forward(pp, lr, lrsr, ref, refsr):
    N = lr.shape[0]
    lr_h = nchw_to_nhwc(lr)
    # Batch the three FE towers (shared weights) into one pass over 3N images.
    stacked = jnp.concatenate(
        [(lrsr + 1.0) / 2.0, (refsr + 1.0) / 2.0, (ref + 1.0) / 2.0], axis=0)
    lv1, lv2, lv3 = FE(pp, nchw_to_nhwc(stacked))
    lrsr_lv3 = lv3[:N]
    refsr_lv3 = lv3[N:2 * N]
    ref_lv1, ref_lv2, ref_lv3 = lv1[2 * N:], lv2[2 * N:], lv3[2 * N:]

    S, T_lv3, T_lv2, T_lv1 = search_transfer(lrsr_lv3, refsr_lv3,
                                             ref_lv1, ref_lv2, ref_lv3)
    x_tt, T3, T2, T1 = CSFI(pp, lr_h, S, T_lv3, T_lv2, T_lv1)
    sr = GDE(pp, lr_h, x_tt, T3, T2, T1)
    return nhwc_to_nchw(sr), nhwc_to_nchw(S)


# ----------------------------------------------------------------------------
# Parameter init (raw torch layout) and one-time prep (transposed bf16 weights)
# ----------------------------------------------------------------------------
def init_params(key, n_feats, nrb, ngb):
    params = {}
    state = [key]

    def nk():
        state[0], sub = jax.random.split(state[0])
        return sub

    def conv_p(name, cin, cout):
        w = jax.random.normal(nk(), (cout, cin, 3, 3), jnp.float32) * (2.0 / (cin * 9)) ** 0.5
        params[name] = (w, jnp.zeros((cout,), jnp.float32))

    nf = n_feats
    conv_p("fe_conv1", 3, nf)
    conv_p("fe_conv2", nf, nf)
    conv_p("fe_conv3", nf, nf)

    conv_p("csfi_head", 3, nf)
    conv_p("csfi_fuse3", 2 * nf, nf)
    for i in range(nrb[0]):
        conv_p(f"csfi_rb3_{i}_a", nf, nf)
        conv_p(f"csfi_rb3_{i}_b", nf, nf)
    conv_p("csfi_up2", nf, 4 * nf)
    conv_p("csfi_fuse2", 2 * nf, nf)
    for i in range(nrb[1]):
        conv_p(f"csfi_rb2_{i}_a", nf, nf)
        conv_p(f"csfi_rb2_{i}_b", nf, nf)
    conv_p("csfi_up1", nf, 4 * nf)
    conv_p("csfi_fuse1", 2 * nf, nf)
    for i in range(nrb[2]):
        conv_p(f"csfi_rb1_{i}_a", nf, nf)
        conv_p(f"csfi_rb1_{i}_b", nf, nf)

    conv_p("gde_head", 3, nf)
    for i in range(ngb[0]):
        conv_p(f"gde_rbA_{i}_a", nf, nf)
        conv_p(f"gde_rbA_{i}_b", nf, nf)
    conv_p("gde_up1", nf, 4 * nf)
    for i in range(ngb[1]):
        conv_p(f"gde_rbB_{i}_a", nf, nf)
        conv_p(f"gde_rbB_{i}_b", nf, nf)
    conv_p("gde_up2", nf, 4 * nf)
    conv_p("gde_fuse", 3 * nf, nf)
    conv_p("gde_tail", nf, 3)
    return params


def prep_rb_stage(params, prefix, nblk):
    w1 = jnp.stack([_prep_w(params[f"{prefix}_{i}_a"][0]) for i in range(nblk)])
    b1 = jnp.stack([_prep_b(params[f"{prefix}_{i}_a"][1]) for i in range(nblk)])
    w2 = jnp.stack([_prep_w(params[f"{prefix}_{i}_b"][0]) for i in range(nblk)])
    b2 = jnp.stack([_prep_b(params[f"{prefix}_{i}_b"][1]) for i in range(nblk)])
    return w1, b1, w2, b2


def prepare_params(params, nrb, ngb):
    pp = {}
    for name in ("fe_conv1", "fe_conv2", "fe_conv3",
                 "csfi_head", "csfi_fuse3", "csfi_up2", "csfi_fuse2",
                 "csfi_up1", "csfi_fuse1",
                 "gde_head", "gde_up1", "gde_up2", "gde_fuse", "gde_tail"):
        pp[name] = prep_conv(params[name])
    pp["csfi_rb3"] = prep_rb_stage(params, "csfi_rb3", nrb[0])
    pp["csfi_rb2"] = prep_rb_stage(params, "csfi_rb2", nrb[1])
    pp["csfi_rb1"] = prep_rb_stage(params, "csfi_rb1", nrb[2])
    pp["gde_rbA"] = prep_rb_stage(params, "gde_rbA", ngb[0])
    pp["gde_rbB"] = prep_rb_stage(params, "gde_rbB", ngb[1])
    return pp


# ----------------------------------------------------------------------------
# Reference helper for lightweight correctness checks
# ----------------------------------------------------------------------------
def _conv_reference(x, w, b, relu):
    """Same numerics as the kernel: bf16 operands, f32 accumulation, f32 epilogue."""
    y = lax.conv_general_dilated(
        x.astype(jnp.bfloat16),
        jnp.transpose(w, (2, 3, 1, 0)).astype(jnp.bfloat16),
        window_strides=(1, 1), padding="SAME",
        dimension_numbers=("NHWC", "HWIO", "NHWC"),
        preferred_element_type=jnp.float32)
    y = y + b.reshape(1, 1, 1, -1)
    return jnp.maximum(y, 0.0) if relu else y


if __name__ == "__main__":
    # args equivalent: num_res_blocks="1+1+1", num_grad_blocks="1+1", n_feats=16, top_k=1
    n_feats = 16
    nrb = (1, 1, 1)
    ngb = (1, 1)

    _detect_fast_conv()   # pick fast lane-dense conv path, or conservative fallback

    key = jax.random.PRNGKey(0)
    kp, kx, kc, kr = jax.random.split(key, 4)
    params = init_params(kp, n_feats, nrb, ngb)
    pp = prepare_params(params, nrb, ngb)

    # --- correctness check: fused conv kernel vs XLA conv (same bf16 numerics) ---
    kc1, kc2, kc3 = jax.random.split(kc, 3)
    xs = jax.random.uniform(kc1, (2, 16, 16, 8), jnp.float32, -1.0, 1.0)
    wt = jax.random.normal(kc2, (16, 8, 3, 3), jnp.float32) * 0.2
    bs = jax.random.normal(kc3, (16,), jnp.float32) * 0.1
    y_kernel = conv3x3(xs, prep_conv((wt, bs)), relu=True)
    y_ref = _conv_reference(xs, wt, bs, relu=True)
    assert jnp.allclose(y_kernel, y_ref, atol=2e-2, rtol=2e-2), "conv kernel mismatch"

    # --- correctness check: fused resblock-chain kernel ---
    w_a = jax.random.normal(kc2, (16, 16, 3, 3), jnp.float32) * 0.15
    w_b = jax.random.normal(kc3, (16, 16, 3, 3), jnp.float32) * 0.15
    b_a, b_b = bs, bs * 0.5
    stage = (jnp.stack([_prep_w(w_a)]), jnp.stack([_prep_b(b_a)]),
             jnp.stack([_prep_w(w_b)]), jnp.stack([_prep_b(b_b)]))
    xrb = jax.random.uniform(kc1, (2, 16, 16, 16), jnp.float32, -1.0, 1.0)
    y_rb = resblock_chain(stage, xrb)
    y1 = _conv_reference(xrb, w_a, b_a, relu=True)
    y2 = _conv_reference(y1, w_b, b_b, relu=False) + xrb
    assert jnp.allclose(y_rb, y2, atol=3e-2, rtol=3e-2), "resblock kernel mismatch"

    # --- correctness check: streamed relevance kernel (multi-block, padded) ---
    kr1, kr2 = jax.random.split(kr)
    qv = jax.random.normal(kr1, (2, 50, 80), jnp.float32)
    kv = jax.random.normal(kr2, (2, 600, 80), jnp.float32)
    qv = qv / jnp.linalg.norm(qv, axis=-1, keepdims=True)
    kv = kv / jnp.linalg.norm(kv, axis=-1, keepdims=True)
    qv = qv.astype(jnp.bfloat16).astype(jnp.float32)   # make products exactly representable
    kv = kv.astype(jnp.bfloat16).astype(jnp.float32)
    S_k, idx_k = relevance(qv, kv)
    scores_ref = jnp.einsum("npd,nqd->npq", qv, kv)
    assert jnp.allclose(S_k, scores_ref.max(-1), atol=2e-3), "relevance max mismatch"
    gathered = jnp.take_along_axis(scores_ref, idx_k[:, :, None], axis=2)[..., 0]
    assert jnp.allclose(gathered, S_k, atol=2e-3), "relevance argmax mismatch"
    assert bool(jnp.all((idx_k >= 0) & (idx_k < 600))), "relevance idx out of range"

    # --- full EXTRACTER forward ---
    N, h, w = 2, 8, 8
    k1, k2, k3, k4 = jax.random.split(kx, 4)
    lr = jax.random.uniform(k1, (N, 3, h, w), jnp.float32, -1.0, 1.0)
    lrsr = jax.random.uniform(k2, (N, 3, 4 * h, 4 * w), jnp.float32, -1.0, 1.0)
    ref = jax.random.uniform(k3, (N, 3, 4 * h, 4 * w), jnp.float32, -1.0, 1.0)
    refsr = jax.random.uniform(k4, (N, 3, 4 * h, 4 * w), jnp.float32, -1.0, 1.0)

    fwd = jax.jit(functools.partial(extracter_forward, pp))
    sr, S = fwd(lr, lrsr, ref, refsr)
    jax.block_until_ready((sr, S))

    assert sr.shape == (N, 3, 4 * h, 4 * w), sr.shape
    assert S.shape == (N, 1, h, w), S.shape
    assert bool(jnp.all(jnp.isfinite(sr))) and bool(jnp.all(jnp.isfinite(S)))
    print("KERNEL_OK")
</pallas_src>

<mosaic_0001>
module attributes {stable_mosaic.version = 11 : i64} {
  func.func @_conv_kernel(%arg0: i32, %arg1: memref<1x8x8x8xf32, #tpu.memory_space<vmem>>, %arg2: memref<72x16xbf16, #tpu.memory_space<vmem>>, %arg3: memref<1x16xf32, #tpu.memory_space<vmem>>, %arg4: memref<1x8x128xf32, #tpu.memory_space<vmem>>, %arg5: memref<10x10x8xbf16, #tpu.memory_space<vmem>>) attributes {dimension_semantics = [#tpu.dimension_semantics<parallel>], iteration_bounds = array<i64: 1>, scalar_prefetch = 0 : i64, scratch_operands = 1 : i64, tpu.core_type = #tpu.core_type<tc>, window_params = [{transform_indices = @transform_0, window_bounds = array<i64: 1, 8, 8, 8>}, {pipeline_mode = #tpu.pipeline_mode<synchronous>, transform_indices = @transform_1, window_bounds = array<i64: 72, 16>}, {pipeline_mode = #tpu.pipeline_mode<synchronous>, transform_indices = @transform_2, window_bounds = array<i64: 1, 16>}, {transform_indices = @transform_3, window_bounds = array<i64: 1, 8, 128>}]} {
    %cst = arith.constant 0.000000e+00 : bf16
    %0 = vector.broadcast %cst : bf16 to vector<1x10x8xbf16>
    %cst_0 = arith.constant 0.000000e+00 : bf16
    %1 = vector.broadcast %cst_0 : bf16 to vector<10x1x8xbf16>
    %c0 = arith.constant 0 : index
    %c0_1 = arith.constant 0 : index
    %c0_2 = arith.constant 0 : index
    %2 = vector.load %arg5[%c0, %c0_1, %c0_2] : memref<10x10x8xbf16, #tpu.memory_space<vmem>>, vector<1x10x8xbf16>
    tpu.vector_store %arg5[%c0, %c0_1, %c0_2], %0 {strides = array<i32>} : memref<10x10x8xbf16, #tpu.memory_space<vmem>>, vector<1x10x8xbf16>,
    %c9 = arith.constant 9 : index
    %c0_3 = arith.constant 0 : index
    %c0_4 = arith.constant 0 : index
    %3 = vector.load %arg5[%c9, %c0_3, %c0_4] : memref<10x10x8xbf16, #tpu.memory_space<vmem>>, vector<1x10x8xbf16>
    tpu.vector_store %arg5[%c9, %c0_3, %c0_4], %0 {strides = array<i32>} : memref<10x10x8xbf16, #tpu.memory_space<vmem>>, vector<1x10x8xbf16>,
    %c0_5 = arith.constant 0 : index
    %c0_6 = arith.constant 0 : index
    %c0_7 = arith.constant 0 : index
    %4 = vector.load %arg5[%c0_5, %c0_6, %c0_7] : memref<10x10x8xbf16, #tpu.memory_space<vmem>>, vector<10x1x8xbf16>
    tpu.vector_store %arg5[%c0_5, %c0_6, %c0_7], %1 {strides = array<i32>} : memref<10x10x8xbf16, #tpu.memory_space<vmem>>, vector<10x1x8xbf16>,
    %c0_8 = arith.constant 0 : index
    %c9_9 = arith.constant 9 : index
    %c0_10 = arith.constant 0 : index
    %5 = vector.load %arg5[%c0_8, %c9_9, %c0_10] : memref<10x10x8xbf16, #tpu.memory_space<vmem>>, vector<10x1x8xbf16>
    tpu.vector_store %arg5[%c0_8, %c9_9, %c0_10], %1 {strides = array<i32>} : memref<10x10x8xbf16, #tpu.memory_space<vmem>>, vector<10x1x8xbf16>,
    %c0_11 = arith.constant 0 : index
    %c0_12 = arith.constant 0 : index
    %c0_13 = arith.constant 0 : index
    %c0_14 = arith.constant 0 : index
    %6 = vector.load %arg1[%c0_11, %c0_12, %c0_13, %c0_14] : memref<1x8x8x8xf32, #tpu.memory_space<vmem>>, vector<1x8x8x8xf32>
    %7 = vector.shape_cast %6 : vector<1x8x8x8xf32> to vector<8x8x8xf32>
    %8 = arith.truncf %7 : vector<8x8x8xf32> to vector<8x8x8xbf16>
    %c1 = arith.constant 1 : index
    %c1_15 = arith.constant 1 : index
    %c0_16 = arith.constant 0 : index
    %9 = vector.load %arg5[%c1, %c1_15, %c0_16] : memref<10x10x8xbf16, #tpu.memory_space<vmem>>, vector<8x8x8xbf16>
    tpu.vector_store %arg5[%c1, %c1_15, %c0_16], %8 {strides = array<i32>} : memref<10x10x8xbf16, #tpu.memory_space<vmem>>, vector<8x8x8xbf16>,
    %c0_17 = arith.constant 0 : index
    %c0_18 = arith.constant 0 : index
    %10 = vector.load %arg2[%c0_17, %c0_18] : memref<72x16xbf16, #tpu.memory_space<vmem>>, vector<72x16xbf16>
    %c0_19 = arith.constant 0 : index
    %c0_20 = arith.constant 0 : index
    %c0_21 = arith.constant 0 : index
    %11 = vector.load %arg5[%c0_19, %c0_20, %c0_21] : memref<10x10x8xbf16, #tpu.memory_space<vmem>>, vector<8x8x8xbf16>
    %12 = vector.shape_cast %11 : vector<8x8x8xbf16> to vector<64x8xbf16>
    %c0_22 = arith.constant 0 : index
    %c1_23 = arith.constant 1 : index
    %c0_24 = arith.constant 0 : index
    %13 = vector.load %arg5[%c0_22, %c1_23, %c0_24] : memref<10x10x8xbf16, #tpu.memory_space<vmem>>, vector<8x8x8xbf16>
    %14 = vector.shape_cast %13 : vector<8x8x8xbf16> to vector<64x8xbf16>
    %c0_25 = arith.constant 0 : index
    %c2 = arith.constant 2 : index
    %c0_26 = arith.constant 0 : index
    %15 = vector.load %arg5[%c0_25, %c2, %c0_26] : memref<10x10x8xbf16, #tpu.memory_space<vmem>>, vector<8x8x8xbf16>
    %16 = vector.shape_cast %15 : vector<8x8x8xbf16> to vector<64x8xbf16>
    %c1_27 = arith.constant 1 : index
    %c0_28 = arith.constant 0 : index
    %c0_29 = arith.constant 0 : index
    %17 = vector.load %arg5[%c1_27, %c0_28, %c0_29] : memref<10x10x8xbf16, #tpu.memory_space<vmem>>, vector<8x8x8xbf16>
    %18 = vector.shape_cast %17 : vector<8x8x8xbf16> to vector<64x8xbf16>
    %c1_30 = arith.constant 1 : index
    %c1_31 = arith.constant 1 : index
    %c0_32 = arith.constant 0 : index
    %19 = vector.load %arg5[%c1_30, %c1_31, %c0_32] : memref<10x10x8xbf16, #tpu.memory_space<vmem>>, vector<8x8x8xbf16>
    %20 = vector.shape_cast %19 : vector<8x8x8xbf16> to vector<64x8xbf16>
    %c1_33 = arith.constant 1 : index
    %c2_34 = arith.constant 2 : index
    %c0_35 = arith.constant 0 : index
    %21 = vector.load %arg5[%c1_33, %c2_34, %c0_35] : memref<10x10x8xbf16, #tpu.memory_space<vmem>>, vector<8x8x8xbf16>
    %22 = vector.shape_cast %21 : vector<8x8x8xbf16> to vector<64x8xbf16>
    %c2_36 = arith.constant 2 : index
    %c0_37 = arith.constant 0 : index
    %c0_38 = arith.constant 0 : index
    %23 = vector.load %arg5[%c2_36, %c0_37, %c0_38] : memref<10x10x8xbf16, #tpu.memory_space<vmem>>, vector<8x8x8xbf16>
    %24 = vector.shape_cast %23 : vector<8x8x8xbf16> to vector<64x8xbf16>
    %c2_39 = arith.constant 2 : index
    %c1_40 = arith.constant 1 : index
    %c0_41 = arith.constant 0 : index
    %25 = vector.load %arg5[%c2_39, %c1_40, %c0_41] : memref<10x10x8xbf16, #tpu.memory_space<vmem>>, vector<8x8x8xbf16>
    %26 = vector.shape_cast %25 : vector<8x8x8xbf16> to vector<64x8xbf16>
    %c2_42 = arith.constant 2 : index
    %c2_43 = arith.constant 2 : index
    %c0_44 = arith.constant 0 : index
    %27 = vector.load %arg5[%c2_42, %c2_43, %c0_44] : memref<10x10x8xbf16, #tpu.memory_space<vmem>>, vector<8x8x8xbf16>
    %28 = vector.shape_cast %27 : vector<8x8x8xbf16> to vector<64x8xbf16>
    %29 = tpu.concatenate %12, %14, %16, %18, %20, %22, %24, %26, %28 in 1 : vector<64x8xbf16>, vector<64x8xbf16>, vector<64x8xbf16>, vector<64x8xbf16>, vector<64x8xbf16>, vector<64x8xbf16>, vector<64x8xbf16>, vector<64x8xbf16>, vector<64x8xbf16> -> vector<64x72xbf16>
    %cst_45 = arith.constant dense<0.000000e+00> : vector<64x16xf32>
    %30 = tpu.matmul %29, %10, %cst_45 {dimension_numbers = #tpu.dot_dimension_numbers<[1], [0], [0], [1], [0, 0, 1, 1], [], []>} : vector<64x72xbf16>, vector<72x16xbf16>, vector<64x16xf32> -> vector<64x16xf32>
    %c0_46 = arith.constant 0 : index
    %c0_47 = arith.constant 0 : index
    %31 = vector.load %arg3[%c0_46, %c0_47] : memref<1x16xf32, #tpu.memory_space<vmem>>, vector<1x16xf32>
    %32 = vector.broadcast %31 : vector<1x16xf32> to vector<64x16xf32>
    %33 = arith.addf %30, %32 : vector<64x16xf32>
    %34 = vector.shape_cast %33 : vector<64x16xf32> to vector<1x8x128xf32>
    %c0_48 = arith.constant 0 : index
    %c0_49 = arith.constant 0 : index
    %c0_50 = arith.constant 0 : index
    %35 = vector.load %arg4[%c0_48, %c0_49, %c0_50] : memref<1x8x128xf32, #tpu.memory_space<vmem>>, vector<1x8x128xf32>
    tpu.vector_store %arg4[%c0_48, %c0_49, %c0_50], %34 {strides = array<i32>} : memref<1x8x128xf32, #tpu.memory_space<vmem>>, vector<1x8x128xf32>,
    return
  }
  func.func @transform_0(%arg0: i32) -> (i32, i32, i32, i32) {
    %c0_i32 = arith.constant 0 : i32
    %c0_i32_0 = arith.constant 0 : i32
    %c0_i32_1 = arith.constant 0 : i32
    %c0_i32_2 = arith.constant 0 : i32
    return %arg0, %c0_i32, %c0_i32_0, %c0_i32_1 : i32, i32, i32, i32
  }
  func.func @transform_1(%arg0: i32) -> (i32, i32) {
    %c0_i32 = arith.constant 0 : i32
    %c0_i32_0 = arith.constant 0 : i32
    %c0_i32_1 = arith.constant 0 : i32
    return %c0_i32, %c0_i32_0 : i32, i32
  }
  func.func @transform_2(%arg0: i32) -> (i32, i32) {
    %c0_i32 = arith.constant 0 : i32
    %c0_i32_0 = arith.constant 0 : i32
    %c0_i32_1 = arith.constant 0 : i32
    return %c0_i32, %c0_i32_0 : i32, i32
  }
  func.func @transform_3(%arg0: i32) -> (i32, i32, i32) {
    %c0_i32 = arith.constant 0 : i32
    %c0_i32_0 = arith.constant 0 : i32
    %c0_i32_1 = arith.constant 0 : i32
    return %arg0, %c0_i32, %c0_i32_0 : i32, i32, i32
  }
}

module attributes {stable_mosaic.version = 11 : i64} {
  func.func @_conv_kernel(%arg0: i32, %arg1: memref<1x16x16x8xf32, #tpu.memory_space<vmem>>, %arg2: memref<72x16xbf16, #tpu.memory_space<vmem>>, %arg3: memref<1x16xf32, #tpu.memory_space<vmem>>, %arg4: memref<1x16x16x16xf32, #tpu.memory_space<vmem>>, %arg5: memref<18x18x8xbf16, #tpu.memory_space<vmem>>) attributes {dimension_semantics = [#tpu.dimension_semantics<parallel>], iteration_bounds = array<i64: 2>, scalar_prefetch = 0 : i64, scratch_operands = 1 : i64, tpu.core_type = #tpu.core_type<tc>, window_params = [{transform_indices = @transform_0, window_bounds = array<i64: 1, 16, 16, 8>}, {pipeline_mode = #tpu.pipeline_mode<synchronous>, transform_indices = @transform_1, window_bounds = array<i64: 72, 16>}, {pipeline_mode = #tpu.pipeline_mode<synchronous>, transform_indices = @transform_2, window_bounds = array<i64: 1, 16>}, {transform_indices = @transform_3, window_bounds = array<i64: 1, 16, 16, 16>}]} {
    %cst = arith.constant 0.000000e+00 : bf16
    %0 = vector.broadcast %cst : bf16 to vector<1x18x8xbf16>
    %cst_0 = arith.constant 0.000000e+00 : bf16
    %1 = vector.broadcast %cst_0 : bf16 to vector<18x1x8xbf16>
    %c0 = arith.constant 0 : index
    %c0_1 = arith.constant 0 : index
    %c0_2 = arith.constant 0 : index
    %2 = vector.load %arg5[%c0, %c0_1, %c0_2] : memref<18x18x8xbf16, #tpu.memory_space<vmem>>, vector<1x18x8xbf16>
    tpu.vector_store %arg5[%c0, %c0_1, %c0_2], %0 {strides = array<i32>} : memref<18x18x8xbf16, #tpu.memory_space<vmem>>, vector<1x18x8xbf16>,
    %c17 = arith.constant 17 : index
    %c0_3 = arith.constant 0 : index
    %c0_4 = arith.constant 0 : index
    %3 = vector.load %arg5[%c17, %c0_3, %c0_4] : memref<18x18x8xbf16, #tpu.memory_space<vmem>>, vector<1x18x8xbf16>
    tpu.vector_store %arg5[%c17, %c0_3, %c0_4], %0 {strides = array<i32>} : memref<18x18x8xbf16, #tpu.memory_space<vmem>>, vector<1x18x8xbf16>,
    %c0_5 = arith.constant 0 : index
    %c0_6 = arith.constant 0 : index
    %c0_7 = arith.constant 0 : index
    %4 = vector.load %arg5[%c0_5, %c0_6, %c0_7] : memref<18x18x8xbf16, #tpu.memory_space<vmem>>, vector<18x1x8xbf16>
    tpu.vector_store %arg5[%c0_5, %c0_6, %c0_7], %1 {strides = array<i32>} : memref<18x18x8xbf16, #tpu.memory_space<vmem>>, vector<18x1x8xbf16>,
    %c0_8 = arith.constant 0 : index
    %c17_9 = arith.constant 17 : index
    %c0_10 = arith.constant 0 : index
    %5 = vector.load %arg5[%c0_8, %c17_9, %c0_10] : memref<18x18x8xbf16, #tpu.memory_space<vmem>>, vector<18x1x8xbf16>
    tpu.vector_store %arg5[%c0_8, %c17_9, %c0_10], %1 {strides = array<i32>} : memref<18x18x8xbf16, #tpu.memory_space<vmem>>, vector<18x1x8xbf16>,
    %c0_11 = arith.constant 0 : index
    %c0_12 = arith.constant 0 : index
    %c0_13 = arith.constant 0 : index
    %c0_14 = arith.constant 0 : index
    %6 = vector.load %arg1[%c0_11, %c0_12, %c0_13, %c0_14] : memref<1x16x16x8xf32, #tpu.memory_space<vmem>>, vector<1x16x16x8xf32>
    %7 = vector.shape_cast %6 : vector<1x16x16x8xf32> to vector<16x16x8xf32>
    %8 = arith.truncf %7 : vector<16x16x8xf32> to vector<16x16x8xbf16>
    %c1 = arith.constant 1 : index
    %c1_15 = arith.constant 1 : index
    %c0_16 = arith.constant 0 : index
    %9 = vector.load %arg5[%c1, %c1_15, %c0_16] : memref<18x18x8xbf16, #tpu.memory_space<vmem>>, vector<16x16x8xbf16>
    tpu.vector_store %arg5[%c1, %c1_15, %c0_16], %8 {strides = array<i32>} : memref<18x18x8xbf16, #tpu.memory_space<vmem>>, vector<16x16x8xbf16>,
    %c0_17 = arith.constant 0 : index
    %c0_18 = arith.constant 0 : index
    %10 = vector.load %arg2[%c0_17, %c0_18] : memref<72x16xbf16, #tpu.memory_space<vmem>>, vector<72x16xbf16>
    %cst_19 = arith.constant 0.000000e+00 : f32
    %11 = vector.broadcast %cst_19 : f32 to vector<256x16xf32>
    %c0_20 = arith.constant 0 : index
    %c0_21 = arith.constant 0 : index
    %c0_22 = arith.constant 0 : index
    %12 = vector.load %arg5[%c0_20, %c0_21, %c0_22] : memref<18x18x8xbf16, #tpu.memory_space<vmem>>, vector<16x16x8xbf16>
    %13 = vector.shape_cast %12 : vector<16x16x8xbf16> to vector<256x8xbf16>
    %14 = vector.extract_strided_slice %10 {offsets = [0, 0], sizes = [8, 16], strides = [1, 1]} : vector<72x16xbf16> to vector<8x16xbf16>
    %cst_23 = arith.constant dense<0.000000e+00> : vector<256x16xf32>
    %15 = tpu.matmul %13, %14, %cst_23 {dimension_numbers = #tpu.dot_dimension_numbers<[1], [0], [0], [1], [0, 0, 1, 1], [], []>} : vector<256x8xbf16>, vector<8x16xbf16>, vector<256x16xf32> -> vector<256x16xf32>
    %16 = arith.addf %11, %15 : vector<256x16xf32>
    %c0_24 = arith.constant 0 : index
    %c1_25 = arith.constant 1 : index
    %c0_26 = arith.constant 0 : index
    %17 = vector.load %arg5[%c0_24, %c1_25, %c0_26] : memref<18x18x8xbf16, #tpu.memory_space<vmem>>, vector<16x16x8xbf16>
    %18 = vector.shape_cast %17 : vector<16x16x8xbf16> to vector<256x8xbf16>
    %19 = vector.extract_strided_slice %10 {offsets = [8, 0], sizes = [8, 16], strides = [1, 1]} : vector<72x16xbf16> to vector<8x16xbf16>
    %cst_27 = arith.constant dense<0.000000e+00> : vector<256x16xf32>
    %20 = tpu.matmul %18, %19, %cst_27 {dimension_numbers = #tpu.dot_dimension_numbers<[1], [0], [0], [1], [0, 0, 1, 1], [], []>} : vector<256x8xbf16>, vector<8x16xbf16>, vector<256x16xf32> -> vector<256x16xf32>
    %21 = arith.addf %16, %20 : vector<256x16xf32>
    %c0_28 = arith.constant 0 : index
    %c2 = arith.constant 2 : index
    %c0_29 = arith.constant 0 : index
    %22 = vector.load %arg5[%c0_28, %c2, %c0_29] : memref<18x18x8xbf16, #tpu.memory_space<vmem>>, vector<16x16x8xbf16>
    %23 = vector.shape_cast %22 : vector<16x16x8xbf16> to vector<256x8xbf16>
    %24 = vector.extract_strided_slice %10 {offsets = [16, 0], sizes = [8, 16], strides = [1, 1]} : vector<72x16xbf16> to vector<8x16xbf16>
    %cst_30 = arith.constant dense<0.000000e+00> : vector<256x16xf32>
    %25 = tpu.matmul %23, %24, %cst_30 {dimension_numbers = #tpu.dot_dimension_numbers<[1], [0], [0], [1], [0, 0, 1, 1], [], []>} : vector<256x8xbf16>, vector<8x16xbf16>, vector<256x16xf32> -> vector<256x16xf32>
    %26 = arith.addf %21, %25 : vector<256x16xf32>
    %c1_31 = arith.constant 1 : index
    %c0_32 = arith.constant 0 : index
    %c0_33 = arith.constant 0 : index
    %27 = vector.load %arg5[%c1_31, %c0_32, %c0_33] : memref<18x18x8xbf16, #tpu.memory_space<vmem>>, vector<16x16x8xbf16>
    %28 = vector.shape_cast %27 : vector<16x16x8xbf16> to vector<256x8xbf16>
    %29 = vector.extract_strided_slice %10 {offsets = [24, 0], sizes = [8, 16], strides = [1, 1]} : vector<72x16xbf16> to vector<8x16xbf16>
    %cst_34 = arith.constant dense<0.000000e+00> : vector<256x16xf32>
    %30 = tpu.matmul %28, %29, %cst_34 {dimension_numbers = #tpu.dot_dimension_numbers<[1], [0], [0], [1], [0, 0, 1, 1], [], []>} : vector<256x8xbf16>, vector<8x16xbf16>, vector<256x16xf32> -> vector<256x16xf32>
    %31 = arith.addf %26, %30 : vector<256x16xf32>
    %c1_35 = arith.constant 1 : index
    %c1_36 = arith.constant 1 : index
    %c0_37 = arith.constant 0 : index
    %32 = vector.load %arg5[%c1_35, %c1_36, %c0_37] : memref<18x18x8xbf16, #tpu.memory_space<vmem>>, vector<16x16x8xbf16>
    %33 = vector.shape_cast %32 : vector<16x16x8xbf16> to vector<256x8xbf16>
    %34 = vector.extract_strided_slice %10 {offsets = [32, 0], sizes = [8, 16], strides = [1, 1]} : vector<72x16xbf16> to vector<8x16xbf16>
    %cst_38 = arith.constant dense<0.000000e+00> : vector<256x16xf32>
    %35 = tpu.matmul %33, %34, %cst_38 {dimension_numbers = #tpu.dot_dimension_numbers<[1], [0], [0], [1], [0, 0, 1, 1], [], []>} : vector<256x8xbf16>, vector<8x16xbf16>, vector<256x16xf32> -> vector<256x16xf32>
    %36 = arith.addf %31, %35 : vector<256x16xf32>
    %c1_39 = arith.constant 1 : index
    %c2_40 = arith.constant 2 : index
    %c0_41 = arith.constant 0 : index
    %37 = vector.load %arg5[%c1_39, %c2_40, %c0_41] : memref<18x18x8xbf16, #tpu.memory_space<vmem>>, vector<16x16x8xbf16>
    %38 = vector.shape_cast %37 : vector<16x16x8xbf16> to vector<256x8xbf16>
    %39 = vector.extract_strided_slice %10 {offsets = [40, 0], sizes = [8, 16], strides = [1, 1]} : vector<72x16xbf16> to vector<8x16xbf16>
    %cst_42 = arith.constant dense<0.000000e+00> : vector<256x16xf32>
    %40 = tpu.matmul %38, %39, %cst_42 {dimension_numbers = #tpu.dot_dimension_numbers<[1], [0], [0], [1], [0, 0, 1, 1], [], []>} : vector<256x8xbf16>, vector<8x16xbf16>, vector<256x16xf32> -> vector<256x16xf32>
    %41 = arith.addf %36, %40 : vector<256x16xf32>
    %c2_43 = arith.constant 2 : index
    %c0_44 = arith.constant 0 : index
    %c0_45 = arith.constant 0 : index
    %42 = vector.load %arg5[%c2_43, %c0_44, %c0_45] : memref<18x18x8xbf16, #tpu.memory_space<vmem>>, vector<16x16x8xbf16>
    %43 = vector.shape_cast %42 : vector<16x16x8xbf16> to vector<256x8xbf16>
    %44 = vector.extract_strided_slice %10 {offsets = [48, 0], sizes = [8, 16], strides = [1, 1]} : vector<72x16xbf16> to vector<8x16xbf16>
    %cst_46 = arith.constant dense<0.000000e+00> : vector<256x16xf32>
    %45 = tpu.matmul %43, %44, %cst_46 {dimension_numbers = #tpu.dot_dimension_numbers<[1], [0], [0], [1], [0, 0, 1, 1], [], []>} : vector<256x8xbf16>, vector<8x16xbf16>, vector<256x16xf32> -> vector<256x16xf32>
    %46 = arith.addf %41, %45 : vector<256x16xf32>
    %c2_47 = arith.constant 2 : index
    %c1_48 = arith.constant 1 : index
    %c0_49 = arith.constant 0 : index
    %47 = vector.load %arg5[%c2_47, %c1_48, %c0_49] : memref<18x18x8xbf16, #tpu.memory_space<vmem>>, vector<16x16x8xbf16>
    %48 = vector.shape_cast %47 : vector<16x16x8xbf16> to vector<256x8xbf16>
    %49 = vector.extract_strided_slice %10 {offsets = [56, 0], sizes = [8, 16], strides = [1, 1]} : vector<72x16xbf16> to vector<8x16xbf16>
    %cst_50 = arith.constant dense<0.000000e+00> : vector<256x16xf32>
    %50 = tpu.matmul %48, %49, %cst_50 {dimension_numbers = #tpu.dot_dimension_numbers<[1], [0], [0], [1], [0, 0, 1, 1], [], []>} : vector<256x8xbf16>, vector<8x16xbf16>, vector<256x16xf32> -> vector<256x16xf32>
    %51 = arith.addf %46, %50 : vector<256x16xf32>
    %c2_51 = arith.constant 2 : index
    %c2_52 = arith.constant 2 : index
    %c0_53 = arith.constant 0 : index
    %52 = vector.load %arg5[%c2_51, %c2_52, %c0_53] : memref<18x18x8xbf16, #tpu.memory_space<vmem>>, vector<16x16x8xbf16>
    %53 = vector.shape_cast %52 : vector<16x16x8xbf16> to vector<256x8xbf16>
    %54 = vector.extract_strided_slice %10 {offsets = [64, 0], sizes = [8, 16], strides = [1, 1]} : vector<72x16xbf16> to vector<8x16xbf16>
    %cst_54 = arith.constant dense<0.000000e+00> : vector<256x16xf32>
    %55 = tpu.matmul %53, %54, %cst_54 {dimension_numbers = #tpu.dot_dimension_numbers<[1], [0], [0], [1], [0, 0, 1, 1], [], []>} : vector<256x8xbf16>, vector<8x16xbf16>, vector<256x16xf32> -> vector<256x16xf32>
    %56 = arith.addf %51, %55 : vector<256x16xf32>
    %c0_55 = arith.constant 0 : index
    %c0_56 = arith.constant 0 : index
    %57 = vector.load %arg3[%c0_55, %c0_56] : memref<1x16xf32, #tpu.memory_space<vmem>>, vector<1x16xf32>
    %58 = vector.broadcast %57 : vector<1x16xf32> to vector<256x16xf32>
    %59 = arith.addf %56, %58 : vector<256x16xf32>
    %cst_57 = arith.constant 0.000000e+00 : f32
    %60 = vector.broadcast %cst_57 : f32 to vector<256x16xf32>
    %61 = arith.maximumf %59, %60 : vector<256x16xf32>
    %62 = vector.shape_cast %61 : vector<256x16xf32> to vector<1x16x16x16xf32>
    %c0_58 = arith.constant 0 : index
    %c0_59 = arith.constant 0 : index
    %c0_60 = arith.constant 0 : index
    %c0_61 = arith.constant 0 : index
    %63 = vector.load %arg4[%c0_58, %c0_59, %c0_60, %c0_61] : memref<1x16x16x16xf32, #tpu.memory_space<vmem>>, vector<1x16x16x16xf32>
    tpu.vector_store %arg4[%c0_58, %c0_59, %c0_60, %c0_61], %62 {strides = array<i32>} : memref<1x16x16x16xf32, #tpu.memory_space<vmem>>, vector<1x16x16x16xf32>,
    return
  }
  func.func @transform_0(%arg0: i32) -> (i32, i32, i32, i32) {
    %c0_i32 = arith.constant 0 : i32
    %c0_i32_0 = arith.constant 0 : i32
    %c0_i32_1 = arith.constant 0 : i32
    %c0_i32_2 = arith.constant 0 : i32
    return %arg0, %c0_i32, %c0_i32_0, %c0_i32_1 : i32, i32, i32, i32
  }
  func.func @transform_1(%arg0: i32) -> (i32, i32) {
    %c0_i32 = arith.constant 0 : i32
    %c0_i32_0 = arith.constant 0 : i32
    %c0_i32_1 = arith.constant 0 : i32
    return %c0_i32, %c0_i32_0 : i32, i32
  }
  func.func @transform_2(%arg0: i32) -> (i32, i32) {
    %c0_i32 = arith.constant 0 : i32
    %c0_i32_0 = arith.constant 0 : i32
    %c0_i32_1 = arith.constant 0 : i32
    return %c0_i32, %c0_i32_0 : i32, i32
  }
  func.func @transform_3(%arg0: i32) -> (i32, i32, i32, i32) {
    %c0_i32 = arith.constant 0 : i32
    %c0_i32_0 = arith.constant 0 : i32
    %c0_i32_1 = arith.constant 0 : i32
    %c0_i32_2 = arith.constant 0 : i32
    return %arg0, %c0_i32, %c0_i32_0, %c0_i32_1 : i32, i32, i32, i32
  }
}

</mosaic_0001>

<bundles_post_ra>
// kernel: tpu_custom_call.1
= control target key start
LH: loop header
LB: loop body
LE: loop exit
PB: predicated region body
PF: predicated region fallthrough
CT: control target
= control target key end

     0   :  { %8 = vsyncpa [#allocation4], 0  ;;  %s8960_s0 = inlined_call_operand.vmem [shape: f32[2,16,16,8], index: 0, kind: input, shape index: {}]   ;;  %s8961_s1 = inlined_call_operand.vmem [shape: bf16[72,16], index: 1, kind: input, shape index: {}]   ;;  %s8962_s2 = inlined_call_operand.vmem [shape: f32[1,16], index: 2, kind: input, shape index: {}]   ;;  %s8963_s3 = inlined_call_operand.hbm [shape: f32[2,16,16,16], index: 3, kind: output, shape index: {}]  }
   0x1   :  { %10 = vsyncpa [#allocation4 + $0x1], 0  ;;  %s6949_s12 = smov 0   ;;  %s6951_s13 = smov 0  }
   0x2   :  { %s6953_s14 = smov 0   ;;  %s6955_s15 = smov 0  }
   0x3 LB: > { %s6970_s16 = sadd.s32 4294967295, %s6923_s15   ;;  %s5587_s17 = sadd.s32 4294967294, %s6923_s15   ;;  %s6923_s15 = sphi %s6955_s15, %s9049_s15   ;;  %s6919_s14 = sphi %s6953_s14, %s9048_s14   ;;  %s6915_s13 = sphi %s6951_s13, %s9047_s13   ;;  %s6911_s12 = sphi %s6949_s12, %s9046_s12  }
   0x4   : > { %s6974_s18 = sadd.s32 1, %s6923_s15   ;;  %s91_s19 = sadd.s32 1, %s6919_s14 }
   0x5   : > { %s88_s20 = ssub.s32 %s6923_s15, %s6974_s18  ;;  %p101_p0 = scmp.ne.s32.totalorder %s6919_s14, %s6915_s13 }
   0x6   : > { %p89_p1 = scmp.eq.s32.totalorder %s88_s20, 0  ;;  %p102_p2 = scmp.eq.s32.totalorder %s6970_s16, 1 }
   0x7   : > { %p107_p3 = scmp.ne.s32.totalorder %s6915_s13, %s6911_s12  ;;  %p108_p4 = scmp.eq.s32.totalorder %s5587_s17, 1 }
   0x8   : > { %s6985_s21 = scalar_select %p89_p1, %s6919_s14, %s91_s19  }
   0x9   : > { %p6987_p5 = por %p102_p2, %p101_p0  ;;  %p6991_p6 = por %p108_p4, %p107_p3 }
   0xa   : > { %p5590_p7 = scmp.ge.s32.totalorder %s6923_s15, 1  ;;  %p140_p8 = scmp.lt.s32.totalorder %s6923_s15, 3 }
   0xc   : > { %p141_p9 = pnand %p5590_p7, %p140_p8 }
   0xe   : > { %144 = sbr.rel (%p141_p9) target bundleno = 688 (0x2b0), region = 32 }
  0x15   : > { %v858_v0 = vld [vmem:[%s8961_s1 + $0x4] sm:$0xf]  ;;  %vm1398_vm0 = vcmask 1043456   ;;  %v861_v1 = vld [vmem:[%s8961_s1 + $0x10] sm:$0xf]  ;;  %vm170_vm1 = vcmask 60416  }
  0x16   : > { %6719 = vmatprep.subr.msk.bf16.mxu1 %vm1398_vm0, %v858_v0  ;;  %6723 = vmatprep.subr.msk.bf16.mxu0 %vm1398_vm0, %v861_v1  ;;  %v1400_v2 = vsel %vm1398_vm0, %v858_v0, 0  ;;  %v7007_v3 = vsel %vm1398_vm0, %v861_v1, 0  ;;  %vm173_vm2 = vcmask 57344   ;;  %p164_p10 = scmp.lt.s32.totalorder %s6970_s16, 1  ;;  %v6925_v4 = vmov 0   ;;  %s161_s6 = sand.u32 1, %s6915_s13  }
  0x17   : > { %8981 = vst [vmem:[#allocation6_spill] sm:$0xff] %v7007_v3  ;;  %6156 = vmatpush3.bf16.msra.mxu1 %v1400_v2  ;;  %6292 = vmatpush3.bf16.msra.mxu0 %v7007_v3  ;;  %171 = vst.msk [vmem:[#allocation2] sm:$0xf] %vm170_vm1, %v6925_v4  ;;  %vm180_vm3 = vsmask.f32 256  ;;  %v8984_v7 = vmov 0 }
  0x18   : > { %172 = vst.msk [vmem:[#allocation2 + $0x4] sm:$0xf] %vm170_vm1, %v6925_v4  ;;  %vm236_vm4 = vsmask.f32 7938  ;;  %176 = vst.msk [vmem:[#allocation2 + $0xcc] sm:$0xf] %vm170_vm1, %v6925_v4 }
  0x19   : > { %174 = vst.msk [vmem:[#allocation2 + $0x8] sm:$0x1] %vm173_vm2, %v6925_v4  ;;  %178 = vst.msk [vmem:[#allocation2 + $0xd4] sm:$0x1] %vm173_vm2, %v6925_v4  ;;  %s165_s28 = scalar_select %p164_p10, %s6970_s16, 1  ;;  %vm1349_vm12 = vcmask 64512  }
  0x1a   : > { %177 = vst.msk [vmem:[#allocation2 + $0xd0] sm:$0xf] %vm170_vm1, %v6925_v4  ;;  %vm7019_vm5 = vmand %vm173_vm2, %vm180_vm3  ;;  %v185_v6 = vld [vmem:[#allocation2 + $0xc] sm:$0x1]  ;;  %v241_v9 = vld [vmem:[#allocation2 + $0x14] sm:$0x1] }
  0x1b   : > { %vm7026_vm6 = vmand %vm173_vm2, %vm236_vm4  ;;  %v186_v8 = vsel %vm7019_vm5, 0, %v185_v6  ;;  %s5968_s29 = sshll.u32 %s165_s28, 8  ;;  %v7037_v11 = vld [vmem:[%s8961_s1] sm:$0xf]  ;;  %v7042_v12 = vld [vmem:[%s8961_s1 + $0x14] sm:$0xf] }
  0x1c   : > { %v8985_v7 = vsel %vm7026_vm6, 4294967295, %v8984_v7  ;;  %187 = vst [vmem:[#allocation2 + $0xc] sm:$0x1] %v186_v8  ;;  %v242_v10 = vsel %vm7026_vm6, 0, %v241_v9  ;;  %s7047_s9 = scalar_lea.vmem %s8960_s0, %s5968_s29  ;;  %6720 = vmatprep.subr.msk.bf16.mxu1 %vm1398_vm0, %v7037_v11  ;;  %6725 = vmatprep.subr.msk.bf16.mxu0 %vm1398_vm0, %v7042_v12  ;;  %v188_v13 = vld [vmem:[#allocation2 + $0x18] sm:$0x1]  ;;  %vm7069_vm9 = vmand %vm170_vm1, %vm236_vm4 }
  0x1d   : > { %8986 = vst [vmem:[#allocation7_spill] sm:$0xff] %v8985_v7  ;;  %243 = vst [vmem:[#allocation2 + $0x14] sm:$0x1] %v242_v10  ;;  %v244_v14 = vld [vmem:[#allocation2 + $0x20] sm:$0x1]  ;;  %v293_v16 = vld [vmem:[%s7047_s9 + $0x8] sm:$0xff] }
  0x1e   : > { %v292_v15 = vld [vmem:[%s7047_s9] sm:$0xff]  ;;  %v189_v17 = vsel %vm7019_vm5, 0, %v188_v13  ;;  %v245_v18 = vsel %vm7026_vm6, 0, %v244_v14  ;;  %v5970_v20 = vpack.c.bf16 %v293_v16, %v293_v16  ;;  %vm420_vm7 = vsmask.f32 4368  ;;  %v294_v21 = vld [vmem:[%s7047_s9 + $0x10] sm:$0xff] }
  0x1f   : > { %v5969_v19 = vpack.c.bf16 %v292_v15, %v292_v15  ;;  %190 = vst [vmem:[#allocation2 + $0x18] sm:$0x1] %v189_v17  ;;  %246 = vst [vmem:[#allocation2 + $0x20] sm:$0x1] %v245_v18  ;;  %v295_v22 = vld [vmem:[%s7047_s9 + $0x18] sm:$0xff]  ;;  %v5971_v26 = vpack.c.bf16 %v294_v21, %v294_v21  ;;  %v296_v54 = vld [vmem:[%s7047_s9 + $0x20] sm:$0xff] }
  0x20   : > { %v182_v23 = vld [vmem:[#allocation2] sm:$0x1]  ;;  %v238_v24 = vld [vmem:[#allocation2 + $0x8] sm:$0x1]  ;;  %v867_v25 = vld [vmem:[#allocation2 + $0x4] sm:$0xf]  ;;  %v5972_v27 = vpack.c.bf16 %v295_v22, %v295_v22  ;;  %v5973_v6 = vpack.c.bf16 %v296_v54, %v296_v54 }
  0x21   : > { %v183_v28 = vsel %vm7019_vm5, 0, %v182_v23  ;;  %v239_v29 = vsel %vm7026_vm6, 0, %v238_v24  ;;  %vm914_vm8 = vsmask.f32 3328  ;;  %v927_v30 = vshll.u32 %v867_v25, 16  ;;  %vm7076_vm10 = vmor %vm180_vm3, %vm420_vm7  ;;  %v297_v60 = vld [vmem:[%s7047_s9 + $0x28] sm:$0xff] }
  0x22   : > { %v931_v31 = vshrl.u32 %v867_v25, 16  ;;  %v191_v32 = vld [vmem:[#allocation2 + $0x24] sm:$0x1]  ;;  %184 = vst [vmem:[#allocation2] sm:$0x1] %v183_v28  ;;  %v423_v33 = vshrl.u32 %v5969_v19, 16  ;;  %v5974_v15 = vpack.c.bf16 %v297_v60, %v297_v60 }
  0x23   : > { %240 = vst [vmem:[#allocation2 + $0x8] sm:$0x1] %v239_v29  ;;  %v426_v34 = vshll.u32 %v5969_v19, 16  ;;  %v431_v35 = vshrl.u32 %v5970_v20, 16  ;;  %v434_v36 = vshll.u32 %v5970_v20, 16  ;;  %v7065_v38 = vrot.slane %v927_v30, 5 }
  0x24   : > { %v247_v37 = vld [vmem:[#allocation2 + $0x2c] sm:$0x1]  ;;  %v933_v39 = vrot.slane %v931_v31, 4  ;;  %v440_v40 = vshrl.u32 %v5971_v26, 16  ;;  %v443_v41 = vshll.u32 %v5971_v26, 16  ;;  %v425_v43 = vrot.slane %v423_v33, 7 }
  0x25   : > { %v433_v44 = vrot.slane %v431_v35, 7  ;;  %v745_v45 = vld [vmem:[#allocation2 + $0xc] sm:$0xf]  ;;  %v448_v46 = vshrl.u32 %v5972_v27, 16  ;;  %v451_v47 = vshll.u32 %v5972_v27, 16  ;;  %v192_v52 = vsel %vm7019_vm5, 0, %v191_v32 }
  0x26   : > { %v934_v48 = vor.u32 %v933_v39, %v7065_v38  ;;  %v749_v50 = vld [vmem:[#allocation2 + $0x14] sm:$0x1]  ;;  %v442_v51 = vrot.slane %v440_v40, 7  ;;  %v248_v53 = vsel %vm7026_vm6, 0, %v247_v37  ;;  %v428_v55 = vor.u32 %v426_v34, %v425_v43  ;;  %v752_v59 = vld [vmem:[#allocation2 + $0x18] sm:$0xf] }
  0x27   : > { %v429_v56 = vrot.slane %v425_v43, 4  ;;  %v436_v57 = vor.u32 %v434_v36, %v433_v44  ;;  %v438_v58 = vrot.slane %v433_v44, 4  ;;  %193 = vst [vmem:[#allocation2 + $0x24] sm:$0x1] %v192_v52  ;;  %249 = vst [vmem:[#allocation2 + $0x2c] sm:$0x1] %v248_v53 }
  0x28   : > { %vm915_vm11 = vsmask.f32 7440  ;;  %v445_v61 = vor.u32 %v443_v41, %v442_v51  ;;  %v446_v62 = vrot.slane %v442_v51, 4  ;;  %v450_v63 = vrot.slane %v448_v46, 7  ;;  %v756_v4 = vld [vmem:[#allocation2 + $0x20] sm:$0x1] }
  0x29   : > { %v437_v0 = vsel %vm7076_vm10, %v429_v56, %v436_v57  ;;  %v746_v1 = vsel %vm7069_vm9, %v428_v55, %v745_v45  ;;  %v750_v2 = vsel %vm7019_vm5, %v438_v58, %v749_v50  ;;  %v866_v8 = vld [vmem:[#allocation2] sm:$0xf]  ;;  %v935_v18 = vrot.slane %v934_v48, 4  ;;  %v298_v20 = vld [vmem:[%s7047_s9 + $0x30] sm:$0xff]  ;;  %v250_v26 = vld [vmem:[#allocation2 + $0x38] sm:$0x1] }
  0x2a   : > { %v898_v9 = vld [vmem:[#allocation2 + $0x8] sm:$0x1]  ;;  %747 = vst [vmem:[#allocation2 + $0xc] sm:$0xf] %v746_v1  ;;  %748 = vst.msk [vmem:[#allocation2 + $0x10] sm:$0xf] %vm170_vm1, %v437_v0  ;;  %v453_v10 = vor.u32 %v451_v47, %v450_v63  ;;  %v753_v14 = vsel %vm7069_vm9, %v445_v61, %v752_v59  ;;  %v7114_v36 = vpack.c.bf16 %v298_v20, %v298_v20 }
  0x2b   : > { %751 = vst [vmem:[#allocation2 + $0x14] sm:$0x1] %v750_v2  ;;  %v455_v13 = vrot.slane %v450_v63, 4  ;;  %v918_v16 = vshrl.u32 %v866_v8, 16  ;;  %v921_v17 = vshll.u32 %v866_v8, 16  ;;  %v937_v19 = vshll.u32 %v898_v9, 16  ;;  %vm7102_vm13 = vmor %vm914_vm8, %vm915_vm11 }
  0x2c   : > { %754 = vst [vmem:[#allocation2 + $0x18] sm:$0xf] %v753_v14  ;;  %v454_v21 = vsel %vm7076_vm10, %v446_v62, %v453_v10  ;;  %v457_v23 = vshrl.u32 %v5973_v6, 16  ;;  %v460_v24 = vshll.u32 %v5973_v6, 16  ;;  %v194_v25 = vld [vmem:[#allocation2 + $0x30] sm:$0x1] }
  0x2d   : > { %v757_v22 = vsel %vm7019_vm5, %v455_v13, %v756_v4  ;;  %v920_v28 = vrot.slane %v918_v16, 4  ;;  %v923_v29 = vrot.slane %v921_v17, 5  ;;  %v939_v30 = vrot.slane %v937_v19, 5  ;;  %755 = vst.msk [vmem:[#allocation2 + $0x1c] sm:$0xf] %vm170_vm1, %v454_v21  ;;  %v299_v32 = vld [vmem:[%s7047_s9 + $0x38] sm:$0xff] }
  0x2e   : > { %758 = vst [vmem:[#allocation2 + $0x20] sm:$0x1] %v757_v22  ;;  %v465_v31 = vshrl.u32 %v5974_v15, 16  ;;  %v7110_v33 = vsel %vm1398_vm0, %v7037_v11, 0  ;;  %v7112_v34 = vrot.slane %v457_v23, 7  ;;  %v468_v35 = vshll.u32 %v5974_v15, 16 }
  0x2f   : > { %v924_v37 = vor.u32 %v923_v29, %v920_v28  ;;  %v7118_v39 = vsel %vm1398_vm0, %v7042_v12, 0  ;;  %v195_v41 = vsel %vm7019_vm5, 0, %v194_v25  ;;  %v940_v43 = vsel %vm7102_vm13, %v935_v18, %v939_v30  ;;  %v300_v46 = vld [vmem:[%s7047_s9 + $0x40] sm:$0xff]  ;;  %s6001_s11 = sshll.u32 %s6970_s16, 12  ;;  %s8919_s16 = scalar_lea.sflag [#allocation4], %s161_s6 }
  0x30   : > { %v7120_v40 = vrot.slane %v465_v31, 7  ;;  %v463_v11 = vrot.slane %v7112_v34, 4  ;;  %196 = vst [vmem:[#allocation2 + $0x30] sm:$0x1] %v195_v41  ;;  %v251_v44 = vsel %vm7026_vm6, 0, %v250_v26  ;;  %v7129_v45 = vpack.c.bf16 %v299_v32, %v299_v32  ;;  %s8907_s24 = scalar_lea.hbm %s8963_s3, %s6001_s11  ;;  %s6926_s26 = smov [#allocation3]  }
  0x31   : > { %v925_v47 = vrot.slane %v924_v37, 4  ;;  %v868_v12 = vld [vmem:[#allocation2 + $0xc] sm:$0xf]  ;;  %v869_v48 = vld [vmem:[#allocation2 + $0x10] sm:$0xf]  ;;  %v7133_v50 = vor.u32 %v460_v24, %v7112_v34  ;;  %v474_v52 = vshrl.u32 %v7114_v36, 16  ;;  %v7143_v62 = vpack.c.bf16 %v300_v46, %v300_v46 }
  0x32   : > { %v7136_v51 = vor.u32 %v468_v35, %v7120_v40  ;;  %252 = vst [vmem:[#allocation2 + $0x38] sm:$0x1] %v251_v44  ;;  %v899_v53 = vld [vmem:[#allocation2 + $0x14] sm:$0x1]  ;;  %v942_v54 = vshrl.u32 %v868_v12, 16  ;;  %v945_v55 = vshll.u32 %v868_v12, 16 }
  0x33   : > { %v951_v56 = vshll.u32 %v869_v48, 16  ;;  %v955_v57 = vshrl.u32 %v869_v48, 16  ;;  %v930_v58 = vsel %vm7102_vm13, %v925_v47, %v7065_v38  ;;  %v961_v59 = vshll.u32 %v899_v53, 16  ;;  %v2666_v60 = vld [vmem:[#allocation2 + $0xc] sm:$0xf]  ;;  %s6865_s27 = sshll.u32 %s6926_s26, 4  ;;  %s6866_s27 = int_to_ptr.vmem [resolvable:$false] %s6865_s27 }
  0x34   : > { %v472_v61 = vrot.slane %v7120_v40, 4  ;;  %v5626_v63 = vcombine.low %v930_v58, %v940_v43  ;;  %v944_v0 = vrot.slane %v942_v54, 4  ;;  %v947_v1 = vrot.slane %v945_v55, 5  ;;  %v7145_v4 = vld [vmem:[#allocation2 + $0x10] sm:$0xf]  ;;  %s6867_s28 = scalar_lea.vmem %s6866_s27, 8192 }
  0x35   : > { %v953_v2 = vrot.slane %v951_v56, 5  ;;  %v957_v6 = vrot.slane %v955_v57, 4  ;;  %v963_v8 = vrot.slane %v961_v59, 5  ;;  %v7147_v9 = vld [vmem:[#allocation2 + $0x14] sm:$0x1]  ;;  %v2715_v10 = vshrl.u32 %v2666_v60, 16 }
  0x36   : > { %v2718_v13 = vshll.u32 %v2666_v60, 16  ;;  %6157 = vmatprep.mubr.msk.bf16.mxu1 %vm1349_vm12, %v5626_v63  ;;  %v948_v38 = vor.u32 %v947_v1, %v944_v0  ;;  %v2724_v14 = vshll.u32 %v7145_v4, 16  ;;  %v2728_v15 = vshrl.u32 %v7145_v4, 16  ;;  %v2669_v17 = vld [vmem:[#allocation2 + $0x18] sm:$0xf] }
  0x37   : > { %v2734_v16 = vshll.u32 %v7147_v9, 16  ;;  %v958_v18 = vor.u32 %v957_v6, %v953_v2  ;;  %v2717_v19 = vrot.slane %v2715_v10, 4  ;;  %v3456_v21 = vrot.slane %v7145_v4, 5  ;;  %v7154_v22 = vld [vmem:[#allocation2 + $0x1c] sm:$0xf] }
  0x38   : > { %v2720_v20 = vrot.slane %v2718_v13, 5  ;;  %v949_v23 = vrot.slane %v948_v38, 4  ;;  %v2726_v24 = vrot.slane %v2724_v14, 5  ;;  %v2730_v25 = vrot.slane %v2728_v15, 4  ;;  %v7159_v37 = vld [vmem:[#allocation2 + $0x20] sm:$0x1] }
  0x39   : > { %v2736_v26 = vrot.slane %v2734_v16, 5  ;;  %v959_v28 = vrot.slane %v958_v18, 4  ;;  %v3459_v30 = vrot.slane %v7147_v9, 5  ;;  %v2739_v31 = vshrl.u32 %v2669_v17, 16  ;;  %v870_v48 = vld [vmem:[#allocation2 + $0x18] sm:$0xf] }
  0x3a   : > { %v2721_v29 = vor.u32 %v2720_v20, %v2717_v19  ;;  %v954_v32 = vsel %vm7102_vm13, %v949_v23, %v953_v2  ;;  %v2731_v35 = vor.u32 %v2730_v25, %v2726_v24  ;;  %v2742_v41 = vshll.u32 %v2669_v17, 16  ;;  %v871_v63 = vld [vmem:[#allocation2 + $0x1c] sm:$0xf]  ;;  %v900_v6 = vld [vmem:[#allocation2 + $0x20] sm:$0x1] }
  0x3b   : > { %v2748_v43 = vshll.u32 %v7154_v22, 16  ;;  %v964_v44 = vsel %vm7102_vm13, %v959_v28, %v963_v8  ;;  %v2741_v47 = vrot.slane %v2739_v31, 4  ;;  %v2752_v12 = vshrl.u32 %v7154_v22, 16  ;;  %v759_v15 = vld [vmem:[#allocation2 + $0x24] sm:$0xf] }
  0x3c   : > { %v2722_v46 = vrot.slane %v2721_v29, 4  ;;  %v5627_v53 = vcombine.low %v954_v32, %v964_v44  ;;  %v2732_v54 = vrot.slane %v2731_v35, 4  ;;  %v2744_v55 = vrot.slane %v2742_v41, 5  ;;  %v763_v20 = vld [vmem:[#allocation2 + $0x2c] sm:$0x1] }
  0x3d   : > { %v2750_v56 = vrot.slane %v2748_v43, 5  ;;  %v2754_v58 = vrot.slane %v2752_v12, 4  ;;  %v2758_v59 = vshll.u32 %v7159_v37, 16  ;;  %v3463_v60 = vrot.slane %v7154_v22, 5  ;;  %v197_v32 = vld [vmem:[#allocation2 + $0x3c] sm:$0x1] }
  0x3e   : > { %v2727_v57 = vsel %vm7102_vm13, %v2722_v46, %v2726_v24  ;;  %6158 = vmatmul.mubr.msk.bf16.vlgmr.msra.gmra.mrb[0].mxu1 %vm1349_vm12, %v5627_v53  ;;  %v2737_v0 = vsel %vm7102_vm13, %v2732_v54, %v2736_v26  ;;  %v2745_v1 = vor.u32 %v2744_v55, %v2741_v47  ;;  %v3466_v2 = vrot.slane %v7159_v37, 5  ;;  %v301_v43 = vld [vmem:[%s7047_s9 + $0x48] sm:$0xff]  ;;  %v766_v12 = vld [vmem:[#allocation2 + $0x30] sm:$0xf]  ;;  %v7207_v55 = vld [vmem:[%s8961_s1 + $0x18] sm:$0xf] }
  0x3f   : > { %v966_v8 = vshrl.u32 %v870_v48, 16  ;;  %v5770_v10 = vcombine.low %v2727_v57, %v2737_v0  ;;  %6190 = vmatpush3.bf16.msra.mxu1 %v7110_v33  ;;  %v2755_v13 = vor.u32 %v2754_v58, %v2750_v56  ;;  %v2760_v38 = vrot.slane %v2758_v59, 5  ;;  %v302_v0 = vld [vmem:[%s7047_s9 + $0x50] sm:$0xff]  ;;  %v1856_v5 = vld [vmem:[#allocation2 + $0xc] sm:$0xe] }
  0x40   : > { %v7176_v14 = vrot.slane %v3463_v60, 4  ;;  %v2746_v16 = vrot.slane %v2745_v1, 4  ;;  %v969_v18 = vshll.u32 %v870_v48, 16  ;;  %v975_v19 = vshll.u32 %v871_v63, 16  ;;  %v200_v48 = vld [vmem:[#allocation2 + $0x48] sm:$0x1] }
  0x41   : > { %v968_v17 = vrot.slane %v966_v8, 4  ;;  %6293 = vmatprep.mubr.msk.bf16.mxu0 %vm1349_vm12, %v5770_v10  ;;  %v2756_v23 = vrot.slane %v2755_v13, 4  ;;  %v979_v24 = vshrl.u32 %v871_v63, 16  ;;  %v985_v25 = vshll.u32 %v900_v6, 16  ;;  %v770_v8 = vld [vmem:[#allocation2 + $0x38] sm:$0x1] }
  0x42   : > { %v471_v33 = vsel %vm7076_vm10, %v463_v11, %v7136_v51  ;;  %v2751_v26 = vsel %vm7102_vm13, %v2746_v16, %v2750_v56  ;;  %v971_v28 = vrot.slane %v969_v18, 5  ;;  %v977_v29 = vrot.slane %v975_v19, 5  ;;  %v253_v51 = vld [vmem:[#allocation2 + $0x44] sm:$0x1] }
  0x43   : > { %v760_v31 = vsel %vm7069_vm9, %v7133_v50, %v759_v15  ;;  %762 = vst.msk [vmem:[#allocation2 + $0x28] sm:$0xf] %vm170_vm1, %v471_v33  ;;  %v2761_v35 = vsel %vm7102_vm13, %v2756_v23, %v2760_v38  ;;  %v981_v41 = vrot.slane %v979_v24, 4  ;;  %v987_v34 = vrot.slane %v985_v25, 5 }
  0x44   : > { %761 = vst [vmem:[#allocation2 + $0x24] sm:$0xf] %v760_v31  ;;  %v764_v11 = vsel %vm7019_vm5, %v472_v61, %v763_v20  ;;  %v5771_v44 = vcombine.low %v2751_v26, %v2761_v35  ;;  %v972_v46 = vor.u32 %v971_v28, %v968_v17  ;;  %v476_v50 = vrot.slane %v474_v52, 7 }
  0x45   : > { %765 = vst [vmem:[#allocation2 + $0x2c] sm:$0x1] %v764_v11  ;;  %v477_v47 = vshll.u32 %v7114_v36, 16  ;;  %v982_v53 = vor.u32 %v981_v41, %v977_v29  ;;  %v482_v54 = vshrl.u32 %v7129_v45, 16  ;;  %v485_v40 = vshll.u32 %v7129_v45, 16 }
  0x46   : > { %v198_v61 = vsel %vm7019_vm5, 0, %v197_v32  ;;  %6294 = vmatmul.mubr.msk.bf16.vlgmr.msra.gmra.mrb[0].mxu0 %vm1349_vm12, %v5771_v44  ;;  %v973_v52 = vrot.slane %v972_v46, 4  ;;  %v480_v56 = vrot.slane %v476_v50, 4  ;;  %v254_v57 = vsel %vm7026_vm6, 0, %v253_v51 }
  0x47   : > { %v479_v36 = vor.u32 %v477_v47, %v476_v50  ;;  %199 = vst [vmem:[#allocation2 + $0x3c] sm:$0x1] %v198_v61  ;;  %6326 = vmatpush3.bf16.msra.mxu0 %v7118_v39  ;;  %v983_v45 = vrot.slane %v982_v53, 4  ;;  %v484_v58 = vrot.slane %v482_v54, 7  ;;  %255 = vst [vmem:[#allocation2 + $0x44] sm:$0x1] %v254_v57  ;;  %v7213_v59 = vpack.c.bf16 %v301_v43, %v301_v43 }
  0x48   : > { %v491_v63 = vshrl.u32 %v7143_v62, 16  ;;  %v978_v1 = vsel %vm7102_vm13, %v973_v52, %v977_v29  ;;  %v494_v10 = vshll.u32 %v7143_v62, 16  ;;  %v201_v39 = vsel %vm7019_vm5, 0, %v200_v48  ;;  %6726 = vmatprep.subr.msk.bf16.mxu0 %vm1398_vm0, %v7207_v55  ;;  %v303_v50 = vld [vmem:[%s7047_s9 + $0x58] sm:$0xff] }
  0x49   : > { %v767_v6 = vsel %vm7069_vm9, %v479_v36, %v766_v12  ;;  %v988_v13 = vsel %vm7102_vm13, %v983_v45, %v987_v34  ;;  %v487_v16 = vor.u32 %v485_v40, %v484_v58  ;;  %v489_v17 = vrot.slane %v484_v58, 4  ;;  %202 = vst [vmem:[#allocation2 + $0x48] sm:$0x1] %v201_v39 }
  0x4a   : > { %v873_v38 = vld [vmem:[#allocation2 + $0x28] sm:$0xf]  ;;  %768 = vst [vmem:[#allocation2 + $0x30] sm:$0xf] %v767_v6  ;;  %v7230_v18 = vrot.slane %v491_v63, 7  ;;  %v5628_v19 = vcombine.low %v978_v1, %v988_v13  ;;  %v7232_v25 = vpack.c.bf16 %v302_v0, %v302_v0  ;;  %v7247_v0 = vpack.c.bf16 %v303_v50, %v303_v50 }
  0x4b   : > { %v7228_v15 = vld [vmem:[#allocation2 + $0x28] sm:$0xf]  ;;  %v872_v62 = vld [vmem:[#allocation2 + $0x24] sm:$0xf]  ;;  %v999_v20 = vshll.u32 %v873_v38, 16  ;;  %v1003_v23 = vshrl.u32 %v873_v38, 16  ;;  %v488_v29 = vsel %vm7076_vm10, %v480_v56, %v487_v16  ;;  %v771_v31 = vsel %vm7019_vm5, %v489_v17, %v770_v8 }
  0x4c   : > { %v2672_v24 = vld [vmem:[#allocation2 + $0x24] sm:$0xf]  ;;  %v901_v33 = vld [vmem:[#allocation2 + $0x2c] sm:$0x1]  ;;  %v990_v26 = vshrl.u32 %v872_v62, 16  ;;  %v993_v28 = vshll.u32 %v872_v62, 16  ;;  %6161 = vmatprep.mubr.msk.bf16.mxu1 %vm1349_vm12, %v5628_v19  ;;  %v496_v63 = vor.u32 %v494_v10, %v7230_v18 }
  0x4d   : > { %v1001_v32 = vrot.slane %v999_v20, 5  ;;  %v1005_v35 = vrot.slane %v1003_v23, 4  ;;  %v1009_v41 = vshll.u32 %v901_v33, 16  ;;  %v7239_v34 = vld [vmem:[#allocation2 + $0x2c] sm:$0x1]  ;;  %v2763_v11 = vshrl.u32 %v2672_v24, 16 }
  0x4e   : > { %769 = vst.msk [vmem:[#allocation2 + $0x34] sm:$0xf] %vm170_vm1, %v488_v29  ;;  %772 = vst [vmem:[#allocation2 + $0x38] sm:$0x1] %v771_v31  ;;  %v992_v51 = vrot.slane %v990_v26, 4  ;;  %v995_v43 = vrot.slane %v993_v28, 5 }
  0x4f   : > { %v2766_v44 = vshll.u32 %v2672_v24, 16  ;;  %v2772_v46 = vshll.u32 %v7228_v15, 16  ;;  %v1006_v47 = vor.u32 %v1005_v35, %v1001_v32  ;;  %v1011_v12 = vrot.slane %v1009_v41, 5  ;;  %v773_v36 = vld [vmem:[#allocation2 + $0x3c] sm:$0xf] }
  0x50   : > { %v2765_v48 = vrot.slane %v2763_v11, 4  ;;  %v2776_v53 = vshrl.u32 %v7228_v15, 16  ;;  %v996_v54 = vor.u32 %v995_v43, %v992_v51  ;;  %v2782_v52 = vshll.u32 %v7239_v34, 16 }
  0x51   : > { %v2768_v40 = vrot.slane %v2766_v44, 5  ;;  %v2774_v61 = vrot.slane %v2772_v46, 5  ;;  %v1007_v56 = vrot.slane %v1006_v47, 4  ;;  %v2675_v45 = vld [vmem:[#allocation2 + $0x30] sm:$0xf]  ;;  %v774_v24 = vsel %vm7069_vm9, %v496_v63, %v773_v36 }
  0x52   : > { %v2778_v57 = vrot.slane %v2776_v53, 4  ;;  %v874_v58 = vld [vmem:[#allocation2 + $0x30] sm:$0xf]  ;;  %v997_v1 = vrot.slane %v996_v54, 4  ;;  %v2784_v8 = vrot.slane %v2782_v52, 5  ;;  %v2787_v39 = vshrl.u32 %v2675_v45, 16 }
  0x53   : > { %v2769_v6 = vor.u32 %v2768_v40, %v2765_v48  ;;  %v1012_v13 = vsel %vm7102_vm13, %v1007_v56, %v1011_v12  ;;  %v2790_v16 = vshll.u32 %v2675_v45, 16  ;;  %v1014_v17 = vshrl.u32 %v874_v58, 16  ;;  %775 = vst [vmem:[#allocation2 + $0x3c] sm:$0xf] %v774_v24  ;;  %v256_v47 = vld [vmem:[#allocation2 + $0x50] sm:$0x1] }
  0x54   : > { %v2779_v38 = vor.u32 %v2778_v57, %v2774_v61  ;;  %v1002_v19 = vsel %vm7102_vm13, %v997_v1, %v1001_v32  ;;  %v2789_v10 = vrot.slane %v2787_v39, 4  ;;  %v1017_v50 = vshll.u32 %v874_v58, 16  ;;  %v777_v39 = vld [vmem:[#allocation2 + $0x44] sm:$0x1] }
  0x55   : > { %v2770_v62 = vrot.slane %v2769_v6, 4  ;;  %v7253_v20 = vld [vmem:[#allocation2 + $0x34] sm:$0xf]  ;;  %v7255_v23 = vld [vmem:[#allocation2 + $0x38] sm:$0x1]  ;;  %v5629_v33 = vcombine.low %v1002_v19, %v1012_v13  ;;  %v2792_v28 = vrot.slane %v2790_v16, 5 }
  0x56   : > { %v2780_v26 = vrot.slane %v2779_v38, 4  ;;  %v2796_v29 = vshll.u32 %v7253_v20, 16  ;;  %v875_v31 = vld [vmem:[#allocation2 + $0x34] sm:$0xf]  ;;  %v2800_v32 = vshrl.u32 %v7253_v20, 16  ;;  %v2806_v41 = vshll.u32 %v7255_v23, 16 }
  0x57   : > { %v2775_v35 = vsel %vm7102_vm13, %v2770_v62, %v2774_v61  ;;  %v902_v11 = vld [vmem:[#allocation2 + $0x38] sm:$0x1]  ;;  %v1016_v51 = vrot.slane %v1014_v17, 4  ;;  %6162 = vmatmul.mubr.msk.bf16.gmra.mrb[4].mxu1 %vm1349_vm12, %v5629_v33  ;;  %v2793_v44 = vor.u32 %v2792_v28, %v2789_v10  ;;  %v1023_v54 = vshll.u32 %v875_v31, 16 }
  0x58   : > { %v2785_v43 = vsel %vm7102_vm13, %v2780_v26, %v2784_v8  ;;  %v2798_v46 = vrot.slane %v2796_v29, 5  ;;  %v2802_v48 = vrot.slane %v2800_v32, 4  ;;  %v2808_v53 = vrot.slane %v2806_v41, 5  ;;  %v259_v32 = vld [vmem:[#allocation2 + $0x5c] sm:$0x1] }
  0x59   : > { %v5772_v12 = vcombine.low %v2775_v35, %v2785_v43  ;;  %v2794_v40 = vrot.slane %v2793_v44, 4  ;;  %v1019_v61 = vrot.slane %v1017_v50, 5  ;;  %v1027_v52 = vshrl.u32 %v875_v31, 16  ;;  %v203_v35 = vld [vmem:[#allocation2 + $0x54] sm:$0x1]  ;;  %v304_v43 = vld [vmem:[%s7047_s9 + $0x60] sm:$0xff] }
  0x5a   : > { %v1033_v36 = vshll.u32 %v902_v11, 16  ;;  %v2803_v56 = vor.u32 %v2802_v48, %v2798_v46  ;;  %v1025_v57 = vrot.slane %v1023_v54, 5  ;;  %v497_v45 = vrot.slane %v7230_v18, 4  ;;  %v876_v17 = vld [vmem:[#allocation2 + $0x3c] sm:$0xf] }
  0x5b   : > { %6297 = vmatprep.mubr.msk.bf16.mxu0 %vm1349_vm12, %v5772_v12  ;;  %v499_v63 = vshrl.u32 %v7213_v59, 16  ;;  %v2799_v58 = vsel %vm7102_vm13, %v2794_v40, %v2798_v46  ;;  %v1020_v1 = vor.u32 %v1019_v61, %v1016_v51  ;;  %v1029_v6 = vrot.slane %v1027_v52, 4  ;;  %v2678_v33 = vld [vmem:[#allocation2 + $0x3c] sm:$0xf]  ;;  %v206_v12 = vld [vmem:[#allocation2 + $0x60] sm:$0x1] }
  0x5c   : > { %v1035_v8 = vrot.slane %v1033_v36, 5  ;;  %v2804_v13 = vrot.slane %v2803_v56, 4  ;;  %v502_v16 = vshll.u32 %v7213_v59, 16  ;;  %v257_v19 = vsel %vm7026_vm6, 0, %v256_v47  ;;  %v305_v61 = vld [vmem:[%s7047_s9 + $0x68] sm:$0xff] }
  0x5d   : > { %v501_v38 = vrot.slane %v499_v63, 7  ;;  %v1021_v62 = vrot.slane %v1020_v1, 4  ;;  %v1030_v18 = vor.u32 %v1029_v6, %v1025_v57  ;;  %v1038_v10 = vshrl.u32 %v876_v17, 16  ;;  %258 = vst [vmem:[#allocation2 + $0x50] sm:$0x1] %v257_v19 }
  0x5e   : > { %v1041_v24 = vshll.u32 %v876_v17, 16  ;;  %v2809_v26 = vsel %vm7102_vm13, %v2804_v13, %v2808_v53  ;;  %v2811_v31 = vshrl.u32 %v2678_v33, 16  ;;  %v2814_v53 = vshll.u32 %v2678_v33, 16  ;;  %v6814_v42 = vld [vmem:[#allocation2 + $0x3c] sm:$0xf] }
  0x5f   : > { %v504_v28 = vor.u32 %v502_v16, %v501_v38  ;;  %v506_v29 = vrot.slane %v501_v38, 4  ;;  %v5773_v59 = vcombine.low %v2799_v58, %v2809_v26  ;;  %v1026_v41 = vsel %vm7102_vm13, %v1021_v62, %v1025_v57  ;;  %v306_v62 = vld [vmem:[%s7047_s9 + $0x70] sm:$0xff] }
  0x60   : > { %v1031_v11 = vrot.slane %v1030_v18, 4  ;;  %v1040_v51 = vrot.slane %v1038_v10, 4  ;;  %v1043_v50 = vrot.slane %v1041_v24, 5  ;;  %v2813_v47 = vrot.slane %v2811_v31, 4  ;;  %v307_v18 = vld [vmem:[%s7047_s9 + $0x78] sm:$0xff] }
  0x61   : > { %v505_v44 = vsel %vm7076_vm10, %v497_v45, %v504_v28  ;;  %v778_v46 = vsel %vm7019_vm5, %v506_v29, %v777_v39  ;;  %6298 = vmatmul.mubr.msk.bf16.gmra.mrb[4].mxu0 %vm1349_vm12, %v5773_v59  ;;  %v508_v54 = vshrl.u32 %v7232_v25, 16  ;;  %v511_v40 = vshll.u32 %v7232_v25, 16 }
  0x62   : > { %v1036_v48 = vsel %vm7102_vm13, %v1031_v11, %v1035_v8  ;;  %776 = vst.msk [vmem:[#allocation2 + $0x40] sm:$0xf] %vm170_vm1, %v505_v44  ;;  %779 = vst [vmem:[#allocation2 + $0x44] sm:$0x1] %v778_v46  ;;  %v1044_v36 = vor.u32 %v1043_v50, %v1040_v51  ;;  %v516_v56 = vshrl.u32 %v7247_v0, 16  ;;  %v519_v57 = vshll.u32 %v7247_v0, 16 }
  0x63   : > { %v5630_v52 = vcombine.low %v1026_v41, %v1036_v48  ;;  %v2816_v45 = vrot.slane %v2814_v53, 5  ;;  %v510_v63 = vrot.slane %v508_v54, 7  ;;  %v204_v58 = vsel %vm7019_vm5, 0, %v203_v35  ;;  %v780_v8 = vld [vmem:[#allocation2 + $0x48] sm:$0xf] }
  0x64   : > { %v260_v1 = vsel %vm7026_vm6, 0, %v259_v32  ;;  %v7298_v25 = vrot.slane %v1044_v36, 4  ;;  %v518_v6 = vrot.slane %v516_v56, 7  ;;  %205 = vst [vmem:[#allocation2 + $0x54] sm:$0x1] %v204_v58  ;;  %v5981_v39 = vpack.c.bf16 %v304_v43, %v304_v43 }
  0x65   : > { %6165 = vmatprep.mubr.msk.bf16.mxu1 %vm1349_vm12, %v5630_v52  ;;  %261 = vst [vmem:[#allocation2 + $0x5c] sm:$0x1] %v260_v1  ;;  %v5982_v0 = vpack.c.bf16 %v305_v61, %v305_v61  ;;  %v2817_v13 = vor.u32 %v2816_v45, %v2813_v47  ;;  %v513_v38 = vor.u32 %v511_v40, %v510_v63  ;;  %v514_v16 = vrot.slane %v510_v63, 4  ;;  %v784_v17 = vld [vmem:[#allocation2 + $0x50] sm:$0x1] }
  0x66   : > { %v207_v19 = vsel %vm7019_vm5, 0, %v206_v12  ;;  %v521_v10 = vor.u32 %v519_v57, %v518_v6  ;;  %v523_v24 = vrot.slane %v518_v6, 4  ;;  %v525_v33 = vshrl.u32 %v5981_v39, 16  ;;  %v859_v32 = vld [vmem:[%s8961_s1 + $0x8] sm:$0xf] }
  0x67   : > { %v528_v26 = vshll.u32 %v5981_v39, 16  ;;  %208 = vst [vmem:[#allocation2 + $0x60] sm:$0x1] %v207_v19  ;;  %v7304_v28 = vrot.slane %v2817_v13, 4  ;;  %v781_v29 = vsel %vm7069_vm9, %v513_v38, %v780_v8  ;;  %v533_v31 = vshrl.u32 %v5982_v0, 16  ;;  %6721 = vmatprep.subr.msk.bf16.mxu1 %vm1398_vm0, %v859_v32 }
  0x68   : > { %v536_v35 = vshll.u32 %v5982_v0, 16  ;;  %v522_v51 = vsel %vm7076_vm10, %v514_v16, %v521_v10  ;;  %782 = vst [vmem:[#allocation2 + $0x48] sm:$0xf] %v781_v29  ;;  %v785_v43 = vsel %vm7019_vm5, %v523_v24, %v784_v17  ;;  %v7317_v44 = vpack.c.bf16 %v306_v62, %v306_v62  ;;  %v262_v36 = vld [vmem:[#allocation2 + $0x68] sm:$0x1]  ;;  %v308_v0 = vld [vmem:[%s7047_s9 + $0x80] sm:$0xff] }
  0x69   : > { %v877_v59 = vld [vmem:[#allocation2 + $0x40] sm:$0xf]  ;;  %v903_v41 = vld [vmem:[#allocation2 + $0x44] sm:$0x1]  ;;  %v7319_v46 = vpack.c.bf16 %v307_v18, %v307_v18  ;;  %783 = vst.msk [vmem:[#allocation2 + $0x4c] sm:$0xf] %vm170_vm1, %v522_v51 }
  0x6a   : > { %v7311_v11 = vld [vmem:[#allocation2 + $0x40] sm:$0xf]  ;;  %v1047_v50 = vshll.u32 %v877_v59, 16  ;;  %v1051_v47 = vshrl.u32 %v877_v59, 16  ;;  %v1057_v12 = vshll.u32 %v903_v41, 16  ;;  %v527_v61 = vrot.slane %v525_v33, 7 }
  0x6b   : > { %v7322_v48 = vld [vmem:[#allocation2 + $0x44] sm:$0x1]  ;;  %v2820_v53 = vshll.u32 %v7311_v11, 16  ;;  %786 = vst [vmem:[#allocation2 + $0x50] sm:$0x1] %v785_v43  ;;  %v2824_v54 = vshrl.u32 %v7311_v11, 16 }
  0x6c   : > { %v2830_v40 = vshll.u32 %v7322_v48, 16  ;;  %v535_v52 = vrot.slane %v533_v31, 7  ;;  %v1049_v56 = vrot.slane %v1047_v50, 5  ;;  %v1053_v57 = vrot.slane %v1051_v47, 4  ;;  %v787_v58 = vld [vmem:[#allocation2 + $0x54] sm:$0xf] }
  0x6d   : > { %v1059_v45 = vrot.slane %v1057_v12, 5  ;;  %v2822_v63 = vrot.slane %v2820_v53, 5  ;;  %v2826_v1 = vrot.slane %v2824_v54, 4  ;;  %v530_v8 = vor.u32 %v528_v26, %v527_v61  ;;  %v791_v19 = vld [vmem:[#allocation2 + $0x5c] sm:$0x1]  ;;  %v309_v62 = vld [vmem:[%s7047_s9 + $0x88] sm:$0xff] }
  0x6e   : > { %v2832_v6 = vrot.slane %v2830_v40, 5  ;;  %v531_v39 = vrot.slane %v527_v61, 4  ;;  %v1050_v13 = vsel %vm7102_vm13, %v7298_v25, %v1049_v56  ;;  %v1054_v38 = vor.u32 %v1053_v57, %v1049_v56 }
  0x6f   : > { %v2823_v16 = vsel %vm7102_vm13, %v7304_v28, %v2822_v63  ;;  %v538_v17 = vor.u32 %v536_v35, %v535_v52  ;;  %v2827_v18 = vor.u32 %v2826_v1, %v2822_v63  ;;  %v540_v10 = vrot.slane %v535_v52, 4  ;;  %v2681_v29 = vld [vmem:[#allocation2 + $0x48] sm:$0xf] }
  0x70   : > { %v788_v24 = vsel %vm7069_vm9, %v530_v8, %v787_v58  ;;  %v263_v33 = vsel %vm7026_vm6, 0, %v262_v36  ;;  %v1055_v26 = vrot.slane %v1054_v38, 4  ;;  %v878_v31 = vld [vmem:[#allocation2 + $0x48] sm:$0xf]  ;;  %v542_v28 = vshrl.u32 %v7317_v44, 16 }
  0x71   : > { %v539_v25 = vsel %vm7076_vm10, %v531_v39, %v538_v17  ;;  %789 = vst [vmem:[#allocation2 + $0x54] sm:$0xf] %v788_v24  ;;  %264 = vst [vmem:[#allocation2 + $0x68] sm:$0x1] %v263_v33  ;;  %v7343_v35 = vpack.c.bf16 %v308_v0, %v308_v0  ;;  %v2828_v32 = vrot.slane %v2827_v18, 4  ;;  %v2835_v51 = vshrl.u32 %v2681_v29, 16 }
  0x72   : > { %v7345_v59 = vld [vmem:[#allocation2 + $0x4c] sm:$0xf]  ;;  %v7347_v41 = vld [vmem:[#allocation2 + $0x50] sm:$0x1]  ;;  %790 = vst.msk [vmem:[#allocation2 + $0x58] sm:$0xf] %vm170_vm1, %v539_v25  ;;  %v792_v43 = vsel %vm7019_vm5, %v540_v10, %v791_v19  ;;  %v7352_v50 = vpack.c.bf16 %v309_v62, %v309_v62  ;;  %v1060_v47 = vsel %vm7102_vm13, %v1055_v26, %v1059_v45 }
  0x73   : > { %v2838_v12 = vshll.u32 %v2681_v29, 16  ;;  %v2844_v53 = vshll.u32 %v7345_v59, 16  ;;  %v2848_v54 = vshrl.u32 %v7345_v59, 16  ;;  %v879_v40 = vld [vmem:[#allocation2 + $0x4c] sm:$0xf]  ;;  %v5631_v61 = vcombine.low %v1050_v13, %v1060_v47 }
  0x74   : > { %793 = vst [vmem:[#allocation2 + $0x5c] sm:$0x1] %v792_v43  ;;  %v2833_v52 = vsel %vm7102_vm13, %v2828_v32, %v2832_v6  ;;  %v2837_v36 = vrot.slane %v2835_v51, 4  ;;  %v2854_v56 = vshll.u32 %v7347_v41, 16  ;;  %v904_v57 = vld [vmem:[#allocation2 + $0x50] sm:$0x1] }
  0x75   : > { %v5774_v63 = vcombine.low %v2823_v16, %v2833_v52  ;;  %v2840_v58 = vrot.slane %v2838_v12, 5  ;;  %v2846_v1 = vrot.slane %v2844_v53, 5  ;;  %v2850_v8 = vrot.slane %v2848_v54, 4  ;;  %6166 = vmatmul.mubr.msk.bf16.gmra.mrb[8].mxu1 %vm1349_vm12, %v5631_v61  ;;  %v6816_v49 = vld [vmem:[#allocation2 + $0x48] sm:$0xf] }
  0x76   : > { %v2856_v45 = vrot.slane %v2854_v56, 5  ;;  %v1062_v39 = vshrl.u32 %v878_v31, 16  ;;  %v1065_v0 = vshll.u32 %v878_v31, 16  ;;  %v1071_v38 = vshll.u32 %v879_v40, 16 }
  0x77   : > { %6301 = vmatprep.mubr.msk.bf16.mxu0 %vm1349_vm12, %v5774_v63  ;;  %v2841_v13 = vor.u32 %v2840_v58, %v2837_v36  ;;  %v2851_v17 = vor.u32 %v2850_v8, %v2846_v1  ;;  %v1075_v19 = vshrl.u32 %v879_v40, 16  ;;  %v1081_v6 = vshll.u32 %v904_v57, 16 }
  0x78   : > { %v1064_v62 = vrot.slane %v1062_v39, 4  ;;  %v1067_v18 = vrot.slane %v1065_v0, 5  ;;  %v1073_v10 = vrot.slane %v1071_v38, 5  ;;  %v880_v24 = vld [vmem:[#allocation2 + $0x54] sm:$0xf]  ;;  %v7363_v16 = vrot.slane %v542_v28, 7 }
  0x79   : > { %v2842_v33 = vrot.slane %v2841_v13, 4  ;;  %v2852_v26 = vrot.slane %v2851_v17, 4  ;;  %v1077_v29 = vrot.slane %v1075_v19, 4  ;;  %v1083_v25 = vrot.slane %v1081_v6, 5  ;;  %v881_v32 = vld [vmem:[#allocation2 + $0x58] sm:$0xf] }
  0x7a   : > { %v1068_v51 = vor.u32 %v1067_v18, %v1064_v62  ;;  %v1086_v43 = vshrl.u32 %v880_v24, 16  ;;  %v1089_v47 = vshll.u32 %v880_v24, 16  ;;  %v1095_v12 = vshll.u32 %v881_v32, 16  ;;  %v2684_v28 = vld [vmem:[#allocation2 + $0x54] sm:$0xf] }
  0x7b   : > { %v905_v31 = vld [vmem:[#allocation2 + $0x5c] sm:$0x1]  ;;  %v2847_v53 = vsel %vm7102_vm13, %v2842_v33, %v2846_v1  ;;  %v2857_v54 = vsel %vm7102_vm13, %v2852_v26, %v2856_v45  ;;  %v1078_v40 = vor.u32 %v1077_v29, %v1073_v10  ;;  %v1099_v61 = vshrl.u32 %v881_v32, 16  ;;  %v7369_v63 = vld [vmem:[#allocation2 + $0x58] sm:$0xf] }
  0x7c   : > { %v5775_v52 = vcombine.low %v2847_v53, %v2857_v54  ;;  %v1069_v36 = vrot.slane %v1068_v51, 4  ;;  %v1088_v56 = vrot.slane %v1086_v43, 4  ;;  %v1091_v57 = vrot.slane %v1089_v47, 5  ;;  %v7374_v38 = vld [vmem:[#allocation2 + $0x5c] sm:$0x1] }
  0x7d   : > { %vm1903_vm14 = vcmask 1042432   ;;  %vm1904_vm15 = vcmask 1046532   ;;  %v1079_v58 = vrot.slane %v1078_v40, 4  ;;  %v1097_v8 = vrot.slane %v1095_v12, 5  ;;  %v209_v53 = vld [vmem:[#allocation2 + $0x6c] sm:$0x1] }
  0x7e   : > { %v1101_v39 = vrot.slane %v1099_v61, 4  ;;  %v1105_v0 = vshll.u32 %v905_v31, 16  ;;  %6302 = vmatmul.mubr.msk.bf16.gmra.mrb[8].mxu0 %vm1349_vm12, %v5775_v52  ;;  %v1074_v1 = vsel %vm7102_vm13, %v1069_v36, %v1073_v10  ;;  %v1092_v45 = vor.u32 %v1091_v57, %v1088_v56  ;;  %v265_v54 = vld [vmem:[#allocation2 + $0x74] sm:$0x1]  ;;  %v794_v36 = vld [vmem:[#allocation2 + $0x60] sm:$0xf]  ;;  %vm7405_vm2 = vmor %vm1903_vm14, %vm1904_vm15 }
  0x7f   : > { %v2859_v13 = vshrl.u32 %v2684_v28, 16  ;;  %v2862_v17 = vshll.u32 %v2684_v28, 16  ;;  %v1084_v19 = vsel %vm7102_vm13, %v1079_v58, %v1083_v25  ;;  %v2868_v18 = vshll.u32 %v7369_v63, 16 }
  0x80   : > { %v1102_v6 = vor.u32 %v1101_v39, %v1097_v8  ;;  %v1107_v62 = vrot.slane %v1105_v0, 5  ;;  %v5632_v24 = vcombine.low %v1074_v1, %v1084_v19  ;;  %v1093_v33 = vrot.slane %v1092_v45, 4  ;;  %v3390_v45 = vld [vmem:[#allocation2 + $0xc] sm:$0xe] }
  0x81   : > { %v2861_v26 = vrot.slane %v2859_v13, 4  ;;  %v2864_v29 = vrot.slane %v2862_v17, 5  ;;  %v2870_v51 = vrot.slane %v2868_v18, 5  ;;  %v2872_v10 = vshrl.u32 %v7369_v63, 16 }
  0x82   : > { %v1103_v32 = vrot.slane %v1102_v6, 4  ;;  %v2878_v31 = vshll.u32 %v7374_v38, 16  ;;  %6169 = vmatprep.mubr.msk.bf16.mxu1 %vm1349_vm12, %v5632_v24  ;;  %v1098_v43 = vsel %vm7102_vm13, %v1093_v33, %v1097_v8  ;;  %v545_v47 = vshll.u32 %v7317_v44, 16 }
  0x83   : > { %v2865_v25 = vor.u32 %v2864_v29, %v2861_v26  ;;  %v548_v12 = vrot.slane %v7363_v16, 4  ;;  %v2874_v61 = vrot.slane %v2872_v10, 4  ;;  %v550_v52 = vshrl.u32 %v7319_v46, 16 }
  0x84   : > { %v1108_v40 = vsel %vm7102_vm13, %v1103_v32, %v1107_v62  ;;  %v2880_v28 = vrot.slane %v2878_v31, 5  ;;  %v547_v58 = vor.u32 %v545_v47, %v7363_v16  ;;  %v553_v8 = vshll.u32 %v7319_v46, 16  ;;  %v798_v16 = vld [vmem:[#allocation2 + $0x68] sm:$0x1]  ;;  %v212_v47 = vld [vmem:[#allocation2 + $0x78] sm:$0x1] }
  0x85   : > { %v5633_v56 = vcombine.low %v1098_v43, %v1108_v40  ;;  %v2866_v57 = vrot.slane %v2865_v25, 4  ;;  %v2875_v39 = vor.u32 %v2874_v61, %v2870_v51  ;;  %v552_v44 = vrot.slane %v550_v52, 7  ;;  %v268_v61 = vld [vmem:[#allocation2 + $0x80] sm:$0x1] }
  0x86   : > { %v210_v0 = vsel %vm7019_vm5, 0, %v209_v53  ;;  %v266_v1 = vsel %vm7026_vm6, 0, %v265_v54  ;;  %v795_v17 = vsel %vm7069_vm9, %v547_v58, %v794_v36  ;;  %v559_v46 = vshrl.u32 %v7343_v35, 16 }
  0x87   : > { %6170 = vmatmul.mubr.msk.bf16.gmra.mrb[12].mxu1 %vm1349_vm12, %v5633_v56  ;;  %v2871_v13 = vsel %vm7102_vm13, %v2866_v57, %v2870_v51  ;;  %211 = vst [vmem:[#allocation2 + $0x6c] sm:$0x1] %v210_v0  ;;  %267 = vst [vmem:[#allocation2 + $0x74] sm:$0x1] %v266_v1  ;;  %v562_v19 = vshll.u32 %v7343_v35, 16  ;;  %v2876_v6 = vrot.slane %v2875_v39, 4  ;;  %v555_v62 = vor.u32 %v553_v8, %v552_v44 }
  0x88   : > { %v557_v18 = vrot.slane %v552_v44, 4  ;;  %796 = vst [vmem:[#allocation2 + $0x60] sm:$0xf] %v795_v17  ;;  %v567_v24 = vshrl.u32 %v7352_v50, 16  ;;  %v561_v26 = vrot.slane %v559_v46, 7  ;;  %v570_v29 = vshll.u32 %v7352_v50, 16 }
  0x89   : > { %v5802_v32 = vrot.slane %v3390_v45, 9  ;;  %v3458_v35 = vrot.slane %v3456_v21, 4  ;;  %v3391_v51 = vld [vmem:[#allocation2 + $0x18] sm:$0xe]  ;;  %v2881_v10 = vsel %vm7102_vm13, %v2876_v6, %v2880_v28  ;;  %v556_v31 = vsel %vm7076_vm10, %v548_v12, %v555_v62  ;;  %v310_v12 = vld [vmem:[%s7047_s9 + $0x90] sm:$0xff] }
  0x8a   : > { %v799_v43 = vsel %vm7019_vm5, %v557_v18, %v798_v16  ;;  %v569_v25 = vrot.slane %v567_v24, 7  ;;  %v5776_v53 = vcombine.low %v2871_v13, %v2881_v10  ;;  %797 = vst.msk [vmem:[#allocation2 + $0x64] sm:$0xf] %vm170_vm1, %v556_v31  ;;  %v564_v50 = vor.u32 %v562_v19, %v561_v26  ;;  %v311_v57 = vld [vmem:[%s7047_s9 + $0x98] sm:$0xff]  ;;  %v313_v13 = vld [vmem:[%s7047_s9 + $0xa8] sm:$0xff] }
  0x8b   : > { %800 = vst [vmem:[#allocation2 + $0x68] sm:$0x1] %v799_v43  ;;  %v565_v54 = vrot.slane %v561_v26, 4  ;;  %v7423_v40 = vsel %vm7405_vm2, %v5802_v32, %v3456_v21  ;;  %v7430_v36 = vsel %vm7405_vm2, %v3458_v35, %v3459_v30  ;;  %v5803_v56 = vrot.slane %v3391_v51, 9 }
  0x8c   : > { %v572_v28 = vor.u32 %v570_v29, %v569_v25  ;;  %v574_v52 = vrot.slane %v569_v25, 4  ;;  %6305 = vmatprep.mubr.msk.bf16.mxu0 %vm1349_vm12, %v5776_v53  ;;  %v5818_v4 = vcombine.low %v7423_v40, %v7430_v36  ;;  %v7441_v21 = vsel %vm7405_vm2, %v7176_v14, %v3466_v2  ;;  %v3393_v36 = vld [vmem:[#allocation2 + $0x30] sm:$0xe] }
  0x8d   : > { %v7445_v9 = vsel %vm1398_vm0, %v7207_v55, 0  ;;  %v213_v30 = vsel %vm7019_vm5, 0, %v212_v47  ;;  %v7455_v37 = vsel %vm7405_vm2, %v5803_v56, %v3463_v60  ;;  %v269_v2 = vsel %vm7026_vm6, 0, %v268_v61  ;;  %v312_v55 = vld [vmem:[%s7047_s9 + $0xa0] sm:$0xff] }
  0x8e   : > { %v573_v58 = vsel %vm7076_vm10, %v565_v54, %v572_v28  ;;  %v801_v8 = vld [vmem:[#allocation2 + $0x6c] sm:$0xf]  ;;  %v805_v39 = vld [vmem:[#allocation2 + $0x74] sm:$0x1]  ;;  %214 = vst [vmem:[#allocation2 + $0x78] sm:$0x1] %v213_v30  ;;  %v7459_v14 = vpack.c.bf16 %v310_v12, %v310_v12  ;;  %v5819_v60 = vcombine.low %v7455_v37, %v7441_v21  ;;  %v7469_v45 = vpack.c.bf16 %v311_v57, %v311_v57 }
  0x8f   : > { %v2687_v44 = vld [vmem:[#allocation2 + $0x60] sm:$0xf]  ;;  %v802_v1 = vsel %vm7069_vm9, %v564_v50, %v801_v8  ;;  %804 = vst.msk [vmem:[#allocation2 + $0x70] sm:$0xf] %vm170_vm1, %v573_v58  ;;  %v806_v22 = vsel %vm7019_vm5, %v574_v52, %v805_v39  ;;  %270 = vst [vmem:[#allocation2 + $0x80] sm:$0x1] %v269_v2  ;;  %v7480_v51 = vpack.c.bf16 %v312_v55, %v312_v55 }
  0x90   : > { %v882_v0 = vld [vmem:[#allocation2 + $0x60] sm:$0xf]  ;;  %v2883_v17 = vshrl.u32 %v2687_v44, 16  ;;  %v2886_v16 = vshll.u32 %v2687_v44, 16  ;;  %803 = vst [vmem:[#allocation2 + $0x6c] sm:$0xf] %v802_v1  ;;  %v7482_v10 = vpack.c.bf16 %v313_v13, %v313_v13 }
  0x91   : > { %v1110_v46 = vshrl.u32 %v882_v0, 16  ;;  %v1113_v19 = vshll.u32 %v882_v0, 16  ;;  %807 = vst [vmem:[#allocation2 + $0x74] sm:$0x1] %v806_v22  ;;  %v576_v6 = vshrl.u32 %v7459_v14, 16  ;;  %v579_v62 = vshll.u32 %v7459_v14, 16 }
  0x92   : > { %v584_v18 = vshrl.u32 %v7469_v45, 16  ;;  %v587_v24 = vshll.u32 %v7469_v45, 16  ;;  %v7476_v26 = vld [vmem:[#allocation2 + $0x64] sm:$0xf]  ;;  %v7478_v29 = vld [vmem:[#allocation2 + $0x68] sm:$0x1] }
  0x93   : > { %v2885_v32 = vrot.slane %v2883_v17, 4  ;;  %v2888_v35 = vrot.slane %v2886_v16, 5  ;;  %v2892_v31 = vshll.u32 %v7476_v26, 16  ;;  %v2896_v43 = vshrl.u32 %v7476_v26, 16  ;;  %v883_v47 = vld [vmem:[#allocation2 + $0x64] sm:$0xf] }
  0x94   : > { %v2902_v25 = vshll.u32 %v7478_v29, 16  ;;  %v1112_v53 = vrot.slane %v1110_v46, 4  ;;  %v906_v54 = vld [vmem:[#allocation2 + $0x68] sm:$0x1]  ;;  %v1115_v61 = vrot.slane %v1113_v19, 5  ;;  %v1119_v12 = vshll.u32 %v883_v47, 16 }
  0x95   : > { %v2889_v50 = vor.u32 %v2888_v35, %v2885_v32  ;;  %v1123_v28 = vshrl.u32 %v883_v47, 16  ;;  %v314_v52 = vld [vmem:[%s7047_s9 + $0xb0] sm:$0xff]  ;;  %v2894_v56 = vrot.slane %v2892_v31, 5  ;;  %v2898_v57 = vrot.slane %v2896_v43, 4  ;;  %v215_v47 = vld [vmem:[#allocation2 + $0x84] sm:$0x1] }
  0x96   : > { %v2904_v30 = vrot.slane %v2902_v25, 5  ;;  %v1129_v58 = vshll.u32 %v906_v54, 16  ;;  %v1116_v39 = vor.u32 %v1115_v61, %v1112_v53  ;;  %v1121_v2 = vrot.slane %v1119_v12, 5  ;;  %v885_v55 = vld [vmem:[#allocation2 + $0x70] sm:$0xf] }
  0x97   : > { %v2890_v8 = vrot.slane %v2889_v50, 4  ;;  %v1125_v14 = vrot.slane %v1123_v28, 4  ;;  %v2899_v44 = vor.u32 %v2898_v57, %v2894_v56  ;;  %v884_v1 = vld [vmem:[#allocation2 + $0x6c] sm:$0xf]  ;;  %v1143_v13 = vshll.u32 %v885_v55, 16 }
  0x98   : > { %v1131_v0 = vrot.slane %v1129_v58, 5  ;;  %v907_v22 = vld [vmem:[#allocation2 + $0x74] sm:$0x1]  ;;  %v7488_v17 = vpack.c.bf16 %v314_v52, %v314_v52  ;;  %v1117_v46 = vrot.slane %v1116_v39, 4  ;;  %v1134_v32 = vshrl.u32 %v884_v1, 16  ;;  %v6778_v3 = vld [vmem:[#allocation2 + $0x6c] sm:$0xff]  }
  0x99   : > { %v2895_v16 = vsel %vm7102_vm13, %v2890_v8, %v2894_v56  ;;  %v1126_v19 = vor.u32 %v1125_v14, %v1121_v2  ;;  %v2900_v35 = vrot.slane %v2899_v44, 4  ;;  %v1137_v31 = vshll.u32 %v884_v1, 16  ;;  %v808_v12 = vld [vmem:[#allocation2 + $0x78] sm:$0xf]  ;;  %v271_v28 = vld [vmem:[#allocation2 + $0x8c] sm:$0x1] }
  0x9a   : > { %v1145_v43 = vrot.slane %v1143_v13, 5  ;;  %v1147_v25 = vshrl.u32 %v885_v55, 16  ;;  %v1122_v53 = vsel %vm7102_vm13, %v1117_v46, %v1121_v2  ;;  %v1136_v54 = vrot.slane %v1134_v32, 4  ;;  %v812_v8 = vld [vmem:[#allocation2 + $0x80] sm:$0x1] }
  0x9b   : > { %v1127_v50 = vrot.slane %v1126_v19, 4  ;;  %v1153_v61 = vshll.u32 %v907_v22, 16  ;;  %v2905_v52 = vsel %vm7102_vm13, %v2900_v35, %v2904_v30  ;;  %v1139_v56 = vrot.slane %v1137_v31, 5  ;;  %v3392_v22 = vld [vmem:[#allocation2 + $0x24] sm:$0xe] }
  0x9c   : > { %v1149_v57 = vrot.slane %v1147_v25, 4  ;;  %v578_v58 = vrot.slane %v576_v6, 7  ;;  %v5777_v39 = vcombine.low %v2895_v16, %v2905_v52  ;;  %v586_v44 = vrot.slane %v584_v18, 7 }
  0x9d   : > { %v1132_v14 = vsel %vm7102_vm13, %v1127_v50, %v1131_v0  ;;  %v1155_v55 = vrot.slane %v1153_v61, 5  ;;  %v1140_v2 = vor.u32 %v1139_v56, %v1136_v54  ;;  %v216_v6 = vsel %vm7019_vm5, 0, %v215_v47  ;;  %v218_v61 = vld [vmem:[#allocation2 + $0x90] sm:$0x1]  ;;  %v274_v56 = vld [vmem:[#allocation2 + $0x98] sm:$0x1] }
  0x9e   : > { %v5634_v1 = vcombine.low %v1122_v53, %v1132_v14  ;;  %v1150_v13 = vor.u32 %v1149_v57, %v1145_v43  ;;  %v581_v46 = vor.u32 %v579_v62, %v578_v58  ;;  %6306 = vmatmul.mubr.msk.bf16.gmra.mrb[12].mxu0 %vm1349_vm12, %v5777_v39  ;;  %v582_v19 = vrot.slane %v578_v58, 4  ;;  %217 = vst [vmem:[#allocation2 + $0x84] sm:$0x1] %v216_v6  ;;  %v315_v39 = vld [vmem:[%s7047_s9 + $0xb8] sm:$0xff] }
  0x9f   : > { %v589_v30 = vor.u32 %v587_v24, %v586_v44  ;;  %v591_v32 = vrot.slane %v586_v44, 4  ;;  %v1141_v0 = vrot.slane %v1140_v2, 4  ;;  %6327 = vmatprep.mubr.msk.bf16.mxu0 %vm1349_vm12, %v5818_v4  ;;  %v272_v45 = vsel %vm7026_vm6, 0, %v271_v28 }
  0xa0   : > { %6173 = vmatprep.mubr.msk.bf16.mxu1 %vm1349_vm12, %v5634_v1  ;;  %v1151_v16 = vrot.slane %v1150_v13, 4  ;;  %v809_v62 = vsel %vm7069_vm9, %v581_v46, %v808_v12  ;;  %273 = vst [vmem:[#allocation2 + $0x8c] sm:$0x1] %v272_v45  ;;  %v593_v35 = vshrl.u32 %v7480_v51, 16  ;;  %v596_v40 = vshll.u32 %v7480_v51, 16 }
  0xa1   : > { %v590_v18 = vsel %vm7076_vm10, %v582_v19, %v589_v30  ;;  %810 = vst [vmem:[#allocation2 + $0x78] sm:$0xf] %v809_v62  ;;  %v813_v24 = vsel %vm7019_vm5, %v591_v32, %v812_v8  ;;  %v1146_v4 = vsel %vm7102_vm13, %v1141_v0, %v1145_v43  ;;  %v601_v25 = vshrl.u32 %v7482_v10, 16  ;;  %v221_v30 = vld [vmem:[#allocation2 + $0x9c] sm:$0x1] }
  0xa2   : > { %v1156_v31 = vsel %vm7102_vm13, %v1151_v16, %v1155_v55  ;;  %811 = vst.msk [vmem:[#allocation2 + $0x7c] sm:$0xf] %vm170_vm1, %v590_v18  ;;  %814 = vst [vmem:[#allocation2 + $0x80] sm:$0x1] %v813_v24  ;;  %v604_v47 = vshll.u32 %v7482_v10, 16  ;;  %v595_v50 = vrot.slane %v593_v35, 7 }
  0xa3   : > { %v5635_v53 = vcombine.low %v1146_v4, %v1156_v31  ;;  %v5804_v54 = vrot.slane %v3392_v22, 9  ;;  %v3470_v51 = vrot.slane %v7228_v15, 5  ;;  %v603_v12 = vrot.slane %v601_v25, 7 }
  0xa4   : > { %v3473_v43 = vrot.slane %v7239_v34, 5  ;;  %v5805_v28 = vrot.slane %v3393_v36, 9  ;;  %v3477_v52 = vrot.slane %v7253_v20, 5  ;;  %v598_v57 = vor.u32 %v596_v40, %v595_v50  ;;  %v7537_v34 = vld [vmem:[%s8961_s1 + $0x1c] sm:$0xf] }
  0xa5   : > { %6174 = vmatmul.mubr.msk.bf16.gmra.mrb[16].mxu1 %vm1349_vm12, %v5635_v53  ;;  %v599_v58 = vrot.slane %v595_v50, 4  ;;  %v3471_v10 = vsel %vm7405_vm2, %v5804_v54, %v3470_v51  ;;  %v3472_v8 = vrot.slane %v3470_v51, 4  ;;  %v606_v14 = vor.u32 %v604_v47, %v603_v12  ;;  %v815_v20 = vld [vmem:[#allocation2 + $0x84] sm:$0xf] }
  0xa6   : > { %v608_v55 = vrot.slane %v603_v12, 4  ;;  %v3478_v15 = vsel %vm7405_vm2, %v5805_v28, %v3477_v52  ;;  %v3479_v44 = vrot.slane %v3477_v52, 4  ;;  %6328 = vmatmul.mubr.msk.bf16.vlgmr.msra.gmra.mrb[0].mxu0 %vm1349_vm12, %v5819_v60  ;;  %v3480_v2 = vrot.slane %v7255_v23, 5  ;;  %v277_v40 = vld [vmem:[#allocation2 + $0xa4] sm:$0x1] }
  0xa7   : > { %v3474_v1 = vsel %vm7405_vm2, %v3472_v8, %v3473_v43  ;;  %v219_v13 = vsel %vm7019_vm5, 0, %v218_v61  ;;  %v275_v46 = vsel %vm7026_vm6, 0, %v274_v56  ;;  %6360 = vmatpush3.bf16.msra.mxu0 %v7445_v9  ;;  %v607_v21 = vsel %vm7076_vm10, %v599_v58, %v606_v14  ;;  %v819_v60 = vld [vmem:[#allocation2 + $0x8c] sm:$0x1]  ;;  %v316_v47 = vld [vmem:[%s7047_s9 + $0xc0] sm:$0xff]  ;;  %v318_v56 = vld [vmem:[%s7047_s9 + $0xd0] sm:$0xff] }
  0xa8   : > { %v7551_v22 = vld [vmem:[#allocation2 + $0x78] sm:$0xf]  ;;  %v816_v37 = vsel %vm7069_vm9, %v598_v57, %v815_v20  ;;  %v5820_v19 = vcombine.low %v3471_v10, %v3474_v1  ;;  %220 = vst [vmem:[#allocation2 + $0x90] sm:$0x1] %v219_v13  ;;  %276 = vst [vmem:[#allocation2 + $0x98] sm:$0x1] %v275_v46  ;;  %v5992_v23 = vpack.c.bf16 %v315_v39, %v315_v39  ;;  %6727 = vmatprep.subr.msk.bf16.mxu0 %vm1398_vm0, %v7537_v34 }
  0xa9   : > { %v7557_v32 = vld [vmem:[#allocation2 + $0x7c] sm:$0xf]  ;;  %v908_v6 = vld [vmem:[#allocation2 + $0x80] sm:$0x1]  ;;  %v1158_v0 = vshrl.u32 %v7551_v22, 16  ;;  %v1161_v9 = vshll.u32 %v7551_v22, 16  ;;  %v820_v16 = vsel %vm7019_vm5, %v608_v55, %v819_v60  ;;  %v3481_v62 = vsel %vm7405_vm2, %v3479_v44, %v3480_v2 }
  0xaa   : > { %817 = vst [vmem:[#allocation2 + $0x84] sm:$0xf] %v816_v37  ;;  %818 = vst.msk [vmem:[#allocation2 + $0x88] sm:$0xf] %vm170_vm1, %v607_v21  ;;  %v1167_v45 = vshll.u32 %v7557_v32, 16  ;;  %v1171_v18 = vshrl.u32 %v7557_v32, 16  ;;  %6331 = vmatprep.mubr.msk.bf16.mxu0 %vm1349_vm12, %v5820_v19  ;;  %v5821_v35 = vcombine.low %v3478_v15, %v3481_v62  ;;  %v7585_v21 = vpack.c.bf16 %v318_v56, %v318_v56 }
  0xab   : > { %v1177_v24 = vshll.u32 %v908_v6, 16  ;;  %821 = vst [vmem:[#allocation2 + $0x8c] sm:$0x1] %v820_v16  ;;  %v1160_v36 = vrot.slane %v1158_v0, 4  ;;  %v1163_v4 = vrot.slane %v1161_v9, 5  ;;  %v610_v31 = vshrl.u32 %v7488_v17, 16 }
  0xac   : > { %v613_v25 = vshll.u32 %v7488_v17, 16  ;;  %v1169_v53 = vrot.slane %v1167_v45, 5  ;;  %v1173_v50 = vrot.slane %v1171_v18, 4  ;;  %v618_v51 = vshrl.u32 %v5992_v23, 16  ;;  %v317_v61 = vld [vmem:[%s7047_s9 + $0xc8] sm:$0xff] }
  0xad   : > { %v1179_v54 = vrot.slane %v1177_v24, 5  ;;  %v1164_v12 = vor.u32 %v1163_v4, %v1160_v36  ;;  %v612_v43 = vrot.slane %v610_v31, 7  ;;  %v621_v28 = vshll.u32 %v5992_v23, 16 }
  0xae   : > { %v222_v52 = vsel %vm7019_vm5, 0, %v221_v30  ;;  %v1174_v57 = vor.u32 %v1173_v50, %v1169_v53  ;;  %v620_v58 = vrot.slane %v618_v51, 7  ;;  %v278_v10 = vsel %vm7026_vm6, 0, %v277_v40  ;;  %6332 = vmatmul.mubr.msk.bf16.gmra.mrb[4].mxu0 %vm1349_vm12, %v5821_v35  ;;  %v3394_v35 = vld [vmem:[#allocation2 + $0x3c] sm:$0xe] }
  0xaf   : > { %223 = vst [vmem:[#allocation2 + $0x9c] sm:$0x1] %v222_v52  ;;  %v5993_v17 = vpack.c.bf16 %v316_v47, %v316_v47  ;;  %v1165_v8 = vrot.slane %v1164_v12, 4  ;;  %v615_v39 = vor.u32 %v613_v25, %v612_v43  ;;  %v616_v14 = vrot.slane %v612_v43, 4  ;;  %v822_v55 = vld [vmem:[#allocation2 + $0x90] sm:$0xf] }
  0xb0   : > { %v826_v15 = vld [vmem:[#allocation2 + $0x98] sm:$0x1]  ;;  %279 = vst [vmem:[#allocation2 + $0xa4] sm:$0x1] %v278_v10  ;;  %v5994_v44 = vpack.c.bf16 %v317_v61, %v317_v61  ;;  %v1175_v20 = vrot.slane %v1174_v57, 4  ;;  %v623_v13 = vor.u32 %v621_v28, %v620_v58  ;;  %v625_v46 = vrot.slane %v620_v58, 4 }
  0xb1   : > { %v7581_v1 = vld [vmem:[#allocation2 + $0x84] sm:$0xf]  ;;  %v7583_v2 = vld [vmem:[#allocation2 + $0x88] sm:$0xf]  ;;  %v1170_v37 = vsel %vm7102_vm13, %v1165_v8, %v1169_v53  ;;  %v823_v4 = vsel %vm7069_vm9, %v615_v39, %v822_v55  ;;  %v627_v47 = vshrl.u32 %v5993_v17, 16  ;;  %v630_v53 = vshll.u32 %v5993_v17, 16 }
  0xb2   : > { %v909_v60 = vld [vmem:[#allocation2 + $0x8c] sm:$0x1]  ;;  %v1182_v19 = vshrl.u32 %v7581_v1, 16  ;;  %v1185_v23 = vshll.u32 %v7581_v1, 16  ;;  %v1191_v30 = vshll.u32 %v7583_v2, 16  ;;  %v1180_v6 = vsel %vm7102_vm13, %v1175_v20, %v1179_v54 }
  0xb3   : > { %v1195_v0 = vshrl.u32 %v7583_v2, 16  ;;  %v1201_v9 = vshll.u32 %v909_v60, 16  ;;  %v624_v16 = vsel %vm7076_vm10, %v616_v14, %v623_v13  ;;  %v5636_v62 = vcombine.low %v1170_v37, %v1180_v6  ;;  %824 = vst [vmem:[#allocation2 + $0x90] sm:$0xf] %v823_v4  ;;  %v3395_v54 = vld [vmem:[#allocation2 + $0x48] sm:$0xe] }
  0xb4   : > { %v1184_v45 = vrot.slane %v1182_v19, 4  ;;  %v1187_v18 = vrot.slane %v1185_v23, 5  ;;  %v1193_v24 = vrot.slane %v1191_v30, 5  ;;  %825 = vst.msk [vmem:[#allocation2 + $0x94] sm:$0xf] %vm170_vm1, %v624_v16  ;;  %v827_v31 = vsel %vm7019_vm5, %v625_v46, %v826_v15  ;;  %v319_v4 = vld [vmem:[%s7047_s9 + $0xd8] sm:$0xff] }
  0xb5   : > { %v1197_v40 = vrot.slane %v1195_v0, 4  ;;  %v1203_v36 = vrot.slane %v1201_v9, 5  ;;  %6177 = vmatprep.mubr.msk.bf16.mxu1 %vm1349_vm12, %v5636_v62  ;;  %828 = vst [vmem:[#allocation2 + $0x98] sm:$0x1] %v827_v31  ;;  %v635_v50 = vshrl.u32 %v5994_v44, 16  ;;  %v638_v61 = vshll.u32 %v5994_v44, 16 }
  0xb6   : > { %v1188_v25 = vor.u32 %v1187_v18, %v1184_v45  ;;  %v5806_v12 = vrot.slane %v3394_v35, 9  ;;  %v3484_v43 = vrot.slane %v7311_v11, 5  ;;  %v629_v52 = vrot.slane %v627_v47, 7  ;;  %v829_v44 = vld [vmem:[#allocation2 + $0x9c] sm:$0xf] }
  0xb7   : > { %v1198_v51 = vor.u32 %v1197_v40, %v1193_v24  ;;  %v637_v56 = vrot.slane %v635_v50, 7  ;;  %v3487_v57 = vrot.slane %v7322_v48, 5  ;;  %v5807_v39 = vrot.slane %v3395_v54, 9  ;;  %v833_v20 = vld [vmem:[#allocation2 + $0xa4] sm:$0x1] }
  0xb8   : > { %v1189_v28 = vrot.slane %v1188_v25, 4  ;;  %v3485_v10 = vsel %vm7405_vm2, %v5806_v12, %v3484_v43  ;;  %v3486_v8 = vrot.slane %v3484_v43, 4  ;;  %v632_v14 = vor.u32 %v630_v53, %v629_v52  ;;  %v224_v6 = vld [vmem:[#allocation2 + $0xa8] sm:$0x1]  ;;  %v280_v18 = vld [vmem:[#allocation2 + $0xb0] sm:$0x1] }
  0xb9   : > { %v1199_v58 = vrot.slane %v1198_v51, 4  ;;  %v633_v55 = vrot.slane %v629_v52, 4  ;;  %v640_v15 = vor.u32 %v638_v61, %v637_v56  ;;  %v642_v48 = vrot.slane %v637_v56, 4  ;;  %v227_v12 = vld [vmem:[#allocation2 + $0xb4] sm:$0x1] }
  0xba   : > { %v1194_v17 = vsel %vm7102_vm13, %v1189_v28, %v1193_v24  ;;  %v3488_v46 = vsel %vm7405_vm2, %v3486_v8, %v3487_v57  ;;  %v3491_v37 = vrot.slane %v7345_v59, 5  ;;  %v7620_v0 = vld [vmem:[#allocation2 + $0x90] sm:$0xf]  ;;  %v830_v16 = vsel %vm7069_vm9, %v632_v14, %v829_v44  ;;  %v283_v56 = vld [vmem:[#allocation2 + $0xbc] sm:$0x1]  ;;  %v320_v57 = vld [vmem:[%s7047_s9 + $0xe0] sm:$0xff] }
  0xbb   : > { %v1204_v11 = vsel %vm7102_vm13, %v1199_v58, %v1203_v36  ;;  %v7611_v13 = vld [vmem:[#allocation2 + $0x94] sm:$0xf]  ;;  %v641_v30 = vsel %vm7076_vm10, %v633_v55, %v640_v15  ;;  %v834_v59 = vsel %vm7019_vm5, %v642_v48, %v833_v20  ;;  %v5822_v62 = vcombine.low %v3485_v10, %v3488_v46  ;;  %831 = vst [vmem:[#allocation2 + $0x9c] sm:$0xf] %v830_v16  ;;  %v6849_v33 = vld [vmem:[#allocation2 + $0x88] sm:$0xf] }
  0xbc   : > { %v5637_v60 = vcombine.low %v1194_v17, %v1204_v11  ;;  %v1215_v19 = vshll.u32 %v7611_v13, 16  ;;  %v1219_v23 = vshrl.u32 %v7611_v13, 16  ;;  %v910_v9 = vld [vmem:[#allocation2 + $0x98] sm:$0x1]  ;;  %832 = vst.msk [vmem:[#allocation2 + $0xa0] sm:$0xf] %vm170_vm1, %v641_v30  ;;  %v3492_v45 = vsel %vm7405_vm2, %v5807_v39, %v3491_v37 }
  0xbd   : > { %v1206_v24 = vshrl.u32 %v7620_v0, 16  ;;  %v1209_v35 = vshll.u32 %v7620_v0, 16  ;;  %835 = vst [vmem:[#allocation2 + $0xa4] sm:$0x1] %v834_v59  ;;  %v1225_v31 = vshll.u32 %v910_v9, 16  ;;  %6335 = vmatprep.mubr.msk.bf16.mxu0 %vm1349_vm12, %v5822_v62  ;;  %v3493_v25 = vrot.slane %v3491_v37, 4 }
  0xbe   : > { %6178 = vmatmul.mubr.msk.bf16.gmra.mrb[20].mxu1 %vm1349_vm12, %v5637_v60  ;;  %v1217_v40 = vrot.slane %v1215_v19, 5  ;;  %v1221_v36 = vrot.slane %v1219_v23, 4  ;;  %v3494_v47 = vrot.slane %v7347_v41, 5  ;;  %v225_v53 = vsel %vm7019_vm5, 0, %v224_v6  ;;  %v321_v17 = vld [vmem:[%s7047_s9 + $0xe8] sm:$0xff] }
  0xbf   : > { %v1208_v50 = vrot.slane %v1206_v24, 4  ;;  %v1211_v54 = vrot.slane %v1209_v35, 5  ;;  %226 = vst [vmem:[#allocation2 + $0xa8] sm:$0x1] %v225_v53  ;;  %v281_v61 = vsel %vm7026_vm6, 0, %v280_v18  ;;  %v1227_v43 = vrot.slane %v1225_v31, 5 }
  0xc0   : > { %v1222_v51 = vor.u32 %v1221_v36, %v1217_v40  ;;  %v3495_v28 = vsel %vm7405_vm2, %v3493_v25, %v3494_v47  ;;  %282 = vst [vmem:[#allocation2 + $0xb0] sm:$0x1] %v281_v61  ;;  %v5996_v52 = vpack.c.bf16 %v319_v4, %v319_v4  ;;  %v644_v41 = vshrl.u32 %v7585_v21, 16  ;;  %v3396_v53 = vld [vmem:[#allocation2 + $0x54] sm:$0xe] }
  0xc1   : > { %v1212_v58 = vor.u32 %v1211_v54, %v1208_v50  ;;  %v5823_v8 = vcombine.low %v3492_v45, %v3495_v28  ;;  %v647_v39 = vshll.u32 %v7585_v21, 16  ;;  %v228_v44 = vsel %vm7019_vm5, 0, %v227_v12 }
  0xc2   : > { %v1223_v10 = vrot.slane %v1222_v51, 4  ;;  %v646_v14 = vrot.slane %v644_v41, 7  ;;  %v652_v55 = vshrl.u32 %v5996_v52, 16  ;;  %v655_v15 = vshll.u32 %v5996_v52, 16  ;;  %229 = vst [vmem:[#allocation2 + $0xb4] sm:$0x1] %v228_v44 }
  0xc3   : > { %v1213_v20 = vrot.slane %v1212_v58, 4  ;;  %v7649_v48 = vld [vmem:[#allocation2 + $0xa0] sm:$0xf]  ;;  %6336 = vmatmul.mubr.msk.bf16.gmra.mrb[8].mxu0 %vm1349_vm12, %v5823_v8  ;;  %v284_v46 = vsel %vm7026_vm6, 0, %v283_v56  ;;  %v5997_v21 = vpack.c.bf16 %v320_v57, %v320_v57  ;;  %v7654_v37 = vld [vmem:[#allocation2 + $0x9c] sm:$0xf]  ;;  %v5998_v6 = vpack.c.bf16 %v321_v17, %v321_v17 }
  0xc4   : > { %v1228_v11 = vsel %vm7102_vm13, %v1223_v10, %v1227_v43  ;;  %v911_v60 = vld [vmem:[#allocation2 + $0xa4] sm:$0x1]  ;;  %v1239_v19 = vshll.u32 %v7649_v48, 16  ;;  %v1243_v23 = vshrl.u32 %v7649_v48, 16  ;;  %v649_v30 = vor.u32 %v647_v39, %v646_v14  ;;  %285 = vst [vmem:[#allocation2 + $0xbc] sm:$0x1] %v284_v46 }
  0xc5   : > { %v1218_v9 = vsel %vm7102_vm13, %v1213_v20, %v1217_v40  ;;  %v1230_v16 = vshrl.u32 %v7654_v37, 16  ;;  %v1233_v59 = vshll.u32 %v7654_v37, 16  ;;  %v1249_v62 = vshll.u32 %v911_v60, 16  ;;  %v3397_v46 = vld [vmem:[#allocation2 + $0x60] sm:$0xe] }
  0xc6   : > { %v5638_v45 = vcombine.low %v1218_v9, %v1228_v11  ;;  %v1241_v18 = vrot.slane %v1239_v19, 5  ;;  %v1245_v24 = vrot.slane %v1243_v23, 4  ;;  %v650_v35 = vrot.slane %v646_v14, 4  ;;  %v836_v36 = vld [vmem:[#allocation2 + $0xa8] sm:$0xf] }
  0xc7   : > { %v1232_v4 = vrot.slane %v1230_v16, 4  ;;  %v1235_v31 = vrot.slane %v1233_v59, 5  ;;  %v1251_v25 = vrot.slane %v1249_v62, 5  ;;  %v654_v47 = vrot.slane %v652_v55, 7  ;;  %v840_v54 = vld [vmem:[#allocation2 + $0xb0] sm:$0x1] }
  0xc8   : > { %6181 = vmatprep.mubr.msk.bf16.mxu1 %vm1349_vm12, %v5638_v45  ;;  %v1246_v50 = vor.u32 %v1245_v24, %v1241_v18  ;;  %v837_v40 = vsel %vm7069_vm9, %v649_v30, %v836_v36  ;;  %v661_v51 = vshrl.u32 %v5997_v21, 16  ;;  %v664_v61 = vshll.u32 %v5997_v21, 16  ;;  %v2691_v59 = vld [vmem:[#allocation2 + $0x70] sm:$0xf]  ;;  %v3398_v24 = vld [vmem:[#allocation2 + $0x6c] sm:$0xe] }
  0xc9   : > { %v1236_v12 = vor.u32 %v1235_v31, %v1232_v4  ;;  %v657_v43 = vor.u32 %v655_v15, %v654_v47  ;;  %v659_v28 = vrot.slane %v654_v47, 4  ;;  %838 = vst [vmem:[#allocation2 + $0xa8] sm:$0xf] %v837_v40  ;;  %v669_v52 = vshrl.u32 %v5998_v6, 16  ;;  %v843_v14 = vld [vmem:[#allocation2 + $0xb4] sm:$0xf] }
  0xca   : > { %v1247_v41 = vrot.slane %v1246_v50, 4  ;;  %v663_v56 = vrot.slane %v661_v51, 7  ;;  %v672_v57 = vshll.u32 %v5998_v6, 16  ;;  %v5808_v58 = vrot.slane %v3396_v53, 9 }
  0xcb   : > { %v1237_v10 = vrot.slane %v1236_v12, 4  ;;  %v658_v8 = vsel %vm7076_vm10, %v650_v35, %v657_v43  ;;  %v841_v39 = vsel %vm7019_vm5, %v659_v28, %v840_v54  ;;  %v671_v17 = vrot.slane %v669_v52, 7  ;;  %v847_v20 = vld [vmem:[#allocation2 + $0xbc] sm:$0x1] }
  0xcc   : > { %v1252_v55 = vsel %vm7102_vm13, %v1247_v41, %v1251_v25  ;;  %839 = vst.msk [vmem:[#allocation2 + $0xac] sm:$0xf] %vm170_vm1, %v658_v8  ;;  %842 = vst [vmem:[#allocation2 + $0xb0] sm:$0x1] %v841_v39  ;;  %v666_v15 = vor.u32 %v664_v61, %v663_v56  ;;  %v667_v44 = vrot.slane %v663_v56, 4  ;;  %v3498_v11 = vrot.slane %v7369_v63, 5 }
  0xcd   : > { %v1242_v21 = vsel %vm7102_vm13, %v1237_v10, %v1241_v18  ;;  %v674_v60 = vor.u32 %v672_v57, %v671_v17  ;;  %v676_v19 = vrot.slane %v671_v17, 4  ;;  %v3501_v23 = vrot.slane %v7374_v38, 5  ;;  %v2692_v38 = vld [vmem:[#allocation2 + $0x74] sm:$0x1] }
  0xce   : > { %v5639_v30 = vcombine.low %v1242_v21, %v1252_v55  ;;  %v844_v6 = vsel %vm7069_vm9, %v666_v15, %v843_v14  ;;  %v3499_v9 = vsel %vm7405_vm2, %v5808_v58, %v3498_v11  ;;  %v3500_v16 = vrot.slane %v3498_v11, 4 }
  0xcf   : > { %v675_v63 = vsel %vm7076_vm10, %v667_v44, %v674_v60  ;;  %845 = vst [vmem:[#allocation2 + $0xb4] sm:$0xf] %v844_v6  ;;  %v848_v62 = vsel %vm7019_vm5, %v676_v19, %v847_v20  ;;  %v5809_v45 = vrot.slane %v3397_v46, 9  ;;  %v3505_v18 = vrot.slane %v7476_v26, 5 }
  0xd0   : > { %6182 = vmatmul.mubr.msk.bf16.gmra.mrb[24].mxu1 %vm1349_vm12, %v5639_v30  ;;  %v7686_v35 = vld [vmem:[#allocation2 + $0xa8] sm:$0xf]  ;;  %846 = vst.msk [vmem:[#allocation2 + $0xb8] sm:$0xf] %vm170_vm1, %v675_v63  ;;  %849 = vst [vmem:[#allocation2 + $0xbc] sm:$0x1] %v848_v62  ;;  %v3502_v36 = vsel %vm7405_vm2, %v3500_v16, %v3501_v23 }
  0xd1   : > { %v3508_v4 = vrot.slane %v7478_v29, 5  ;;  %v1254_v31 = vshrl.u32 %v7686_v35, 16  ;;  %v1257_v25 = vshll.u32 %v7686_v35, 16  ;;  %v5824_v47 = vcombine.low %v3499_v9, %v3502_v36  ;;  %v3399_v23 = vld [vmem:[#allocation2 + $0x78] sm:$0xe] }
  0xd2   : > { %v3506_v26 = vsel %vm7405_vm2, %v5809_v45, %v3505_v18  ;;  %v3507_v53 = vrot.slane %v3505_v18, 4  ;;  %v5810_v50 = vrot.slane %v3398_v24, 9  ;;  %v3512_v40 = vrot.slane %v2691_v59, 5  ;;  %v7724_v59 = vld [vmem:[#allocation2 + $0x7c] sm:$0xf] }
  0xd3   : > { %v3515_v54 = vrot.slane %v2692_v38, 5  ;;  %v7696_v51 = vld [vmem:[#allocation2 + $0xac] sm:$0xf]  ;;  %v7698_v61 = vld [vmem:[#allocation2 + $0xb0] sm:$0x1]  ;;  %v1256_v12 = vrot.slane %v1254_v31, 4  ;;  %6339 = vmatprep.mubr.msk.bf16.mxu0 %vm1349_vm12, %v5824_v47 }
  0xd4   : > { %v1259_v43 = vrot.slane %v1257_v25, 5  ;;  %v1263_v29 = vshll.u32 %v7696_v51, 16  ;;  %v1267_v28 = vshrl.u32 %v7696_v51, 16  ;;  %v1273_v52 = vshll.u32 %v7698_v61, 16  ;;  %v7726_v63 = vld [vmem:[#allocation2 + $0x80] sm:$0x1] }
  0xd5   : > { %v3509_v41 = vsel %vm7405_vm2, %v3507_v53, %v3508_v4  ;;  %v3514_v58 = vrot.slane %v3512_v40, 4  ;;  %v3513_v14 = vsel %vm7405_vm2, %v5810_v50, %v3512_v40  ;;  %v2697_v36 = vld [vmem:[#allocation2 + $0x88] sm:$0xf]  ;;  %v5811_v47 = vrot.slane %v3399_v23, 9  ;;  %v3400_v53 = vld [vmem:[#allocation2 + $0x84] sm:$0xe] }
  0xd6   : > { %v1260_v56 = vor.u32 %v1259_v43, %v1256_v12  ;;  %v5825_v57 = vcombine.low %v3506_v26, %v3509_v41  ;;  %v1265_v10 = vrot.slane %v1263_v29, 5  ;;  %v1269_v8 = vrot.slane %v1267_v28, 4  ;;  %v7706_v17 = vld [vmem:[#allocation2 + $0xb4] sm:$0xf]  ;;  %v2698_v26 = vld [vmem:[#allocation2 + $0x8c] sm:$0x1] }
  0xd7   : > { %v1275_v39 = vrot.slane %v1273_v52, 5  ;;  %v7710_v15 = vld [vmem:[#allocation2 + $0xb8] sm:$0xf]  ;;  %v7712_v44 = vld [vmem:[#allocation2 + $0xbc] sm:$0x1]  ;;  %v1278_v20 = vshrl.u32 %v7706_v17, 16  ;;  %v3516_v11 = vsel %vm7405_vm2, %v3514_v58, %v3515_v54 }
  0xd8   : > { %v1261_v55 = vrot.slane %v1260_v56, 4  ;;  %6340 = vmatmul.mubr.msk.bf16.gmra.mrb[12].mxu0 %vm1349_vm12, %v5825_v57  ;;  %v1270_v46 = vor.u32 %v1269_v8, %v1265_v10  ;;  %v1281_v21 = vshll.u32 %v7706_v17, 16  ;;  %v1287_v60 = vshll.u32 %v7710_v15, 16  ;;  %v2700_v40 = vld [vmem:[#allocation2 + $0x94] sm:$0xf] }
  0xd9   : > { %v1291_v19 = vshrl.u32 %v7710_v15, 16  ;;  %v1280_v6 = vrot.slane %v1278_v20, 4  ;;  %v1297_v9 = vshll.u32 %v7712_v44, 16  ;;  %v5826_v16 = vcombine.low %v3513_v14, %v3516_v11  ;;  %v2701_v28 = vld [vmem:[#allocation2 + $0x98] sm:$0x1] }
  0xda   : > { %v1266_v30 = vsel %vm7102_vm13, %v1261_v55, %v1265_v10  ;;  %v1271_v62 = vrot.slane %v1270_v46, 4  ;;  %v1283_v45 = vrot.slane %v1281_v21, 5  ;;  %v1289_v18 = vrot.slane %v1287_v60, 5  ;;  %v7734_v52 = vld [vmem:[#allocation2 + $0x4] sm:$0xf] }
  0xdb   : > { %v1293_v38 = vrot.slane %v1291_v19, 4  ;;  %v1299_v24 = vrot.slane %v1297_v9, 5  ;;  %6343 = vmatprep.mubr.msk.bf16.mxu0 %vm1349_vm12, %v5826_v16  ;;  %v3519_v43 = vrot.slane %v7724_v59, 5  ;;  %v3522_v29 = vrot.slane %v7726_v63, 5  ;;  %v6804_v41 = vld [vmem:[#allocation2] sm:$0xf] }
  0xdc   : > { %v1276_v4 = vsel %vm7102_vm13, %v1271_v62, %v1275_v39  ;;  %v1284_v31 = vor.u32 %v1283_v45, %v1280_v6  ;;  %v5658_v56 = vcombine.low %v6804_v41, %v7734_v52  ;;  %v5812_v57 = vrot.slane %v3400_v53, 9  ;;  %v3401_v8 = vld [vmem:[#allocation2 + $0x90] sm:$0xe]  ;;  %v3402_v11 = vld [vmem:[#allocation2 + $0x9c] sm:$0xe] }
  0xdd   : > { %v1294_v25 = vor.u32 %v1293_v38, %v1289_v18  ;;  %v5640_v50 = vcombine.low %v1266_v30, %v1276_v4  ;;  %v3526_v58 = vrot.slane %v2697_v36, 5  ;;  %v3529_v10 = vrot.slane %v2698_v26, 5  ;;  %v2703_v19 = vld [vmem:[#allocation2 + $0xa0] sm:$0xf]  ;;  %v2704_v16 = vld [vmem:[#allocation2 + $0xa4] sm:$0x1] }
  0xde   : > { %v1285_v54 = vrot.slane %v1284_v31, 4  ;;  %v3520_v55 = vsel %vm7405_vm2, %v5811_v47, %v3519_v43  ;;  %v3521_v20 = vrot.slane %v3519_v43, 4  ;;  %v5813_v30 = vrot.slane %v3401_v8, 9  ;;  %v2706_v38 = vld [vmem:[#allocation2 + $0xac] sm:$0xf] }
  0xdf   : > { %v1295_v12 = vrot.slane %v1294_v25, 4  ;;  %6185 = vmatprep.mubr.msk.bf16.mxu1 %vm1349_vm12, %v5640_v50  ;;  %v3527_v21 = vsel %vm7405_vm2, %v5812_v57, %v3526_v58  ;;  %v3528_v60 = vrot.slane %v3526_v58, 4  ;;  %v3533_v6 = vrot.slane %v2700_v40, 5  ;;  %v2709_v25 = vld [vmem:[#allocation2 + $0xb8] sm:$0xf]  ;;  %v322_v57 = vld [vmem:[%s7047_s9 + $0xf0] sm:$0xff] }
  0xe0   : > { %v1290_v39 = vsel %vm7102_vm13, %v1285_v54, %v1289_v18  ;;  %v3523_v23 = vsel %vm7405_vm2, %v3521_v20, %v3522_v29  ;;  %v3536_v9 = vrot.slane %v2701_v28, 5  ;;  %v5814_v18 = vrot.slane %v3402_v11, 9  ;;  %v230_v47 = vld [vmem:[#allocation2 + $0xc0] sm:$0x1]  ;;  %v3403_v40 = vld [vmem:[#allocation2 + $0xa8] sm:$0xe] }
  0xe1   : > { %v1300_v14 = vsel %vm7102_vm13, %v1295_v12, %v1299_v24  ;;  %v5827_v62 = vcombine.low %v3520_v55, %v3523_v23  ;;  %v3530_v45 = vsel %vm7405_vm2, %v3528_v60, %v3529_v10  ;;  %v3535_v36 = vrot.slane %v3533_v6, 4  ;;  %v286_v12 = vld [vmem:[#allocation2 + $0xc8] sm:$0x1]  ;;  %v6805_v43 = vld [vmem:[#allocation2 + $0xc] sm:$0xf]  ;;  %v323_v58 = vld [vmem:[%s7047_s9 + $0xf8] sm:$0xff] }
  0xe2   : > { %v5641_v46 = vcombine.low %v1290_v39, %v1300_v14  ;;  %v5828_v24 = vcombine.low %v3527_v21, %v3530_v45  ;;  %v3540_v4 = vrot.slane %v2703_v19, 5  ;;  %v3543_v31 = vrot.slane %v2704_v16, 5  ;;  %v7757_v29 = vld [vmem:[#allocation2 + $0x10] sm:$0xf]  ;;  %v6807_v10 = vld [vmem:[%s8961_s1 + $0x8] sm:$0xf] }
  0xe3   : > { %6344 = vmatmul.mubr.msk.bf16.gmra.mrb[16].mxu0 %vm1349_vm12, %v5827_v62  ;;  %v3534_v26 = vsel %vm7405_vm2, %v5813_v30, %v3533_v6  ;;  %v3537_v53 = vsel %vm7405_vm2, %v3535_v36, %v3536_v9  ;;  %v3547_v54 = vrot.slane %v2706_v38, 5  ;;  %v5659_v28 = vcombine.low %v6805_v43, %v7757_v29  ;;  %v6808_v39 = vld [vmem:[#allocation2 + $0x18] sm:$0xf]  ;;  %v7768_v14 = vld [vmem:[#allocation2 + $0x1c] sm:$0xf]  ;;  %s5591_s9 = sshll.u32 %s161_s6, 8 }
  0xe4   : > { %6186 = vmatmul.mubr.msk.bf16.gmra.mrb[28].mxu1 %vm1349_vm12, %v5641_v46  ;;  %6347 = vmatprep.mubr.msk.bf16.mxu0 %vm1349_vm12, %v5828_v24  ;;  %v3542_v50 = vrot.slane %v3540_v4, 4  ;;  %v3541_v41 = vsel %vm7405_vm2, %v5814_v18, %v3540_v4  ;;  %v2115_v8 = vsel %vm1398_vm0, %v6807_v10, 0  ;;  %v5660_v55 = vcombine.low %v6808_v39, %v7768_v14  ;;  %v2710_v11 = vld [vmem:[#allocation2 + $0xbc] sm:$0x1]  ;;  %v3404_v46 = vld [vmem:[#allocation2 + $0xb4] sm:$0xe] }
  0xe5   : > { %6191 = vmatprep.mubr.msk.bf16.mxu1 %vm1349_vm12, %v5658_v56  ;;  %v2707_v56 = vld [vmem:[#allocation2 + $0xb0] sm:$0x1]  ;;  %v3554_v21 = vrot.slane %v2709_v25, 5  ;;  %v5829_v60 = vcombine.low %v3534_v26, %v3537_v53  ;;  %v5815_v19 = vrot.slane %v3403_v40, 9  ;;  %v231_v23 = vsel %vm7019_vm5, 0, %v230_v47  ;;  %s8810_s10 = scalar_lea.vmem [#allocation3], %s5591_s9 }
  0xe6   : > { %v3544_v20 = vsel %vm7405_vm2, %v3542_v50, %v3543_v31  ;;  %v287_v30 = vsel %vm7026_vm6, 0, %v286_v12  ;;  %v3549_v9 = vrot.slane %v3547_v54, 4  ;;  %v3550_v16 = vrot.slane %v2707_v56, 5  ;;  %232 = vst [vmem:[#allocation2 + $0xc0] sm:$0x1] %v231_v23  ;;  %s5525_s17 = sshll.u32 %s8810_s10, 4  ;;  %s8909_s17 = int_to_ptr.vmem [resolvable:$true] %s5525_s17 }
  0xe7   : > { %v5830_v6 = vcombine.low %v3541_v41, %v3544_v20  ;;  %288 = vst [vmem:[#allocation2 + $0xc8] sm:$0x1] %v287_v30  ;;  %v5999_v62 = vpack.c.bf16 %v322_v57, %v322_v57  ;;  %v7780_v45 = vld [vmem:[%s8961_s1 + $0xc] sm:$0xf]  ;;  %v5816_v18 = vrot.slane %v3404_v46, 9  ;;  %v3556_v38 = vrot.slane %v3554_v21, 4  ;;  %p6868_p0 = scmp.lt.s32.totalorder %s8909_s17, %s6866_s27 }
  0xe8   : > { %v3557_v24 = vrot.slane %v2710_v11, 5  ;;  %v6000_v36 = vpack.c.bf16 %v323_v58, %v323_v58  ;;  %v3548_v26 = vsel %vm7405_vm2, %v5815_v19, %v3547_v54  ;;  %v3551_v53 = vsel %vm7405_vm2, %v3549_v9, %v3550_v16  ;;  %v7792_v40 = vld [vmem:[#allocation2 + $0x28] sm:$0xf]  ;;  %v6811_v12 = vld [vmem:[#allocation2 + $0x24] sm:$0xf]  ;;  %s6861_s25 = scalar_lea.vmem %s8909_s17, 4096 }
  0xe9   : > { %v678_v4 = vshrl.u32 %v5999_v62, 16  ;;  %v681_v31 = vshll.u32 %v5999_v62, 16  ;;  %v5661_v43 = vcombine.low %v6811_v12, %v7792_v40  ;;  %v6812_v57 = vld [vmem:[#allocation2 + $0x30] sm:$0xf]  ;;  %v7799_v58 = vld [vmem:[#allocation2 + $0x34] sm:$0xf]  ;;  %v5831_v39 = vcombine.low %v3548_v26, %v3551_v53  ;;  %p6862_p11 = scmp.ne.s32.totalorder %s8909_s17, %s6861_s25  ;;  %p6869_p1 = scmp.lt.s32.totalorder %s6867_s28, %s6861_s25 }
  0xea   : > { %v686_v25 = vshrl.u32 %v6000_v36, 16  ;;  %v689_v47 = vshll.u32 %v6000_v36, 16  ;;  %v3558_v41 = vsel %vm7405_vm2, %v3556_v38, %v3557_v24  ;;  %v5662_v54 = vcombine.low %v6812_v57, %v7799_v58  ;;  %v7813_v30 = vld [vmem:[#allocation2 + $0x40] sm:$0xf]  ;;  %v7816_v9 = vld [vmem:[#allocation2 + $0x4c] sm:$0xf] }
  0xeb   : > { %6348 = vmatmul.mubr.msk.bf16.gmra.mrb[20].mxu0 %vm1349_vm12, %v5829_v60  ;;  %v680_v50 = vrot.slane %v678_v4, 7  ;;  %v5664_v16 = vcombine.low %v6816_v49, %v7816_v9  ;;  %v1915_v12 = vrot.slane %v7757_v29, 5  ;;  %v1855_v57 = vld [vmem:[#allocation2] sm:$0xe]  ;;  %v6772_v49 = vld [vmem:[#allocation2 + $0x24] sm:$0xff]   ;;  %p6863_p12 = pnand %p6862_p11, %p6987_p5  ;;  %p6870_p2 = por %p6869_p1, %p6868_p0 }
  0xec   : > { %6192 = vmatmul.mubr.msk.bf16.vlgmr.msra.gmra.mrb[0].mxu1 %vm1349_vm12, %v5659_v28  ;;  %6351 = vmatprep.mubr.msk.bf16.mxu0 %vm1349_vm12, %v5830_v6  ;;  %v3555_v28 = vsel %vm7405_vm2, %v5816_v18, %v3554_v21  ;;  %v688_v56 = vrot.slane %v686_v25, 7  ;;  %v5663_v6 = vcombine.low %v6814_v42, %v7813_v30  ;;  %v233_v18 = vld [vmem:[#allocation2 + $0xcc] sm:$0x1]  ;;  %v2940_v25 = vshll.u32 %v7724_v59, 16  ;;  %v6823_v42 = vld [vmem:[#allocation2 + $0x14] sm:$0x1] }
  0xed   : > { %6224 = vmatpush3.bf16.msra.mxu1 %v2115_v8  ;;  %6195 = vmatprep.mubr.msk.bf16.mxu1 %vm1349_vm12, %v5660_v55  ;;  %v683_v10 = vor.u32 %v681_v31, %v680_v50  ;;  %v684_v8 = vrot.slane %v680_v50, 4  ;;  %v850_v11 = vld [vmem:[#allocation2 + $0xc0] sm:$0xf]  ;;  %v5832_v60 = vcombine.low %v3555_v28, %v3558_v41  ;;  %v234_v50 = vsel %vm7019_vm5, 0, %v233_v18  ;;  %v7828_v28 = vld [vmem:[#allocation2 + $0x58] sm:$0xf]  ;;  %p6864_p13 = pneg %p6863_p12 }
  0xee   : > { %6722 = vmatprep.subr.msk.bf16.mxu1 %vm1398_vm0, %v7780_v45  ;;  %v691_v55 = vor.u32 %v689_v47, %v688_v56  ;;  %v693_v20 = vrot.slane %v688_v56, 4  ;;  %v854_v46 = vld [vmem:[#allocation2 + $0xc8] sm:$0x1]  ;;  %v2944_v47 = vshrl.u32 %v7724_v59, 16  ;;  %v6771_v56 = vld [vmem:[#allocation2 + $0x18] sm:$0xff]  }
  0xef   : > { %v851_v21 = vsel %vm7069_vm9, %v683_v10, %v850_v11  ;;  %235 = vst [vmem:[#allocation2 + $0xcc] sm:$0x1] %v234_v50  ;;  %v7833_v10 = vld [vmem:[#allocation2 + $0x64] sm:$0xf]  ;;  %v1859_v50 = vld [vmem:[#allocation2 + $0x30] sm:$0xe]  ;;  %p6871_p3 = pnand %p6870_p2, %p6864_p13 }
  0xf0   : > { %v692_v19 = vsel %vm7076_vm10, %v684_v8, %v691_v55  ;;  %852 = vst [vmem:[#allocation2 + $0xc0] sm:$0xf] %v851_v21  ;;  %v855_v23 = vsel %vm7019_vm5, %v693_v20, %v854_v46  ;;  %v1908_v55 = vrot.slane %v7734_v52, 5  ;;  %v7838_v20 = vrot.slane %v2940_v25, 5  ;;  %v1857_v46 = vld [vmem:[#allocation2 + $0x18] sm:$0xe] }
  0xf1   : > { %853 = vst.msk [vmem:[#allocation2 + $0xc4] sm:$0xf] %vm170_vm1, %v692_v19  ;;  %856 = vst [vmem:[#allocation2 + $0xc8] sm:$0x1] %v855_v23  ;;  %v2946_v11 = vrot.slane %v2944_v47, 4  ;;  %v5691_v23 = vrot.slane %v1856_v5, 9 }
  0xf2   : > { %8995 = vst [vmem:[#allocation8_spill] sm:$0xff] %v7838_v20  ;;  %v6822_v21 = vld [vmem:[#allocation2 + $0x8] sm:$0x1]  ;;  %v1918_v52 = vrot.slane %v6823_v42, 5  ;;  %v4744_v25 = vsel %vm1398_vm0, %v7537_v34, 0 }
  0xf3   : > { %6352 = vmatmul.mubr.msk.bf16.gmra.mrb[24].mxu0 %vm1349_vm12, %v5831_v39  ;;  %v2950_v39 = vshll.u32 %v7726_v63, 16  ;;  %v1911_v19 = vrot.slane %v6822_v21, 5  ;;  %v5690_v63 = vrot.slane %v1855_v57, 9  ;;  %v2947_v18 = vor.u32 %v2946_v11, %v7838_v20  ;;  %v1860_v34 = vld [vmem:[#allocation2 + $0x3c] sm:$0xe] }
  0xf4   : > { %6196 = vmatmul.mubr.msk.bf16.gmra.mrb[4].mxu1 %vm1349_vm12, %v5661_v43  ;;  %6355 = vmatprep.mubr.msk.bf16.mxu0 %vm1349_vm12, %v5832_v60  ;;  %v6818_v43 = vld [vmem:[#allocation2 + $0x54] sm:$0xf]  ;;  %v1922_v60 = vrot.slane %v7768_v14, 5  ;;  %v6825_v14 = vld [vmem:[#allocation2 + $0x6c] sm:$0xf] }
  0xf5   : > { %6199 = vmatprep.mubr.msk.bf16.mxu1 %vm1349_vm12, %v5662_v54  ;;  %v5665_v41 = vcombine.low %v6818_v43, %v7828_v28  ;;  %v6820_v54 = vld [vmem:[#allocation2 + $0x60] sm:$0xf]  ;;  %v1936_v43 = vrot.slane %v7799_v58, 5  ;;  %v7861_v57 = vsel %vm7405_vm2, %v5690_v63, %v1908_v55  ;;  %v6827_v58 = vld [vmem:[#allocation2 + $0x2c] sm:$0x1]  ;;  %v5670_v63 = vcombine.low %v7620_v0, %v7611_v13  ;;  %v6776_v13 = vld [vmem:[#allocation2 + $0x54] sm:$0xff]  }
  0xf6   : > { %v5666_v8 = vcombine.low %v6820_v54, %v7833_v10  ;;  %v1924_v47 = vrot.slane %v1922_v60, 4  ;;  %v7882_v11 = vld [vmem:[%s8961_s1 + $0x20] sm:$0xf]  ;;  %v1861_v0 = vld [vmem:[#allocation2 + $0x48] sm:$0xe] }
  0xf7   : > { %v3405_v62 = vld [vmem:[#allocation2 + $0xc0] sm:$0xe]  ;;  %v1938_v21 = vrot.slane %v1936_v43, 4  ;;  %v6833_v42 = vld [vmem:[#allocation2 + $0x7c] sm:$0xf] }
  0xf8   : > { %v2712_v38 = vld [vmem:[#allocation2 + $0xc4] sm:$0xf]  ;;  %v2713_v24 = vld [vmem:[#allocation2 + $0xc8] sm:$0x1]  ;;  %v5817_v36 = vrot.slane %v3405_v62, 9  ;;  %v1917_v62 = vrot.slane %v1915_v12, 4 }
  0xf9   : > { %v3561_v4 = vrot.slane %v2712_v38, 5  ;;  %v3564_v31 = vrot.slane %v2713_v24, 5  ;;  %v7848_v38 = vld [vmem:[#allocation2 + $0x70] sm:$0xf] }
  0xfa   : > { %v5667_v24 = vcombine.low %v6825_v14, %v7848_v38 }
  0xfb   : > { %v3562_v26 = vsel %vm7405_vm2, %v5817_v36, %v3561_v4  ;;  %v3563_v53 = vrot.slane %v3561_v4, 4  ;;  %v5692_v36 = vrot.slane %v1857_v46, 9  ;;  %v1858_v4 = vld [vmem:[#allocation2 + $0x24] sm:$0xe] }
  0xfc   : > { %6200 = vmatmul.mubr.msk.bf16.gmra.mrb[8].mxu1 %vm1349_vm12, %v5663_v6  ;;  %v7845_v6 = vrot.slane %v2950_v39, 5 }
  0xfd   : > { %6203 = vmatprep.mubr.msk.bf16.mxu1 %vm1349_vm12, %v5664_v16  ;;  %v3565_v59 = vsel %vm7405_vm2, %v3563_v53, %v3564_v31  ;;  %v1910_v16 = vrot.slane %v1908_v55, 4  ;;  %v1929_v31 = vrot.slane %v7792_v40, 5  ;;  %v7865_v40 = vsel %vm7405_vm2, %v5691_v23, %v1915_v12 }
  0xfe   : > { %v5833_v29 = vcombine.low %v3562_v26, %v3565_v59  ;;  %8996 = vst [vmem:[#allocation9_spill] sm:$0xff] %v7845_v6  ;;  %v6826_v26 = vld [vmem:[#allocation2 + $0x20] sm:$0x1]  ;;  %v6773_v59 = vld [vmem:[#allocation2 + $0x30] sm:$0xff]   ;;  %v7877_v5 = vsel %vm7405_vm2, %v5692_v36, %v1922_v60  ;;  %v5694_v12 = vrot.slane %v1859_v50, 9  ;;  %v5695_v60 = vrot.slane %v1860_v34, 9 }
  0xff   : > { %v1925_v53 = vrot.slane %v6826_v26, 5  ;;  %v7869_v54 = vsel %vm7405_vm2, %v1910_v16, %v1911_v19  ;;  %v1931_v39 = vrot.slane %v1929_v31, 4  ;;  %v1943_v19 = vrot.slane %v7813_v30, 5  ;;  %v4221_v16 = vld [vmem:[#allocation2 + $0x30] sm:$0xf] }
 0x100   : > { %6356 = vmatmul.mubr.msk.bf16.gmra.mrb[28].mxu0 %vm1349_vm12, %v5833_v29  ;;  %v6828_v29 = vld [vmem:[#allocation2 + $0x38] sm:$0x1]  ;;  %v5671_v23 = vcombine.low %v7654_v37, %v7649_v48  ;;  %v7918_v14 = vsel %vm7405_vm2, %v5694_v12, %v1936_v43  ;;  %v1862_v43 = vld [vmem:[#allocation2 + $0x54] sm:$0xe]  ;;  %v5696_v34 = vrot.slane %v1861_v0, 9  ;;  %v1957_v12 = vrot.slane %v7828_v28, 5 }
 0x101   : > { %6361 = vmatprep.mubr.msk.bf16.mxu0 %vm1349_vm12, %v6771_v56  ;;  %v5669_v56 = vcombine.low %v7581_v1, %v7583_v2  ;;  %v1939_v55 = vrot.slane %v6828_v29, 5  ;;  %v7888_v46 = vsel %vm7405_vm2, %v1924_v47, %v1925_v53  ;;  %v6775_v47 = vld [vmem:[#allocation2 + $0x48] sm:$0xff]   ;;  %v1945_v50 = vrot.slane %v1943_v19, 4  ;;  %v6834_v37 = vld [vmem:[#allocation2 + $0x74] sm:$0x1] }
 0x102   : > { %v4219_v29 = vld [vmem:[#allocation2 + $0x28] sm:$0xf]  ;;  %v5697_v0 = vrot.slane %v1862_v43, 9  ;;  %v1959_v2 = vrot.slane %v1957_v12, 4 }
 0x103   : > { %v7926_v53 = vsel %vm7405_vm2, %v1938_v21, %v1939_v55 }
 0x104   : > { %6204 = vmatmul.mubr.msk.bf16.gmra.mrb[12].mxu1 %vm1349_vm12, %v5665_v41  ;;  %v5668_v41 = vcombine.low %v7551_v22, %v7557_v32  ;;  %v7873_v22 = vsel %vm7405_vm2, %v1917_v62, %v1918_v52  ;;  %v5693_v32 = vrot.slane %v1858_v4, 9  ;;  %v1950_v52 = vrot.slane %v7816_v9, 5  ;;  %v6774_v62 = vld [vmem:[#allocation2 + $0x3c] sm:$0xff]   ;;  %v4215_v4 = vld [vmem:[#allocation2 + $0x18] sm:$0xf] }
 0x105   : > { %6207 = vmatprep.mubr.msk.bf16.mxu1 %vm1349_vm12, %v5666_v8  ;;  %v1932_v8 = vrot.slane %v6827_v58, 5 }
 0x107   : > { %v7922_v26 = vsel %vm7405_vm2, %v1931_v39, %v1932_v8  ;;  %v4264_v8 = vshrl.u32 %v4215_v4, 16  ;;  %v4267_v39 = vshll.u32 %v4215_v4, 16  ;;  %v1863_v4 = vld [vmem:[#allocation2 + $0x60] sm:$0xe] }
 0x108   : > { %6362 = vmatmul.mubr.msk.bf16.vlgmr.msra.gmra.mrb[0].mxu0 %vm1349_vm12, %v6772_v49  ;;  %v7899_v49 = vrot.slane %v2947_v18, 4  ;;  %v7914_v18 = vsel %vm7405_vm2, %v5693_v32, %v1929_v31  ;;  %v7930_v31 = vsel %vm7405_vm2, %v5695_v60, %v1943_v19  ;;  %v6830_v32 = vld [vmem:[#allocation2 + $0x50] sm:$0x1]  ;;  %v5698_v21 = vrot.slane %v1863_v4, 9 }
 0x109   : > { %6394 = vmatpush3.bf16.msra.mxu0 %v4744_v25  ;;  %6365 = vmatprep.mubr.msk.bf16.mxu0 %vm1349_vm12, %v6773_v59  ;;  %v4216_v25 = vld [vmem:[#allocation2 + $0x1c] sm:$0xf]  ;;  %v1952_v59 = vrot.slane %v1950_v52, 4  ;;  %v1953_v58 = vrot.slane %v6830_v32, 5  ;;  %v4301_v32 = vshrl.u32 %v4219_v29, 16  ;;  %v4269_v43 = vrot.slane %v4267_v39, 5 }
 0x10a   : > { %8997 = vst [vmem:[#allocation10_spill] sm:$0xff] %v7899_v49  ;;  %6728 = vmatprep.subr.msk.bf16.mxu0 %vm1398_vm0, %v7882_v11  ;;  %v4277_v9 = vshrl.u32 %v4216_v25, 16 }
 0x10b   : > { %v7954_v1 = vsel %vm7405_vm2, %v1952_v59, %v1953_v58  ;;  %v7964_v59 = vsel %vm7405_vm2, %v5697_v0, %v1957_v12  ;;  %v1964_v58 = vrot.slane %v7833_v10, 5  ;;  %v4303_v39 = vrot.slane %v4301_v32, 4 }
 0x10c   : > { %6208 = vmatmul.mubr.msk.bf16.gmra.mrb[16].mxu1 %vm1349_vm12, %v5667_v24  ;;  %v6829_v24 = vld [vmem:[#allocation2 + $0x44] sm:$0x1] }
 0x10d   : > { %6211 = vmatprep.mubr.msk.bf16.mxu1 %vm1349_vm12, %v5668_v41  ;;  %v1946_v36 = vrot.slane %v6829_v24, 5  ;;  %v4218_v41 = vld [vmem:[#allocation2 + $0x24] sm:$0xf]  ;;  %v4273_v24 = vshll.u32 %v4216_v25, 16  ;;  %v4297_v25 = vshll.u32 %v4219_v29, 16  ;;  %v7980_v32 = vsel %vm7405_vm2, %v5698_v21, %v1964_v58 }
 0x10e   : > { %v4288_v60 = vshrl.u32 %v4218_v41, 16  ;;  %v4291_v19 = vshll.u32 %v4218_v41, 16  ;;  %v7950_v41 = vsel %vm7405_vm2, %v5696_v34, %v1950_v52  ;;  %v4217_v52 = vld [vmem:[#allocation2 + $0x20] sm:$0x1]  ;;  %v8999_v21 = vcombine.low %v7686_v35, %v7696_v51 }
 0x10f   : > { %v7944_v28 = vsel %vm7405_vm2, %v1945_v50, %v1946_v36  ;;  %v7956_v36 = vld [vmem:[#allocation2 + $0x6c] sm:$0xe]  ;;  %v4266_v50 = vrot.slane %v4264_v8, 4  ;;  %v7958_v29 = vrot.slane %v4273_v24, 5  ;;  %v7967_v8 = vrot.slane %v4297_v25, 5  ;;  %v6777_v24 = vld [vmem:[#allocation2 + $0x60] sm:$0xff]  }
 0x110   : > { %6366 = vmatmul.mubr.msk.bf16.gmra.mrb[4].mxu0 %vm1349_vm12, %v6774_v62  ;;  %v4290_v34 = vrot.slane %v4288_v60, 4  ;;  %v4293_v55 = vrot.slane %v4291_v19, 5  ;;  %v5699_v60 = vrot.slane %v7956_v36, 9  ;;  %v1971_v19 = vrot.slane %v7848_v38, 5 }
 0x111   : > { %6369 = vmatprep.mubr.msk.bf16.mxu0 %vm1349_vm12, %v6775_v47  ;;  %v6832_v47 = vld [vmem:[#allocation2 + $0x68] sm:$0x1]  ;;  %v4270_v10 = vor.u32 %v4269_v43, %v4266_v50  ;;  %v4283_v25 = vshll.u32 %v4217_v52, 16  ;;  %v1978_v36 = vrot.slane %v6833_v42, 5  ;;  %v1966_v38 = vrot.slane %v1964_v58, 4 }
 0x112   : > { %v1967_v4 = vrot.slane %v6832_v47, 5  ;;  %v1865_v47 = vld [vmem:[#allocation2 + $0x78] sm:$0xe]  ;;  %v4315_v50 = vshll.u32 %v4221_v16, 16  ;;  %v1973_v48 = vrot.slane %v1971_v19, 4 }
 0x113   : > { %v7995_v58 = vld [vmem:[#allocation2 + $0x34] sm:$0xf] }
 0x114   : > { %6212 = vmatmul.mubr.msk.bf16.gmra.mrb[20].mxu1 %vm1349_vm12, %v5669_v56  ;;  %v6831_v56 = vld [vmem:[#allocation2 + $0x5c] sm:$0x1]  ;;  %9000 = vst [vmem:[#allocation12_spill] sm:$0xff] %v7995_v58  ;;  %v4317_v6 = vrot.slane %v4315_v50, 5 }
 0x115   : > { %6215 = vmatprep.mubr.msk.bf16.mxu1 %vm1349_vm12, %v5670_v63  ;;  %v1960_v62 = vrot.slane %v6831_v56, 5  ;;  %v4279_v63 = vrot.slane %v4277_v9, 4  ;;  %v4220_v56 = vld [vmem:[#allocation2 + $0x2c] sm:$0x1]  ;;  %v4294_v9 = vor.u32 %v4293_v55, %v4290_v34  ;;  %v1866_v55 = vld [vmem:[#allocation2 + $0x84] sm:$0xe] }
 0x116   : > { %v4307_v30 = vshll.u32 %v4220_v56, 16  ;;  %v4285_v34 = vrot.slane %v4283_v25, 5  ;;  %v5701_v42 = vrot.slane %v1866_v55, 9  ;;  %v4224_v50 = vld [vmem:[#allocation2 + $0x3c] sm:$0xf] }
 0x117   : > { %v7975_v12 = vsel %vm7405_vm2, %v1959_v2, %v1960_v62  ;;  %v4280_v0 = vor.u32 %v4279_v63, %v7958_v29  ;;  %v4304_v2 = vor.u32 %v4303_v39, %v7967_v8  ;;  %v4312_v62 = vshrl.u32 %v4221_v16, 16 }
 0x118   : > { %8998 = vst [vmem:[#allocation11_spill] sm:$0xff] %v7975_v12  ;;  %6370 = vmatmul.mubr.msk.bf16.gmra.mrb[8].mxu0 %vm1349_vm12, %v6776_v13  ;;  %v6835_v13 = vld [vmem:[#allocation2 + $0x88] sm:$0xf]  ;;  %v4271_v63 = vrot.slane %v4270_v10, 4  ;;  %v5700_v16 = vrot.slane %v1865_v47, 9  ;;  %v4295_v35 = vrot.slane %v4294_v9, 4  ;;  %v8001_v9 = vsel %vm7405_vm2, %v1966_v38, %v1967_v4 }
 0x119   : > { %6373 = vmatprep.mubr.msk.bf16.mxu0 %vm1349_vm12, %v6777_v24  ;;  %v1985_v43 = vrot.slane %v6835_v13, 5  ;;  %v4281_v52 = vrot.slane %v4280_v0, 4  ;;  %v4309_v56 = vrot.slane %v4307_v30, 5  ;;  %v1980_v39 = vrot.slane %v1978_v36, 4  ;;  %v6837_v12 = vld [vmem:[#allocation2 + $0x8c] sm:$0x1] }
 0x11a   : > { %v4305_v20 = vrot.slane %v4304_v2, 4  ;;  %v4314_v49 = vrot.slane %v4312_v62, 4  ;;  %v1988_v13 = vrot.slane %v6837_v12, 5  ;;  %v4321_v10 = vshll.u32 %v7995_v58, 16  ;;  %v8014_v47 = vld [vmem:[#allocation2 + $0x38] sm:$0x1] }
 0x11b   : > { %v1987_v7 = vrot.slane %v1985_v43, 4  ;;  %v4325_v0 = vshrl.u32 %v7995_v58, 16  ;;  %v8005_v30 = vsel %vm7405_vm2, %v5699_v60, %v1971_v19  ;;  %v4276_v12 = vsel %vm7102_vm13, %v4271_v63, %v7958_v29  ;;  %9001 = vst [vmem:[#allocation13_spill] sm:$0xff] %v8014_v47 }
 0x11c   : > { %6216 = vmatmul.mubr.msk.bf16.gmra.mrb[24].mxu1 %vm1349_vm12, %v5671_v23  ;;  %v1974_v23 = vrot.slane %v6834_v37, 5  ;;  %v6779_v37 = vld [vmem:[#allocation2 + $0x78] sm:$0xff]   ;;  %v4286_v2 = vsel %vm7102_vm13, %v4281_v52, %v4285_v34  ;;  %v4300_v4 = vsel %vm7102_vm13, %v4295_v35, %v7967_v8  ;;  %v8023_v60 = vsel %vm7405_vm2, %v5700_v16, %v1978_v36  ;;  %v8070_v52 = vld [vmem:[#allocation2 + $0x4c] sm:$0xf]  ;;  %v4230_v34 = vld [vmem:[#allocation2 + $0x54] sm:$0xf] }
 0x11d   : > { %6219 = vmatprep.mubr.msk.bf16.mxu1 %vm1349_vm12, %v8999_v21  ;;  %v6836_v21 = vld [vmem:[#allocation2 + $0x80] sm:$0x1]  ;;  %v9002_v29 = vcombine.low %v7706_v17, %v7710_v15  ;;  %v2471_v38 = vsel %vm1398_vm0, %v7780_v45, 0  ;;  %v4310_v8 = vsel %vm7102_vm13, %v4305_v20, %v4309_v56  ;;  %v8040_v36 = vsel %vm7405_vm2, %v5701_v42, %v1985_v43  ;;  %v6780_v16 = vld [vmem:[#allocation2 + $0x84] sm:$0xff]  }
 0x11e   : > { %v1981_v24 = vrot.slane %v6836_v21, 5  ;;  %v8009_v25 = vsel %vm7405_vm2, %v1973_v48, %v1974_v23  ;;  %v4318_v62 = vor.u32 %v4317_v6, %v4314_v49  ;;  %v9003_v48 = vcombine.low %v7861_v57, %v7869_v54  ;;  %v8054_v42 = vld [vmem:[#allocation2 + $0x40] sm:$0xf]  ;;  %v8078_v21 = vld [vmem:[#allocation2 + $0x58] sm:$0xf] }
 0x11f   : > { %v8051_v17 = vrot.slane %v4321_v10, 5  ;;  %v4327_v45 = vrot.slane %v4325_v0, 4  ;;  %v4331_v20 = vshll.u32 %v8014_v47, 16  ;;  %9004 = vst [vmem:[#allocation14_spill] sm:$0xff] %v8054_v42  ;;  %v8060_v54 = vcombine.low %v4276_v12, %v4286_v2  ;;  %9005 = vst [vmem:[#allocation15_spill] sm:$0xff] %v8078_v21 }
 0x120   : > { %v8027_v19 = vsel %vm7405_vm2, %v1980_v39, %v1981_v24  ;;  %6374 = vmatmul.mubr.msk.bf16.gmra.mrb[12].mxu0 %vm1349_vm12, %v6778_v3  ;;  %v8049_v3 = vsel %vm7405_vm2, %v1987_v7, %v1988_v13  ;;  %v8064_v49 = vsel %vm1398_vm0, %v7882_v11, 0  ;;  %v4227_v7 = vld [vmem:[#allocation2 + $0x48] sm:$0xf]  ;;  %v8066_v23 = vcombine.low %v4300_v4, %v4310_v8  ;;  %v6781_v24 = vld [vmem:[#allocation2 + $0x90] sm:$0xff]   ;;  %v8083_v10 = vld [vmem:[#allocation2 + $0x44] sm:$0x1] }
 0x121   : > { %6377 = vmatprep.mubr.msk.bf16.mxu0 %vm1349_vm12, %v6779_v37  ;;  %v4336_v43 = vshrl.u32 %v4224_v50, 16  ;;  %v4339_v63 = vshll.u32 %v4224_v50, 16  ;;  %v8074_v56 = vrot.slane %v4318_v62, 4  ;;  %v4345_v11 = vshll.u32 %v8054_v42, 16  ;;  %9006 = vst [vmem:[#allocation16_spill] sm:$0xff] %v8083_v10 }
 0x122   : > { %v4349_v39 = vshrl.u32 %v8054_v42, 16  ;;  %v4328_v37 = vor.u32 %v4327_v45, %v8051_v17  ;;  %v8081_v13 = vrot.slane %v4331_v20, 5  ;;  %v4360_v0 = vshrl.u32 %v4227_v7, 16  ;;  %v1867_v2 = vld [vmem:[#allocation2 + $0x90] sm:$0xe] }
 0x123   : > { %v4363_v12 = vshll.u32 %v4227_v7, 16  ;;  %v4369_v4 = vshll.u32 %v8070_v52, 16  ;;  %v4384_v8 = vshrl.u32 %v4230_v34, 16  ;;  %v4387_v62 = vshll.u32 %v4230_v34, 16  ;;  %v6838_v6 = vld [vmem:[#allocation2 + $0x94] sm:$0xf] }
 0x124   : > { %6220 = vmatmul.mubr.msk.bf16.gmra.mrb[28].mxu1 %vm1349_vm12, %v9002_v29  ;;  %v4373_v29 = vshrl.u32 %v8070_v52, 16  ;;  %v4338_v50 = vrot.slane %v4336_v43, 4  ;;  %v4393_v35 = vshll.u32 %v8078_v21, 16  ;;  %v4397_v55 = vshrl.u32 %v8078_v21, 16 }
 0x125   : > { %6225 = vmatprep.mubr.msk.bf16.mxu1 %vm1349_vm12, %v9003_v48  ;;  %v4341_v48 = vrot.slane %v4339_v63, 5  ;;  %v9007_v45 = vcombine.low %v7865_v40, %v7873_v22  ;;  %v8094_v20 = vrot.slane %v4345_v11, 5  ;;  %v4351_v7 = vrot.slane %v4349_v39, 4 }
 0x126   : > { %v4355_v57 = vshll.u32 %v8083_v10, 16  ;;  %v1992_v34 = vrot.slane %v6838_v6, 5  ;;  %v9008_v43 = vcombine.low %v7877_v5, %v7888_v46  ;;  %v4329_v63 = vrot.slane %v4328_v37, 4  ;;  %v1868_v6 = vld [vmem:[#allocation2 + $0x9c] sm:$0xe] }
 0x127   : > { %v5702_v42 = vrot.slane %v1867_v2, 9  ;;  %v4362_v40 = vrot.slane %v4360_v0, 4  ;;  %v4365_v22 = vrot.slane %v4363_v12, 5  ;;  %v8104_v11 = vrot.slane %v4369_v4, 5  ;;  %v6782_v0 = vld [vmem:[#allocation2 + $0x9c] sm:$0xff]  }
 0x128   : > { %6378 = vmatmul.mubr.msk.bf16.gmra.mrb[16].mxu0 %vm1349_vm12, %v6780_v16  ;;  %v8102_v16 = vld [vmem:[#allocation2 + $0x50] sm:$0x1]  ;;  %v4375_v39 = vrot.slane %v4373_v29, 4  ;;  %v4389_v10 = vrot.slane %v4387_v62, 5  ;;  %v4324_v5 = vsel %vm7102_vm13, %v8074_v56, %v8051_v17  ;;  %v4342_v46 = vor.u32 %v4341_v48, %v4338_v50  ;;  %v6840_v29 = vld [vmem:[#allocation2 + $0x98] sm:$0x1] }
 0x129   : > { %6381 = vmatprep.mubr.msk.bf16.mxu0 %vm1349_vm12, %v6781_v24  ;;  %v8114_v24 = vrot.slane %v4393_v35, 5  ;;  %v4399_v37 = vrot.slane %v4397_v55, 4  ;;  %v4352_v12 = vor.u32 %v4351_v7, %v8094_v20  ;;  %v8117_v2 = vrot.slane %v4355_v57, 5  ;;  %v8119_v62 = vld [vmem:[#allocation2 + $0x5c] sm:$0x1] }
 0x12a   : > { %v1994_v4 = vrot.slane %v1992_v34, 4  ;;  %v4334_v17 = vsel %vm7102_vm13, %v4329_v63, %v8081_v13  ;;  %v6841_v56 = vld [vmem:[#allocation2 + $0xa0] sm:$0xf]  ;;  %v4366_v35 = vor.u32 %v4365_v22, %v4362_v40  ;;  %v4379_v55 = vshll.u32 %v8102_v16, 16 }
 0x12b   : > { %v1999_v50 = vrot.slane %v6841_v56, 5  ;;  %v8127_v48 = vsel %vm7405_vm2, %v5702_v42, %v1992_v34  ;;  %v4376_v57 = vor.u32 %v4375_v39, %v8104_v11  ;;  %v4343_v47 = vrot.slane %v4342_v46, 4  ;;  %v4233_v22 = vld [vmem:[#allocation2 + $0x60] sm:$0xf] }
 0x12c   : > { %6226 = vmatmul.mubr.msk.bf16.vlgmr.msra.gmra.mrb[0].mxu1 %vm1349_vm12, %v9007_v45  ;;  %v4386_v45 = vrot.slane %v4384_v8, 4  ;;  %v1995_v8 = vrot.slane %v6840_v29, 5  ;;  %v2006_v29 = vrot.slane %v7696_v51, 5  ;;  %v5703_v58 = vrot.slane %v1868_v6, 9  ;;  %v6842_v51 = vld [vmem:[#allocation2 + $0xa4] sm:$0x1] }
 0x12d   : > { %6258 = vmatpush3.bf16.msra.mxu1 %v2471_v38  ;;  %6229 = vmatprep.mubr.msk.bf16.mxu1 %vm1349_vm12, %v9008_v43  ;;  %v6839_v38 = vld [vmem:[%s8961_s1 + $0x10] sm:$0xf]  ;;  %v6783_v43 = vld [vmem:[#allocation2 + $0xa8] sm:$0xff]   ;;  %v4400_v21 = vor.u32 %v4399_v37, %v8114_v24  ;;  %v4403_v13 = vshll.u32 %v8119_v62, 16  ;;  %v9009_v63 = vcombine.low %v7914_v18, %v7922_v26  ;;  %v8138_v42 = vcombine.low %v4324_v5, %v4334_v17 }
 0x12e   : > { %6724 = vmatprep.subr.msk.bf16.mxu1 %vm1398_vm0, %v6839_v38  ;;  %v4390_v7 = vor.u32 %v4389_v10, %v4386_v45  ;;  %v1869_v38 = vld [vmem:[#allocation2 + $0xa8] sm:$0xe]  ;;  %v4353_v34 = vrot.slane %v4352_v12, 4  ;;  %v8142_v10 = vsel %vm7405_vm2, %v1994_v4, %v1995_v8  ;;  %v2002_v40 = vrot.slane %v6842_v51, 5  ;;  %v1870_v12 = vld [vmem:[#allocation2 + $0xb4] sm:$0xe] }
 0x12f   : > { %v9010_v39 = vcombine.low %v7918_v14, %v7926_v53  ;;  %v2001_v18 = vrot.slane %v1999_v50, 4  ;;  %v4367_v26 = vrot.slane %v4366_v35, 4  ;;  %v4381_v45 = vrot.slane %v4379_v55, 5  ;;  %v6784_v14 = vld [vmem:[#allocation2 + $0xb4] sm:$0xff]   ;;  %v6785_v55 = vld [vmem:[#allocation2 + $0xc0] sm:$0xff]  }
 0x130   : > { %6382 = vmatmul.mubr.msk.bf16.gmra.mrb[20].mxu0 %vm1349_vm12, %v6782_v0  ;;  %v5704_v5 = vrot.slane %v1869_v38, 9  ;;  %v4377_v46 = vrot.slane %v4376_v57, 4  ;;  %v4391_v6 = vrot.slane %v4390_v7, 4  ;;  %v2008_v37 = vrot.slane %v2006_v29, 4  ;;  %v8174_v57 = vld [vmem:[#allocation2 + $0x68] sm:$0x1] }
 0x131   : > { %6385 = vmatprep.mubr.msk.bf16.mxu0 %vm1349_vm12, %v6783_v43  ;;  %v2009_v0 = vrot.slane %v7698_v61, 5  ;;  %v4401_v4 = vrot.slane %v4400_v21, 4  ;;  %v4405_v8 = vrot.slane %v4403_v13, 5  ;;  %v2013_v17 = vrot.slane %v7710_v15, 5  ;;  %v8161_v61 = vld [vmem:[#allocation2 + $0x64] sm:$0xf] }
 0x132   : > { %v4408_v56 = vshrl.u32 %v4233_v22, 16  ;;  %v4348_v53 = vsel %vm7102_vm13, %v4343_v47, %v8094_v20  ;;  %v4358_v43 = vsel %vm7102_vm13, %v4353_v34, %v8117_v2  ;;  %v8159_v35 = vsel %vm7405_vm2, %v5703_v58, %v1999_v50  ;;  %9011 = vst [vmem:[#allocation17_spill] sm:$0xff] %v8174_v57  ;;  %v4236_v58 = vld [vmem:[#allocation2 + $0x6c] sm:$0xf]  ;;  %v8186_v13 = vld [vmem:[#allocation2 + $0x70] sm:$0xf] }
 0x133   : > { %v4411_v21 = vshll.u32 %v4233_v22, 16  ;;  %v8165_v15 = vsel %vm7405_vm2, %v2001_v18, %v2002_v40  ;;  %v4372_v47 = vsel %vm7102_vm13, %v4367_v26, %v8104_v11  ;;  %v8172_v20 = vsel %vm7405_vm2, %v5704_v5, %v2006_v29  ;;  %9012 = vst [vmem:[#allocation18_spill] sm:$0xff] %v8186_v13 }
 0x134   : > { %6230 = vmatmul.mubr.msk.bf16.gmra.mrb[4].mxu1 %vm1349_vm12, %v9009_v63  ;;  %v5705_v2 = vrot.slane %v1870_v12, 9  ;;  %v4382_v50 = vsel %vm7102_vm13, %v4377_v46, %v4381_v45  ;;  %v4396_v7 = vsel %vm7102_vm13, %v4391_v6, %v8114_v24  ;;  %v8183_v38 = vsel %vm7405_vm2, %v2008_v37, %v2009_v0  ;;  %v4239_v37 = vld [vmem:[#allocation2 + $0x78] sm:$0xf] }
 0x135   : > { %6233 = vmatprep.mubr.msk.bf16.mxu1 %vm1349_vm12, %v9010_v39  ;;  %v2016_v11 = vrot.slane %v7712_v44, 5  ;;  %v4406_v29 = vsel %vm7102_vm13, %v4401_v4, %v4405_v8  ;;  %v2015_v63 = vrot.slane %v2013_v17, 4  ;;  %v4410_v34 = vrot.slane %v4408_v56, 4  ;;  %v8229_v56 = vld [vmem:[#allocation2 + $0x7c] sm:$0xf] }
 0x136   : > { %v4417_v51 = vshll.u32 %v8161_v61, 16  ;;  %v9013_v40 = vcombine.low %v7930_v31, %v7944_v28  ;;  %v4413_v24 = vrot.slane %v4411_v21, 5  ;;  %v4421_v22 = vshrl.u32 %v8161_v61, 16  ;;  %9016 = vst [vmem:[#allocation20_spill] sm:$0xff] %v8229_v56 }
 0x137   : > { %v4427_v44 = vshll.u32 %v8174_v57, 16  ;;  %v4432_v39 = vshrl.u32 %v4236_v58, 16  ;;  %v9014_v18 = vcombine.low %v7950_v41, %v7954_v1  ;;  %v8203_v26 = vcombine.low %v4348_v53, %v4358_v43  ;;  %v8214_v1 = vld [vmem:[#allocation2 + $0x74] sm:$0x1]  ;;  %v6786_v53 = vld [vmem:[#allocation2 + $0xcc] sm:$0xff]  }
 0x138   : > { %6386 = vmatmul.mubr.msk.bf16.gmra.mrb[24].mxu0 %vm1349_vm12, %v6784_v14  ;;  %v4435_v28 = vshll.u32 %v4236_v58, 16  ;;  %v4441_v45 = vshll.u32 %v8186_v13, 16  ;;  %v8210_v46 = vcombine.low %v4372_v47, %v4382_v50  ;;  %9015 = vst [vmem:[#allocation19_spill] sm:$0xff] %v8214_v1  ;;  %v4445_v6 = vshrl.u32 %v8186_v13, 16  ;;  %v4242_v14 = vld [vmem:[#allocation2 + $0x84] sm:$0xf] }
 0x139   : > { %6389 = vmatprep.mubr.msk.bf16.mxu0 %vm1349_vm12, %v6785_v55  ;;  %v8217_v0 = vcombine.low %v4396_v7, %v4406_v29  ;;  %v8221_v12 = vsel %vm7405_vm2, %v5705_v2, %v2013_v17  ;;  %v8225_v4 = vsel %vm7405_vm2, %v2015_v63, %v2016_v11  ;;  %v8227_v8 = vrot.slane %v4417_v51, 5  ;;  %v8233_v58 = vld [vmem:[#allocation2 + $0x88] sm:$0xf]  ;;  %v4245_v11 = vld [vmem:[#allocation2 + $0x90] sm:$0xf] }
 0x13a   : > { %v4414_v43 = vor.u32 %v4413_v24, %v4410_v34  ;;  %v4423_v21 = vrot.slane %v4421_v22, 4  ;;  %v8231_v55 = vrot.slane %v4427_v44, 5  ;;  %v4434_v47 = vrot.slane %v4432_v39, 4  ;;  %9017 = vst [vmem:[#allocation21_spill] sm:$0xff] %v8233_v58  ;;  %v8240_v34 = vld [vmem:[#allocation2 + $0x94] sm:$0xf] }
 0x13b   : > { %v4437_v50 = vrot.slane %v4435_v28, 5  ;;  %v8235_v17 = vrot.slane %v4441_v45, 5  ;;  %v4451_v2 = vshll.u32 %v8214_v1, 16  ;;  %v4456_v7 = vshrl.u32 %v4239_v37, 16  ;;  %9018 = vst [vmem:[#allocation22_spill] sm:$0xff] %v8240_v34 }
 0x13c   : > { %6234 = vmatmul.mubr.msk.bf16.gmra.mrb[8].mxu1 %vm1349_vm12, %v9013_v40  ;;  %v4447_v29 = vrot.slane %v4445_v6, 4  ;;  %v4459_v63 = vshll.u32 %v4239_v37, 16  ;;  %v4465_v51 = vshll.u32 %v8229_v56, 16  ;;  %v4469_v40 = vshrl.u32 %v8229_v56, 16  ;;  %v8273_v56 = vld [vmem:[#allocation2 + $0x98] sm:$0x1] }
 0x13d   : > { %6237 = vmatprep.mubr.msk.bf16.mxu1 %vm1349_vm12, %v9014_v18  ;;  %v4480_v24 = vshrl.u32 %v4242_v14, 16  ;;  %v4483_v22 = vshll.u32 %v4242_v14, 16  ;;  %v4489_v44 = vshll.u32 %v8233_v58, 16  ;;  %v4493_v39 = vshrl.u32 %v8233_v58, 16  ;;  %v9019_v18 = vld [vmem:[#allocation11_spill] sm:$0xff] }
 0x13e   : > { %v9020_v28 = vcombine.low %v7964_v59, %v9019_v18  ;;  %v8249_v45 = vrot.slane %v4414_v43, 4  ;;  %v4424_v6 = vor.u32 %v4423_v21, %v8227_v8  ;;  %v4504_v37 = vshrl.u32 %v4245_v11, 16  ;;  %v8258_v59 = vld [vmem:[#allocation2 + $0x80] sm:$0x1] }
 0x13f   : > { %v4507_v41 = vshll.u32 %v4245_v11, 16  ;;  %v9021_v14 = vcombine.low %v7980_v32, %v8001_v9  ;;  %v4438_v5 = vor.u32 %v4437_v50, %v4434_v47  ;;  %v4458_v18 = vrot.slane %v4456_v7, 4  ;;  %v4248_v32 = vld [vmem:[#allocation2 + $0x9c] sm:$0xf]  ;;  %v8265_v9 = vld [vmem:[#allocation2 + $0x8c] sm:$0x1] }
 0x140   : > { %6390 = vmatmul.mubr.msk.bf16.gmra.mrb[28].mxu0 %vm1349_vm12, %v6786_v53  ;;  %v4513_v53 = vshll.u32 %v8240_v34, 16  ;;  %v4517_v43 = vshrl.u32 %v8240_v34, 16  ;;  %v4448_v21 = vor.u32 %v4447_v29, %v8235_v17  ;;  %v8263_v11 = vrot.slane %v4465_v51, 5 }
 0x141   : > { %6395 = vmatprep.mubr.msk.bf16.mxu0 %vm1349_vm12, %v8060_v54  ;;  %v4471_v31 = vrot.slane %v4469_v40, 4  ;;  %v4485_v58 = vrot.slane %v4483_v22, 5  ;;  %v8267_v54 = vrot.slane %v4489_v44, 5  ;;  %v4495_v47 = vrot.slane %v4493_v39, 4  ;;  %v8277_v40 = vld [vmem:[#allocation2 + $0xa0] sm:$0xf] }
 0x142   : > { %v8269_v50 = vrot.slane %v4424_v6, 4  ;;  %v8271_v7 = vrot.slane %v4451_v2, 5  ;;  %v4506_v34 = vrot.slane %v4504_v37, 4  ;;  %v4509_v29 = vrot.slane %v4507_v41, 5  ;;  %v289_v2 = vld [vmem:[#allocation2 + $0xd4] sm:$0x1] }
 0x143   : > { %v4519_v51 = vrot.slane %v4517_v43, 4  ;;  %v4528_v1 = vshrl.u32 %v4248_v32, 16  ;;  %v4531_v13 = vshll.u32 %v4248_v32, 16  ;;  %v8281_v22 = vrot.slane %v4448_v21, 4  ;;  %v8372_v32 = vld [vmem:[#allocation2 + $0xb8] sm:$0xf] }
 0x144   : > { %6238 = vmatmul.mubr.msk.bf16.gmra.mrb[12].mxu1 %vm1349_vm12, %v9020_v28  ;;  %v4461_v28 = vrot.slane %v4459_v63, 5  ;;  %v8275_v63 = vrot.slane %v4513_v53, 5  ;;  %v4475_v39 = vshll.u32 %v8258_v59, 16  ;;  %v4472_v6 = vor.u32 %v4471_v31, %v8263_v11  ;;  %v4251_v53 = vld [vmem:[#allocation2 + $0xa8] sm:$0xf] }
 0x145   : > { %6241 = vmatprep.mubr.msk.bf16.mxu1 %vm1349_vm12, %v9021_v14  ;;  %v4482_v14 = vrot.slane %v4480_v24, 4  ;;  %v8279_v24 = vrot.slane %v4438_v5, 4  ;;  %v4496_v41 = vor.u32 %v4495_v47, %v8267_v54  ;;  %v4499_v37 = vshll.u32 %v8265_v9, 16 }
 0x146   : > { %v4462_v44 = vor.u32 %v4461_v28, %v4458_v18  ;;  %v9022_v43 = vcombine.low %v8005_v30, %v8009_v25  ;;  %v4510_v5 = vor.u32 %v4509_v29, %v4506_v34  ;;  %v4523_v18 = vshll.u32 %v8273_v56, 16 }
 0x147   : > { %v4486_v57 = vor.u32 %v4485_v58, %v4482_v14  ;;  %v4537_v21 = vshll.u32 %v8277_v40, 16  ;;  %v4541_v31 = vshrl.u32 %v8277_v40, 16  ;;  %v9023_v58 = vcombine.low %v8023_v60, %v8027_v19 }
 0x148   : > { %6396 = vmatmul.mubr.msk.bf16.vlgmr.msra.gmra.mrb[0].mxu0 %vm1349_vm12, %v8066_v23  ;;  %v4520_v30 = vor.u32 %v4519_v51, %v8275_v63  ;;  %v4530_v25 = vrot.slane %v4528_v1, 4  ;;  %v4533_v28 = vrot.slane %v4531_v13, 5  ;;  %v290_v23 = vsel %vm7026_vm6, 0, %v289_v2 }
 0x149   : > { %6428 = vmatpush3.bf16.msra.mxu0 %v8064_v49  ;;  %6399 = vmatprep.mubr.msk.bf16.mxu0 %vm1349_vm12, %v8138_v42  ;;  %v4463_v34 = vrot.slane %v4462_v44, 4  ;;  %v4477_v14 = vrot.slane %v4475_v39, 5  ;;  %v4552_v47 = vshrl.u32 %v4251_v53, 16  ;;  %v4555_v29 = vshll.u32 %v4251_v53, 16  ;;  %291 = vst [vmem:[#allocation2 + $0xd4] sm:$0x1] %v290_v23 }
 0x14a   : > { %v4473_v49 = vrot.slane %v4472_v6, 4  ;;  %v4497_v60 = vrot.slane %v4496_v41, 4  ;;  %v4501_v19 = vrot.slane %v4499_v37, 5  ;;  %v4420_v13 = vsel %vm7102_vm13, %v8249_v45, %v8227_v8  ;;  %v8316_v6 = vld [vmem:[#allocation2 + $0xa4] sm:$0x1] }
 0x14b   : > { %v4511_v1 = vrot.slane %v4510_v5, 4  ;;  %v8310_v51 = vrot.slane %v4537_v21, 5  ;;  %v4543_v2 = vrot.slane %v4541_v31, 4  ;;  %v4430_v42 = vsel %vm7102_vm13, %v8269_v50, %v8231_v55  ;;  %v8318_v41 = vld [vmem:[#allocation2 + $0xac] sm:$0xf] }
 0x14c   : > { %6242 = vmatmul.mubr.msk.bf16.gmra.mrb[16].mxu1 %vm1349_vm12, %v9022_v43  ;;  %v4487_v43 = vrot.slane %v4486_v57, 4  ;;  %v4521_v44 = vrot.slane %v4520_v30, 4  ;;  %v4525_v39 = vrot.slane %v4523_v18, 5  ;;  %v4534_v57 = vor.u32 %v4533_v28, %v4530_v25  ;;  %v8328_v37 = vld [vmem:[#allocation2 + $0xb0] sm:$0x1] }
 0x14d   : > { %6245 = vmatprep.mubr.msk.bf16.mxu1 %vm1349_vm12, %v9023_v58  ;;  %v4444_v8 = vsel %vm7102_vm13, %v8279_v24, %v8235_v17  ;;  %v4454_v45 = vsel %vm7102_vm13, %v8281_v22, %v8271_v7  ;;  %v4554_v55 = vrot.slane %v4552_v47, 4  ;;  %v4557_v50 = vrot.slane %v4555_v29, 5  ;;  %v4254_v21 = vld [vmem:[#allocation2 + $0xb4] sm:$0xf] }
 0x14e   : > { %v4468_v53 = vsel %vm7102_vm13, %v4463_v34, %v8263_v11  ;;  %v4478_v5 = vsel %vm7102_vm13, %v4473_v49, %v4477_v14  ;;  %v4492_v17 = vsel %vm7102_vm13, %v4487_v43, %v8267_v54  ;;  %v4502_v24 = vsel %vm7102_vm13, %v4497_v60, %v4501_v19  ;;  %v4944_v43 = vld [vmem:[#allocation2 + $0x54] sm:$0xe] }
 0x14f   : > { %v9025_v7 = vcombine.low %v8040_v36, %v8049_v3  ;;  %v4516_v11 = vsel %vm7102_vm13, %v4511_v1, %v8275_v63  ;;  %v4544_v22 = vor.u32 %v4543_v2, %v8310_v51  ;;  %v4547_v18 = vshll.u32 %v8316_v6, 16 }
 0x150   : > { %6400 = vmatmul.mubr.msk.bf16.gmra.mrb[4].mxu0 %vm1349_vm12, %v8203_v26  ;;  %v4561_v54 = vshll.u32 %v8318_v41, 16  ;;  %v9026_v31 = vcombine.low %v8127_v48, %v8142_v10  ;;  %v4526_v36 = vsel %vm7102_vm13, %v4521_v44, %v4525_v39  ;;  %v8360_v3 = vrot.slane %v4534_v57, 4  ;;  %v4943_v10 = vld [vmem:[#allocation2 + $0x48] sm:$0xe]  ;;  %v4945_v57 = vld [vmem:[#allocation2 + $0x60] sm:$0xe] }
 0x151   : > { %6403 = vmatprep.mubr.msk.bf16.mxu0 %vm1349_vm12, %v8210_v46  ;;  %v4565_v26 = vshrl.u32 %v8318_v41, 16  ;;  %v4571_v63 = vshll.u32 %v8328_v37, 16  ;;  %v5721_v58 = vcombine.low %v8221_v12, %v8225_v4  ;;  %v5888_v30 = vcombine.low %v4420_v13, %v4430_v42 }
 0x152   : > { %v8366_v25 = vcombine.low %v4444_v8, %v4454_v45  ;;  %v4558_v48 = vor.u32 %v4557_v50, %v4554_v55  ;;  %v8368_v28 = vcombine.low %v4468_v53, %v4478_v5  ;;  %v8370_v46 = vcombine.low %v4492_v17, %v4502_v24  ;;  %v4946_v53 = vld [vmem:[#allocation2 + $0x6c] sm:$0xe]  ;;  %v9028_v24 = vld [vmem:[#allocation15_spill] sm:$0xff] }
 0x153   : > { %v4576_v23 = vshrl.u32 %v4254_v21, 16  ;;  %v4579_v34 = vshll.u32 %v4254_v21, 16  ;;  %v8374_v14 = vcombine.low %v4516_v11, %v4526_v36  ;;  %v8376_v47 = vrot.slane %v4544_v22, 4  ;;  %v9030_v22 = vld [vmem:[#allocation17_spill] sm:$0xff]  ;;  %v4257_v36 = vld [vmem:[#allocation2 + $0xc0] sm:$0xf] }
 0x154   : > { %6246 = vmatmul.mubr.msk.bf16.gmra.mrb[20].mxu1 %vm1349_vm12, %v9025_v7  ;;  %v8378_v29 = vrot.slane %v4547_v18, 5  ;;  %v8380_v49 = vrot.slane %v4561_v54, 5  ;;  %v4540_v60 = vsel %vm7102_vm13, %v8360_v3, %v8310_v51  ;;  %v8386_v19 = vrot.slane %v4565_v26, 4  ;;  %v9039_v51 = vld [vmem:[#allocation22_spill] sm:$0xff] }
 0x155   : > { %6249 = vmatprep.mubr.msk.bf16.mxu1 %vm1349_vm12, %v9026_v31  ;;  %v8388_v13 = vrot.slane %v4571_v63, 5  ;;  %v5918_v1 = vrot.slane %v4943_v10, 9  ;;  %v8390_v2 = vrot.slane %v4558_v48, 4  ;;  %v4585_v42 = vshll.u32 %v8372_v32, 16  ;;  %v8431_v31 = vld [vmem:[#allocation2 + $0xbc] sm:$0x1] }
 0x156   : > { %v5033_v44 = vrot.slane %v8070_v52, 5  ;;  %v5036_v39 = vrot.slane %v8102_v16, 5  ;;  %v8395_v8 = vrot.slane %v4576_v23, 4  ;;  %v8397_v45 = vrot.slane %v4579_v34, 5  ;;  %v9031_v63 = vld [vmem:[#allocation18_spill] sm:$0xff]  ;;  %v9032_v34 = vld [vmem:[#allocation19_spill] sm:$0xff] }
 0x157   : > { %v4589_v55 = vshrl.u32 %v8372_v32, 16  ;;  %v5919_v50 = vrot.slane %v4944_v43, 9  ;;  %v9027_v5 = vcombine.low %v8159_v35, %v8165_v15  ;;  %v4550_v52 = vsel %vm7102_vm13, %v8376_v47, %v8378_v29  ;;  %v8560_v29 = vld [vmem:[#allocation2 + $0xd4] sm:$0x1] }
 0x158   : > { %6404 = vmatmul.mubr.msk.bf16.gmra.mrb[8].mxu0 %vm1349_vm12, %v8217_v0  ;;  %v8412_v16 = vsel %vm7405_vm2, %v5918_v1, %v5033_v44  ;;  %v5035_v17 = vrot.slane %v5033_v44, 4  ;;  %v5040_v7 = vrot.slane %v9028_v24, 5  ;;  %v9029_v35 = vcombine.low %v8172_v20, %v8183_v38  ;;  %v2693_v1 = vld [vmem:[#allocation2 + $0x78] sm:$0xf]  ;;  %v6787_v44 = vld [vmem:[#allocation2 + $0xc] sm:$0xff]  }
 0x159   : > { %6407 = vmatprep.mubr.msk.bf16.mxu0 %vm1349_vm12, %v5888_v30  ;;  %v5043_v15 = vrot.slane %v8119_v62, 5  ;;  %v5920_v0 = vrot.slane %v4945_v57, 9  ;;  %v5047_v11 = vrot.slane %v8161_v61, 5  ;;  %v5050_v18 = vrot.slane %v9030_v22, 5 }
 0x15a   : > { %v8425_v54 = vsel %vm7405_vm2, %v5035_v17, %v5036_v39  ;;  %v8429_v21 = vsel %vm7405_vm2, %v5919_v50, %v5040_v7  ;;  %v5042_v20 = vrot.slane %v5040_v7, 4  ;;  %v5921_v38 = vrot.slane %v4946_v53, 9  ;;  %v8449_v39 = vld [vmem:[#allocation2 + $0xc4] sm:$0xf] }
 0x15b   : > { %v5934_v62 = vcombine.low %v8412_v16, %v8425_v54  ;;  %v8437_v61 = vsel %vm7405_vm2, %v5920_v0, %v5047_v11  ;;  %v5049_v26 = vrot.slane %v5047_v11, 4  ;;  %v5054_v30 = vrot.slane %v9031_v63, 5  ;;  %v4947_v11 = vld [vmem:[#allocation2 + $0x78] sm:$0xe] }
 0x15c   : > { %6250 = vmatmul.mubr.msk.bf16.gmra.mrb[24].mxu1 %vm1349_vm12, %v9027_v5  ;;  %v4568_v48 = vor.u32 %v8386_v19, %v8380_v49  ;;  %v8442_v10 = vrot.slane %v4585_v42, 5  ;;  %v8446_v23 = vsel %vm7405_vm2, %v5042_v20, %v5043_v15  ;;  %v5057_v43 = vrot.slane %v9032_v34, 5  ;;  %v4948_v20 = vld [vmem:[#allocation2 + $0x84] sm:$0xe] }
 0x15d   : > { %6253 = vmatprep.mubr.msk.bf16.mxu1 %vm1349_vm12, %v9029_v35  ;;  %v5935_v57 = vcombine.low %v8429_v21, %v8446_v23  ;;  %v8455_v50 = vsel %vm7405_vm2, %v5049_v26, %v5050_v18  ;;  %v8459_v19 = vsel %vm7405_vm2, %v5921_v38, %v5054_v30  ;;  %v5056_v42 = vrot.slane %v5054_v30, 4  ;;  %v9035_v30 = vld [vmem:[#allocation20_spill] sm:$0xff]  ;;  %v6802_v21 = vld [vmem:[#allocation2 + $0xc0] sm:$0xff]  }
 0x15e   : > { %v4564_v53 = vsel %vm7102_vm13, %v8390_v2, %v8380_v49  ;;  %v4595_v5 = vshll.u32 %v8431_v31, 16  ;;  %v4600_v17 = vshrl.u32 %v4257_v36, 16  ;;  %v4582_v7 = vor.u32 %v8397_v45, %v8395_v8  ;;  %v8494_v8 = vld [vmem:[#allocation2 + $0xc8] sm:$0x1] }
 0x15f   : > { %v4603_v35 = vshll.u32 %v4257_v36, 16  ;;  %v8472_v15 = vsel %vm7405_vm2, %v5056_v42, %v5057_v43  ;;  %v2931_v0 = vshrl.u32 %v2693_v1, 16  ;;  %v4591_v22 = vrot.slane %v4589_v55, 4  ;;  %v9034_v36 = vld [vmem:[#allocation10_spill] sm:$0xff]  ;;  %v9036_v42 = vld [vmem:[#allocation21_spill] sm:$0xff] }
 0x160   : > { %6408 = vmatmul.mubr.msk.bf16.gmra.mrb[12].mxu0 %vm1349_vm12, %v8366_v25  ;;  %v4609_v18 = vshll.u32 %v8449_v39, 16  ;;  %v2934_v45 = vshll.u32 %v2693_v1, 16  ;;  %v4569_v38 = vrot.slane %v4568_v48, 4  ;;  %v4613_v12 = vshrl.u32 %v8449_v39, 16  ;;  %v6788_v48 = vld [vmem:[#allocation2 + $0x18] sm:$0xff]  }
 0x161   : > { %6411 = vmatprep.mubr.msk.bf16.mxu0 %vm1349_vm12, %v8368_v28  ;;  %v2933_v4 = vrot.slane %v2931_v0, 4  ;;  %v4602_v55 = vrot.slane %v4600_v17, 4  ;;  %v5922_v63 = vrot.slane %v4947_v11, 9  ;;  %v5061_v34 = vrot.slane %v9035_v30, 5  ;;  %v6789_v11 = vld [vmem:[#allocation2 + $0x24] sm:$0xff]  }
 0x162   : > { %v2936_v26 = vrot.slane %v2934_v45, 5  ;;  %v4605_v43 = vrot.slane %v4603_v35, 5  ;;  %v5064_v1 = vrot.slane %v8258_v59, 5  ;;  %v5068_v28 = vrot.slane %v9036_v42, 5 }
 0x163   : > { %v8496_v0 = vrot.slane %v4609_v18, 5  ;;  %v5063_v17 = vrot.slane %v5061_v34, 4  ;;  %v4615_v45 = vrot.slane %v4613_v12, 4  ;;  %v4574_v18 = vsel %vm7102_vm13, %v4569_v38, %v8388_v13 }
 0x164   : > { %6254 = vmatmul.mubr.msk.bf16.gmra.mrb[28].mxu1 %vm1349_vm12, %v5721_v58  ;;  %v9033_v58 = vld [vmem:[#allocation9_spill] sm:$0xff]  ;;  %v2937_v24 = vor.u32 %v2936_v26, %v2933_v4  ;;  %v5070_v35 = vrot.slane %v5068_v28, 4  ;;  %v4592_v4 = vor.u32 %v4591_v22, %v8442_v10  ;;  %v4606_v30 = vor.u32 %v4605_v43, %v4602_v55  ;;  %v9037_v22 = vld [vmem:[#allocation8_spill] sm:$0xff]  ;;  %v9038_v43 = vld [vmem:[#allocation6_spill] sm:$0xff] }
 0x165   : > { %6259 = vmatprep.mubr.msk.bf16.mxu1 %vm1349_vm12, %v6787_v44  ;;  %v2953_v25 = vsel %vm7102_vm13, %v9034_v36, %v9033_v58  ;;  %v5923_v44 = vrot.slane %v4948_v20, 9  ;;  %v8500_v58 = vsel %vm7405_vm2, %v5922_v63, %v5061_v34  ;;  %v4260_v36 = vld [vmem:[#allocation2 + $0xcc] sm:$0xf]  ;;  %v5071_v20 = vrot.slane %v8265_v9, 5  ;;  %v8511_v26 = vld [vmem:[#allocation2 + $0xd0] sm:$0xf] }
 0x166   : > { %v2938_v63 = vrot.slane %v2937_v24, 4  ;;  %v8515_v12 = vsel %vm7405_vm2, %v5063_v17, %v5064_v1  ;;  %v4619_v34 = vshll.u32 %v8494_v8, 16  ;;  %v4624_v13 = vshrl.u32 %v4260_v36, 16 }
 0x167   : > { %v8504_v59 = vsel %vm7405_vm2, %v5923_v44, %v5068_v28  ;;  %v5938_v44 = vcombine.low %v8500_v58, %v8515_v12  ;;  %v8522_v9 = vsel %vm7405_vm2, %v5070_v35, %v5071_v20  ;;  %v4627_v24 = vshll.u32 %v4260_v36, 16  ;;  %v4949_v20 = vld [vmem:[#allocation2 + $0x90] sm:$0xe] }
 0x168   : > { %6412 = vmatmul.mubr.msk.bf16.gmra.mrb[16].mxu0 %vm1349_vm12, %v8370_v46  ;;  %v2943_v38 = vsel %vm7102_vm13, %v2938_v63, %v9037_v22  ;;  %v5939_v55 = vcombine.low %v8504_v59, %v8522_v9  ;;  %v4616_v1 = vor.u32 %v4615_v45, %v8496_v0  ;;  %v4633_v42 = vshll.u32 %v8511_v26, 16  ;;  %v6790_v63 = vld [vmem:[#allocation2 + $0x30] sm:$0xff]   ;;  %v6791_v45 = vld [vmem:[#allocation2 + $0x3c] sm:$0xff]  }
 0x169   : > { %v4637_v28 = vshrl.u32 %v8511_v26, 16  ;;  %v8537_v46 = vcombine.low %v2943_v38, %v2953_v25  ;;  %6415 = vmatprep.mubr.msk.bf16.mxu0 %vm1349_vm12, %v8374_v14  ;;  %v4593_v17 = vrot.slane %v4592_v4, 4  ;;  %v4597_v36 = vrot.slane %v4595_v5, 5 }
 0x16a   : > { %v4607_v35 = vrot.slane %v4606_v30, 4  ;;  %v5893_v25 = vcombine.low %v4540_v60, %v4550_v52  ;;  %v5894_v14 = vcombine.low %v4564_v53, %v4574_v18  ;;  %v4626_v5 = vrot.slane %v4624_v13, 4 }
 0x16b   : > { %v4617_v4 = vrot.slane %v4616_v1, 4  ;;  %v4621_v30 = vrot.slane %v4619_v34, 5  ;;  %v8558_v22 = vrot.slane %v4633_v42, 5  ;;  %v4639_v47 = vrot.slane %v4637_v28, 4  ;;  %v6843_v1 = vld [vmem:[#allocation2 + $0x1c] sm:$0xf] }
 0x16c   : > { %6260 = vmatmul.mubr.msk.bf16.vlgmr.msra.gmra.mrb[0].mxu1 %vm1349_vm12, %v6788_v48  ;;  %v4583_v48 = vrot.slane %v4582_v7, 4  ;;  %v4629_v7 = vrot.slane %v4627_v24, 5  ;;  %v5924_v38 = vrot.slane %v4949_v20, 9  ;;  %v5075_v3 = vrot.slane %v9039_v51, 5  ;;  %v4940_v51 = vld [vmem:[#allocation2 + $0x24] sm:$0xe] }
 0x16d   : > { %6462 = vmatpush3.bf16.msra.mxu1 %v9038_v43  ;;  %6263 = vmatprep.mubr.msk.bf16.mxu1 %vm1349_vm12, %v6789_v11  ;;  %v4950_v11 = vld [vmem:[#allocation2 + $0x9c] sm:$0xe]  ;;  %v5078_v60 = vrot.slane %v8273_v56, 5  ;;  %v4598_v2 = vsel %vm7102_vm13, %v4593_v17, %v4597_v36  ;;  %v4612_v52 = vsel %vm7102_vm13, %v4607_v35, %v8496_v0  ;;  %v4622_v0 = vsel %vm7102_vm13, %v4617_v4, %v4621_v30  ;;  %v6792_v35 = vld [vmem:[#allocation2 + $0x48] sm:$0xff]   ;;  %v6844_v4 = vld [vmem:[#allocation2 + $0x20] sm:$0x1] }
 0x16e   : > { %v4588_v49 = vsel %vm7102_vm13, %v4583_v48, %v8442_v10  ;;  %v5925_v53 = vrot.slane %v4950_v11, 9  ;;  %v4630_v18 = vor.u32 %v4629_v7, %v4626_v5  ;;  %v8576_v56 = vsel %vm7405_vm2, %v5924_v38, %v5075_v3  ;;  %v4951_v38 = vld [vmem:[#allocation2 + $0xa8] sm:$0xe] }
 0x16f   : > { %v5077_v34 = vrot.slane %v5075_v3, 4  ;;  %v5082_v10 = vrot.slane %v8277_v40, 5  ;;  %v4640_v13 = vor.u32 %v4639_v47, %v8558_v22  ;;  %v4643_v24 = vshll.u32 %v8560_v29, 16  ;;  %v4939_v40 = vld [vmem:[#allocation2 + $0x18] sm:$0xe] }
 0x170   : > { %6416 = vmatmul.mubr.msk.bf16.gmra.mrb[20].mxu0 %vm1349_vm12, %v5893_v25  ;;  %v5085_v43 = vrot.slane %v8316_v6, 5  ;;  %v5005_v42 = vrot.slane %v6843_v1, 5  ;;  %v5895_v20 = vcombine.low %v4588_v49, %v4598_v2  ;;  %v6793_v25 = vld [vmem:[#allocation2 + $0x54] sm:$0xff]   ;;  %v4631_v6 = vrot.slane %v4630_v18, 4  ;;  %v6845_v3 = vld [vmem:[#allocation2 + $0x28] sm:$0xf] }
 0x171   : > { %6419 = vmatprep.mubr.msk.bf16.mxu0 %vm1349_vm12, %v5894_v14  ;;  %v8588_v28 = vsel %vm7405_vm2, %v5077_v34, %v5078_v60  ;;  %v8594_v17 = vsel %vm7405_vm2, %v5925_v53, %v5082_v10  ;;  %v5084_v36 = vrot.slane %v5082_v10, 4  ;;  %v4641_v14 = vrot.slane %v4640_v13, 4  ;;  %v4952_v18 = vld [vmem:[#allocation2 + $0xb4] sm:$0xe]  ;;  %v9040_v13 = vld [vmem:[#allocation12_spill] sm:$0xff] }
 0x172   : > { %v5940_v48 = vcombine.low %v8576_v56, %v8588_v28  ;;  %v4645_v5 = vrot.slane %v4643_v24, 5  ;;  %v5914_v11 = vrot.slane %v4939_v40, 9  ;;  %v5008_v30 = vrot.slane %v6844_v4, 5  ;;  %v9041_v4 = vld [vmem:[#allocation13_spill] sm:$0xff] }
 0x173   : > { %v8598_v7 = vsel %vm7405_vm2, %v5084_v36, %v5085_v43  ;;  %v5012_v60 = vrot.slane %v6845_v3, 5  ;;  %v4636_v49 = vsel %vm7102_vm13, %v4631_v6, %v8558_v22  ;;  %v5089_v53 = vrot.slane %v8318_v41, 5  ;;  %v6794_v36 = vld [vmem:[#allocation2 + $0x60] sm:$0xff]  }
 0x174   : > { %6264 = vmatmul.mubr.msk.bf16.gmra.mrb[4].mxu1 %vm1349_vm12, %v6790_v63  ;;  %v5896_v63 = vcombine.low %v4612_v52, %v4622_v0  ;;  %v5941_v47 = vcombine.low %v8594_v17, %v8598_v7  ;;  %v4646_v2 = vsel %vm7102_vm13, %v4641_v14, %v4645_v5  ;;  %v5926_v52 = vrot.slane %v4951_v38, 9  ;;  %v4941_v0 = vld [vmem:[#allocation2 + $0x30] sm:$0xe] }
 0x175   : > { %6267 = vmatprep.mubr.msk.bf16.mxu1 %vm1349_vm12, %v6791_v45  ;;  %v5007_v45 = vrot.slane %v5005_v42, 4  ;;  %v5006_v34 = vsel %vm7405_vm2, %v5914_v11, %v5005_v42  ;;  %v5019_v24 = vrot.slane %v9040_v13, 5  ;;  %v5915_v43 = vrot.slane %v4940_v51, 9  ;;  %v6796_v13 = vld [vmem:[#allocation2 + $0x78] sm:$0xff]  }
 0x176   : > { %v8619_v22 = vsel %vm7405_vm2, %v5926_v52, %v5089_v53  ;;  %v5091_v1 = vrot.slane %v5089_v53, 4  ;;  %v5092_v40 = vrot.slane %v8328_v37, 5  ;;  %v5897_v41 = vcombine.low %v4636_v49, %v4646_v2  ;;  %v9042_v2 = vld [vmem:[#allocation14_spill] sm:$0xff] }
 0x177   : > { %v5009_v10 = vsel %vm7405_vm2, %v5007_v45, %v5008_v30  ;;  %v5927_v42 = vrot.slane %v4952_v18, 9  ;;  %v5916_v14 = vrot.slane %v4941_v0, 9  ;;  %v5096_v11 = vrot.slane %v8372_v32, 5  ;;  %v4953_v18 = vld [vmem:[#allocation2 + $0xc0] sm:$0xe] }
 0x178   : > { %6420 = vmatmul.mubr.msk.bf16.gmra.mrb[24].mxu0 %vm1349_vm12, %v5895_v20  ;;  %v6846_v20 = vld [vmem:[#allocation2 + $0x2c] sm:$0x1]  ;;  %v5930_v6 = vcombine.low %v5006_v34, %v5009_v10  ;;  %v8624_v5 = vsel %vm7405_vm2, %v5091_v1, %v5092_v40  ;;  %v5021_v45 = vrot.slane %v5019_v24, 4  ;;  %v5022_v30 = vrot.slane %v9041_v4, 5 }
 0x179   : > { %6423 = vmatprep.mubr.msk.bf16.mxu0 %vm1349_vm12, %v5896_v63  ;;  %v5015_v63 = vrot.slane %v6846_v20, 5  ;;  %v5942_v37 = vcombine.low %v8619_v22, %v8624_v5  ;;  %v5099_v38 = vrot.slane %v8431_v31, 5  ;;  %v8633_v51 = vsel %vm7405_vm2, %v5927_v42, %v5096_v11  ;;  %v4942_v31 = vld [vmem:[#allocation2 + $0x3c] sm:$0xe]  ;;  %v2690_v0 = vld [vmem:[#allocation2 + $0x6c] sm:$0xf] }
 0x17a   : > { %v5098_v3 = vrot.slane %v5096_v11, 4  ;;  %v5013_v32 = vsel %vm7405_vm2, %v5915_v43, %v5012_v60  ;;  %v5026_v52 = vrot.slane %v9042_v2, 5  ;;  %v5020_v34 = vsel %vm7405_vm2, %v5916_v14, %v5019_v24  ;;  %v6847_v11 = vld [vmem:[#allocation2 + $0x70] sm:$0xf] }
 0x17b   : > { %v5023_v10 = vsel %vm7405_vm2, %v5021_v45, %v5022_v30  ;;  %v5917_v1 = vrot.slane %v4942_v31, 9  ;;  %v5928_v40 = vrot.slane %v4953_v18, 9  ;;  %v5103_v24 = vrot.slane %v8449_v39, 5 }
 0x17c   : > { %6268 = vmatmul.mubr.msk.bf16.gmra.mrb[8].mxu1 %vm1349_vm12, %v6792_v35  ;;  %v5014_v35 = vrot.slane %v5012_v60, 4  ;;  %v8646_v53 = vsel %vm7405_vm2, %v5098_v3, %v5099_v38  ;;  %v5028_v20 = vrot.slane %v5026_v52, 4  ;;  %v5106_v14 = vrot.slane %v8494_v8, 5 }
 0x17d   : > { %6271 = vmatprep.mubr.msk.bf16.mxu1 %vm1349_vm12, %v6793_v25  ;;  %v6795_v25 = vld [vmem:[#allocation2 + $0x6c] sm:$0xff]   ;;  %v5943_v60 = vcombine.low %v8633_v51, %v8646_v53  ;;  %v2916_v45 = vshll.u32 %v6847_v11, 16  ;;  %v2920_v4 = vshrl.u32 %v6847_v11, 16  ;;  %v8661_v38 = vsel %vm7405_vm2, %v5928_v40, %v5103_v24  ;;  %v2696_v40 = vld [vmem:[#allocation2 + $0x84] sm:$0xf] }
 0x17e   : > { %v5016_v49 = vsel %vm7405_vm2, %v5014_v35, %v5015_v63  ;;  %v5932_v35 = vcombine.low %v5020_v34, %v5023_v10  ;;  %v9043_v63 = vld [vmem:[#allocation16_spill] sm:$0xff]  ;;  %v5105_v3 = vrot.slane %v5103_v24, 4  ;;  %v5027_v39 = vsel %vm7405_vm2, %v5917_v1, %v5026_v52  ;;  %v6799_v1 = vld [vmem:[#allocation2 + $0x9c] sm:$0xff]   ;;  %v2699_v11 = vld [vmem:[#allocation2 + $0x90] sm:$0xf] }
 0x17f   : > { %v5931_v43 = vcombine.low %v5013_v32, %v5016_v49  ;;  %v5029_v42 = vrot.slane %v9043_v63, 5  ;;  %v5110_v32 = vrot.slane %v8511_v26, 5  ;;  %v5113_v31 = vrot.slane %v8560_v29, 5 }
 0x180   : > { %6424 = vmatmul.mubr.msk.bf16.gmra.mrb[28].mxu0 %vm1349_vm12, %v5897_v41  ;;  %v6797_v41 = vld [vmem:[#allocation2 + $0x84] sm:$0xff]   ;;  %v8673_v18 = vsel %vm7405_vm2, %v5105_v3, %v5106_v14  ;;  %v2918_v10 = vrot.slane %v2916_v45, 5  ;;  %v2968_v24 = vshrl.u32 %v6849_v33, 16  ;;  %v6801_v3 = vld [vmem:[#allocation2 + $0xb4] sm:$0xff]   ;;  %vm5478_vm0 = vcmask 130048  }
 0x181   : > { %6429 = vmatprep.mubr.msk.bf16.mxu0 %vm1349_vm12, %v5930_v6  ;;  %v2910_v6 = vshll.u32 %v2690_v0, 16  ;;  %v5030_v8 = vsel %vm7405_vm2, %v5028_v20, %v5029_v42  ;;  %v5112_v34 = vrot.slane %v5110_v32, 4  ;;  %v5944_v52 = vcombine.low %v8661_v38, %v8673_v18  ;;  %v6848_v20 = vld [vmem:[#allocation2 + $0x74] sm:$0x1] }
 0x182   : > { %v2926_v63 = vshll.u32 %v6848_v20, 16  ;;  %v2955_v42 = vshrl.u32 %v2696_v40, 16 }
 0x183   : > { %v2912_v2 = vrot.slane %v2910_v6, 5  ;;  %v8683_v29 = vsel %vm7405_vm2, %v5112_v34, %v5113_v31  ;;  %v2964_v6 = vshll.u32 %v6849_v33, 16  ;;  %v2979_v31 = vshrl.u32 %v2699_v11, 16  ;;  %v2702_v34 = vld [vmem:[#allocation2 + $0x9c] sm:$0xf] }
 0x184   : > { %6272 = vmatmul.mubr.msk.bf16.gmra.mrb[12].mxu1 %vm1349_vm12, %v6794_v36  ;;  %v4954_v36 = vld [vmem:[#allocation2 + $0xcc] sm:$0xe] }
 0x185   : > { %6275 = vmatprep.mubr.msk.bf16.mxu1 %vm1349_vm12, %v6795_v25  ;;  %v2907_v25 = vshrl.u32 %v2690_v0, 16  ;;  %v5929_v30 = vrot.slane %v4954_v36, 9  ;;  %v2922_v0 = vrot.slane %v2920_v4, 4  ;;  %v2928_v4 = vrot.slane %v2926_v63, 5 }
 0x186   : > { %v9044_v63 = vcombine.low %v8437_v61, %v8455_v50  ;;  %v2981_v33 = vrot.slane %v2979_v31, 4  ;;  %v2705_v61 = vld [vmem:[#allocation2 + $0xa8] sm:$0xf]  ;;  %v6854_v31 = vld [vmem:[#allocation2 + $0xa4] sm:$0x1] }
 0x187   : > { %v2909_v49 = vrot.slane %v2907_v25, 4  ;;  %v8677_v26 = vsel %vm7405_vm2, %v5929_v30, %v5110_v32  ;;  %v2958_v25 = vshll.u32 %v2696_v40, 16  ;;  %v6800_v30 = vld [vmem:[#allocation2 + $0xa8] sm:$0xff]   ;;  %v2957_v32 = vrot.slane %v2955_v42, 4 }
 0x188   : > { %6430 = vmatmul.mubr.msk.bf16.vlgmr.msra.gmra.mrb[0].mxu0 %vm1349_vm12, %v5931_v43  ;;  %v5933_v43 = vcombine.low %v5027_v39, %v5030_v8  ;;  %v5945_v36 = vcombine.low %v8677_v26, %v8683_v29  ;;  %v8694_v8 = vrot.slane %v2964_v6, 5  ;;  %v3003_v40 = vshrl.u32 %v2702_v34, 16 }
 0x189   : > { %6433 = vmatprep.mubr.msk.bf16.mxu0 %vm1349_vm12, %v5932_v35  ;;  %v2923_v35 = vor.u32 %v2922_v0, %v2918_v10  ;;  %v2960_v39 = vrot.slane %v2958_v25, 5 }
 0x18b   : > { %v2924_v45 = vrot.slane %v2923_v35, 4  ;;  %v6852_v35 = vld [vmem:[#allocation2 + $0xa0] sm:$0xf]  ;;  %v2961_v42 = vor.u32 %v2960_v39, %v2957_v32 }
 0x18c   : > { %6276 = vmatmul.mubr.msk.bf16.gmra.mrb[16].mxu1 %vm1349_vm12, %v6796_v13  ;;  %v6798_v13 = vld [vmem:[#allocation2 + $0x90] sm:$0xff]   ;;  %v3012_v20 = vshll.u32 %v6852_v35, 16 }
 0x18d   : > { %6279 = vmatprep.mubr.msk.bf16.mxu1 %vm1349_vm12, %v6797_v41  ;;  %v2913_v41 = vor.u32 %v2912_v2, %v2909_v49  ;;  %v2970_v49 = vrot.slane %v2968_v24, 4  ;;  %v2982_v2 = vshll.u32 %v2699_v11, 16  ;;  %v2929_v54 = vsel %vm7102_vm13, %v2924_v45, %v2928_v4 }
 0x18e   : > { %v3005_v45 = vrot.slane %v3003_v40, 4  ;;  %v2962_v50 = vrot.slane %v2961_v42, 4  ;;  %v6855_v40 = vld [vmem:[#allocation2 + $0xac] sm:$0xf]  ;;  %v6856_v42 = vld [vmem:[#allocation2 + $0xb8] sm:$0xf] }
 0x18f   : > { %v2914_v14 = vrot.slane %v2913_v41, 4  ;;  %v3006_v41 = vshll.u32 %v2702_v34, 16  ;;  %v2971_v25 = vor.u32 %v2970_v49, %v8694_v8  ;;  %v2984_v6 = vrot.slane %v2982_v2, 5 }
 0x190   : > { %6434 = vmatmul.mubr.msk.bf16.gmra.mrb[4].mxu0 %vm1349_vm12, %v5933_v43  ;;  %v3022_v2 = vshll.u32 %v6854_v31, 16  ;;  %v6857_v31 = vld [vmem:[#allocation2 + $0xb0] sm:$0x1] }
 0x191   : > { %6437 = vmatprep.mubr.msk.bf16.mxu0 %vm1349_vm12, %v5934_v62  ;;  %v2919_v16 = vsel %vm7102_vm13, %v2914_v14, %v2918_v10  ;;  %v6850_v62 = vld [vmem:[#allocation2 + $0x8c] sm:$0x1]  ;;  %v3016_v10 = vshrl.u32 %v6852_v35, 16  ;;  %v6853_v14 = vld [vmem:[#allocation2 + $0x98] sm:$0x1]  ;;  %v3008_v4 = vrot.slane %v3006_v41, 5  ;;  %v2985_v39 = vor.u32 %v2984_v6, %v2981_v33 }
 0x192   : > { %v2974_v0 = vshll.u32 %v6850_v62, 16  ;;  %v5778_v23 = vcombine.low %v2919_v16, %v2929_v54  ;;  %v2998_v11 = vshll.u32 %v6853_v14, 16  ;;  %v2972_v34 = vrot.slane %v2971_v25, 4  ;;  %v2708_v62 = vld [vmem:[#allocation2 + $0xb4] sm:$0xf] }
 0x193   : > { %v3027_v16 = vshrl.u32 %v2705_v61, 16  ;;  %v3030_v54 = vshll.u32 %v2705_v61, 16  ;;  %v3040_v41 = vshrl.u32 %v6855_v40, 16  ;;  %v2967_v35 = vsel %vm7102_vm13, %v2962_v50, %v8694_v8  ;;  %v2711_v50 = vld [vmem:[#allocation2 + $0xc0] sm:$0xf] }
 0x194   : > { %6280 = vmatmul.mubr.msk.bf16.gmra.mrb[20].mxu1 %vm1349_vm12, %v6798_v13  ;;  %v6851_v13 = vld [vmem:[#allocation2 + $0x94] sm:$0xf]  ;;  %v2976_v32 = vrot.slane %v2974_v0, 5  ;;  %v3036_v0 = vshll.u32 %v6855_v40, 16  ;;  %v3060_v25 = vshll.u32 %v6856_v42, 16  ;;  %v3064_v33 = vshrl.u32 %v6856_v42, 16 }
 0x195   : > { %6283 = vmatprep.mubr.msk.bf16.mxu1 %vm1349_vm12, %v6799_v1  ;;  %v2988_v43 = vshll.u32 %v6851_v13, 16  ;;  %v2992_v1 = vshrl.u32 %v6851_v13, 16  ;;  %v9045_v13 = vcombine.low %v8459_v19, %v8472_v15  ;;  %v2986_v15 = vrot.slane %v2985_v39, 4 }
 0x196   : > { %v2977_v19 = vsel %vm7102_vm13, %v2972_v34, %v2976_v32  ;;  %v3032_v58 = vrot.slane %v3030_v54, 5  ;;  %v3042_v14 = vrot.slane %v3040_v41, 4  ;;  %v3066_v61 = vrot.slane %v3064_v33, 4  ;;  %v6860_v33 = vld [vmem:[#allocation2 + $0xc8] sm:$0x1] }
 0x197   : > { %v2994_v24 = vrot.slane %v2992_v1, 4  ;;  %v3075_v59 = vshrl.u32 %v2711_v50, 16  ;;  %v3078_v9 = vshll.u32 %v2711_v50, 16 }
 0x198   : > { %6438 = vmatmul.mubr.msk.bf16.gmra.mrb[8].mxu0 %vm1349_vm12, %v5935_v57  ;;  %v8711_v57 = vrot.slane %v2988_v43, 5  ;;  %v3009_v43 = vor.u32 %v3008_v4, %v3005_v45  ;;  %v5780_v45 = vcombine.low %v2967_v35, %v2977_v19 }
 0x199   : > { %6441 = vmatprep.mubr.msk.bf16.mxu0 %vm1349_vm12, %v9044_v63  ;;  %v3054_v63 = vshll.u32 %v2708_v62, 16  ;;  %v3077_v35 = vrot.slane %v3075_v59, 4  ;;  %v3080_v19 = vrot.slane %v3078_v9, 5 }
 0x19a   : > { %v2995_v49 = vor.u32 %v2994_v24, %v8711_v57  ;;  %v3010_v12 = vrot.slane %v3009_v43, 4  ;;  %v3038_v24 = vrot.slane %v3036_v0, 5 }
 0x19b   : > { %v3056_v4 = vrot.slane %v3054_v63, 5  ;;  %v3081_v42 = vor.u32 %v3080_v19, %v3077_v35 }
 0x19c   : > { %6284 = vmatmul.mubr.msk.bf16.gmra.mrb[24].mxu1 %vm1349_vm12, %v6800_v30  ;;  %v8713_v30 = vrot.slane %v3012_v20, 5  ;;  %v3000_v20 = vrot.slane %v2998_v11, 5  ;;  %v2996_v6 = vrot.slane %v2995_v49, 4  ;;  %v2991_v11 = vsel %vm7102_vm13, %v2986_v15, %v8711_v57 }
 0x19d   : > { %6287 = vmatprep.mubr.msk.bf16.mxu1 %vm1349_vm12, %v6801_v3  ;;  %v3018_v3 = vrot.slane %v3016_v10, 4  ;;  %v3051_v10 = vshrl.u32 %v2708_v62, 16  ;;  %v3043_v57 = vor.u32 %v3042_v14, %v3038_v24  ;;  %v6859_v62 = vld [vmem:[#allocation2 + $0xbc] sm:$0x1] }
 0x19e   : > { %v3001_v34 = vsel %vm7102_vm13, %v2996_v6, %v3000_v20  ;;  %v3015_v39 = vsel %vm7102_vm13, %v3010_v12, %v8713_v30  ;;  %v3094_v6 = vshll.u32 %v6860_v33, 16 }
 0x19f   : > { %v3019_v1 = vor.u32 %v3018_v3, %v8713_v30  ;;  %v3053_v8 = vrot.slane %v3051_v10, 4  ;;  %v3062_v3 = vrot.slane %v3060_v25, 5  ;;  %v5781_v43 = vcombine.low %v2991_v11, %v3001_v34 }
 0x1a0   : > { %6442 = vmatmul.mubr.msk.bf16.gmra.mrb[12].mxu0 %vm1349_vm12, %v9045_v13  ;;  %v3070_v13 = vshll.u32 %v6859_v62, 16  ;;  %v3044_v0 = vrot.slane %v3043_v57, 4  ;;  %v3096_v12 = vrot.slane %v3094_v6, 5 }
 0x1a1   : > { %6445 = vmatprep.mubr.msk.bf16.mxu0 %vm1349_vm12, %v5938_v44  ;;  %v3020_v44 = vrot.slane %v3019_v1, 4  ;;  %v3057_v54 = vor.u32 %v3056_v4, %v3053_v8  ;;  %v3067_v30 = vor.u32 %v3066_v61, %v3062_v3  ;;  %v8802_v61 = vld [vmem:[%s8962_s2] ss:$0 sm:$0xff] }
 0x1a2   : > { %v3072_v20 = vrot.slane %v3070_v13, 5 }
 0x1a3   : > { %v3058_v28 = vrot.slane %v3057_v54, 4 }
 0x1a4   : > { %6288 = vmatmul.mubr.msk.bf16.gmra.mrb[28].mxu1 %vm1349_vm12, %v6802_v21  ;;  %v3024_v21 = vrot.slane %v3022_v2, 5  ;;  %v3046_v2 = vshll.u32 %v6857_v31, 16 }
 0x1a5   : > { %6309 = vmatprep.mubr.msk.bf16.mxu1 %vm1349_vm12, %v5778_v23  ;;  %v3029_v23 = vrot.slane %v3027_v16, 4  ;;  %v3063_v17 = vsel %vm7102_vm13, %v3058_v28, %v3062_v3 }
 0x1a6   : > { %v3025_v49 = vsel %vm7102_vm13, %v3020_v44, %v3024_v21  ;;  %v3048_v41 = vrot.slane %v3046_v2, 5 }
 0x1a7   : > { %v3033_v32 = vor.u32 %v3032_v58, %v3029_v23  ;;  %v5782_v1 = vcombine.low %v3015_v39, %v3025_v49  ;;  %v3082_v23 = vrot.slane %v3081_v42, 4 }
 0x1a8   : > { %6446 = vmatmul.mubr.msk.bf16.gmra.mrb[16].mxu0 %vm1349_vm12, %v5939_v55  ;;  %v6858_v55 = vld [vmem:[#allocation2 + $0xc4] sm:$0xf]  ;;  %v3049_v63 = vsel %vm7102_vm13, %v3044_v0, %v3048_v41 }
 0x1a9   : > { %6449 = vmatprep.mubr.msk.bf16.mxu0 %vm1349_vm12, %v5940_v48  ;;  %v3088_v16 = vshrl.u32 %v6858_v55, 16  ;;  %v3034_v40 = vrot.slane %v3033_v32, 4  ;;  %v3068_v48 = vrot.slane %v3067_v30, 4 }
 0x1ab   : > { %v3090_v56 = vrot.slane %v3088_v16, 4  ;;  %v3039_v10 = vsel %vm7102_vm13, %v3034_v40, %v3038_v24  ;;  %v3073_v7 = vsel %vm7102_vm13, %v3068_v48, %v3072_v20 }
 0x1ac   : > { %6310 = vmatmul.mubr.msk.bf16.vlgmr.msra.gmra.mrb[16].mxu1 %vm1349_vm12, %v8537_v46  ;;  %v3084_v46 = vshll.u32 %v6858_v55, 16  ;;  %v5784_v21 = vcombine.low %v3063_v17, %v3073_v7 }
 0x1ad   : > { %6313 = vmatprep.mubr.msk.bf16.mxu1 %vm1349_vm12, %v5780_v45 }
 0x1ae   : > { %v3086_v15 = vrot.slane %v3084_v46, 5 }
 0x1b0   : > { %6450 = vmatmul.mubr.msk.bf16.gmra.mrb[20].mxu0 %vm1349_vm12, %v5941_v47  ;;  %v3091_v25 = vor.u32 %v3090_v56, %v3086_v15  ;;  %v5783_v47 = vcombine.low %v3039_v10, %v3049_v63  ;;  %v3087_v22 = vsel %vm7102_vm13, %v3082_v23, %v3086_v15 }
 0x1b1   : > { %6453 = vmatprep.mubr.msk.bf16.mxu0 %vm1349_vm12, %v5942_v37 }
 0x1b2   : > { %v3092_v58 = vrot.slane %v3091_v25, 4 }
 0x1b4   : > { %6314 = vmatmul.mubr.msk.bf16.gmra.mrb[20].mxu1 %vm1349_vm12, %v5781_v43  ;;  %v3097_v5 = vsel %vm7102_vm13, %v3092_v58, %v3096_v12 }
 0x1b5   : > { %6317 = vmatprep.mubr.msk.bf16.mxu1 %vm1349_vm12, %v5782_v1  ;;  %v5785_v37 = vcombine.low %v3087_v22, %v3097_v5 }
 0x1b8   : > { %6454 = vmatmul.mubr.msk.bf16.gmra.mrb[24].mxu0 %vm1349_vm12, %v5943_v60 }
 0x1b9   : > { %6457 = vmatprep.mubr.msk.bf16.mxu0 %vm1349_vm12, %v5944_v52 }
 0x1bc   : > { %6318 = vmatmul.mubr.msk.bf16.gmra.mrb[24].mxu1 %vm1349_vm12, %v5783_v47 }
 0x1bd   : > { %6321 = vmatprep.mubr.msk.bf16.mxu1 %vm1349_vm12, %v5784_v21 }
 0x1c0   : > { %6458 = vmatmul.mubr.msk.bf16.gmra.mrb[28].mxu0 %vm1349_vm12, %v5945_v36 }
 0x1c4   : > { %6322 = vmatmul.mubr.msk.bf16.gmra.mrb[28].mxu1 %vm1349_vm12, %v5785_v37 }
 0x23f   : > { %v6261_v51 = vpop.f32.mrb[0].mxu1 }
 0x240   : > { %v2507_v53 = vpop.f32.mrb[1].mxu1 }
 0x241   : > { %v6262_v60 = vpop.f32.mrb[2].mxu1 }
 0x242   : > { %v2510_v44 = vpop.f32.mrb[3].mxu1 }
 0x247   : > { %v6265_v27 = vpop.f32.mrb[4].mxu1 }
 0x248   : > { %v2523_v24 = vpop.f32.mrb[5].mxu1 }
 0x249   : > { %v6266_v14 = vpop.f32.mrb[6].mxu1 }
 0x24a   : > { %v2526_v38 = vpop.f32.mrb[7].mxu1 }
 0x24f   : > { %v6269_v18 = vpop.f32.mrb[8].mxu1 }
 0x250   : > { %v2539_v52 = vpop.f32.mrb[9].mxu1 }
 0x251   : > { %v6270_v45 = vpop.f32.mrb[10].mxu1 }
 0x252   : > { %v2542_v8 = vpop.f32.mrb[11].mxu1 }
 0x257   : > { %v8790_v4 = vpop.f32.mrb[12].mxu1 }
 0x258   : > { %v8792_v3 = vpop.f32.mrb[13].mxu1 }
 0x259   : > { %v8794_v26 = vpop.f32.mrb[14].mxu1 }
 0x25a   : > { %v8796_v29 = vpop.f32.mrb[15].mxu1 }
 0x25b   : > { %v6431_v36 = vpop.f32.mrb[0].mxu0 }
 0x25c   : > { %v6463_v50 = vadd.f32 %v6431_v36, %v6261_v51  ;;  %v5248_v11 = vpop.f32.mrb[1].mxu0 }
 0x25d   : > { %v6464_v34 = vadd.f32 %v5248_v11, %v2507_v53  ;;  %v6432_v32 = vpop.f32.mrb[2].mxu0 }
 0x25e   : > { %v5416_v39 = vadd.f32 %v6463_v50, %v8802_v61  ;;  %v6465_v49 = vadd.f32 %v6432_v32, %v6262_v60  ;;  %v5251_v57 = vpop.f32.mrb[3].mxu0 }
 0x25f   : > { %v5414_v31 = vadd.f32 %v6464_v34, %v8802_v61  ;;  %v6466_v2 = vadd.f32 %v5251_v57, %v2510_v44 }
 0x260   : > { %v5448_v59 = vmax.f32 %v5416_v39, 0.0  ;;  %v5417_v9 = vadd.f32 %v6465_v49, %v8802_v61 }
 0x261   : > { %v5446_v55 = vmax.f32 %v5414_v31, 0.0  ;;  %v5415_v46 = vadd.f32 %v6466_v2, %v8802_v61 }
 0x262   : > { %5481 = vst.msk [vmem:[%s8810_s10 + $0x10] sm:$0xff] %vm5478_vm0, %v5448_v59  ;;  %v5449_v16 = vmax.f32 %v5417_v9, 0.0 }
 0x263   : > { %5479 = vst.msk [vmem:[%s8810_s10] sm:$0xff] %vm5478_vm0, %v5446_v55  ;;  %v5447_v54 = vmax.f32 %v5415_v46, 0.0  ;;  %v6435_v30 = vpop.f32.mrb[4].mxu0 }
 0x264   : > { %5482 = vst.msk [vmem:[%s8810_s10 + $0x18] sm:$0xff] %vm5478_vm0, %v5449_v16  ;;  %v6467_v62 = vadd.f32 %v6435_v30, %v6265_v27  ;;  %v5264_v13 = vpop.f32.mrb[5].mxu0 }
 0x265   : > { %5480 = vst.msk [vmem:[%s8810_s10 + $0x8] sm:$0xff] %vm5478_vm0, %v5447_v54  ;;  %v6468_v43 = vadd.f32 %v5264_v13, %v2523_v24  ;;  %v6436_v1 = vpop.f32.mrb[6].mxu0 }
 0x266   : > { %v5420_v40 = vadd.f32 %v6467_v62, %v8802_v61  ;;  %v6469_v0 = vadd.f32 %v6436_v1, %v6266_v14  ;;  %v5267_v41 = vpop.f32.mrb[7].mxu0 }
 0x267   : > { %v5418_v35 = vadd.f32 %v6468_v43, %v8802_v61  ;;  %v6470_v19 = vadd.f32 %v5267_v41, %v2526_v38 }
 0x268   : > { %v5452_v15 = vmax.f32 %v5420_v40, 0.0  ;;  %v5421_v56 = vadd.f32 %v6469_v0, %v8802_v61 }
 0x269   : > { %v5450_v28 = vmax.f32 %v5418_v35, 0.0  ;;  %v5419_v48 = vadd.f32 %v6470_v19, %v8802_v61 }
 0x26a   : > { %5485 = vst.msk [vmem:[%s8810_s10 + $0x30] sm:$0xff] %vm5478_vm0, %v5452_v15  ;;  %v5453_v20 = vmax.f32 %v5421_v56, 0.0 }
 0x26b   : > { %5483 = vst.msk [vmem:[%s8810_s10 + $0x20] sm:$0xff] %vm5478_vm0, %v5450_v28  ;;  %v5451_v10 = vmax.f32 %v5419_v48, 0.0  ;;  %v6439_v63 = vpop.f32.mrb[8].mxu0 }
 0x26c   : > { %5486 = vst.msk [vmem:[%s8810_s10 + $0x38] sm:$0xff] %vm5478_vm0, %v5453_v20  ;;  %v6471_v42 = vadd.f32 %v6439_v63, %v6269_v18  ;;  %v5280_v25 = vpop.f32.mrb[9].mxu0 }
 0x26d   : > { %5484 = vst.msk [vmem:[%s8810_s10 + $0x28] sm:$0xff] %vm5478_vm0, %v5451_v10  ;;  %v6472_v33 = vadd.f32 %v5280_v25, %v2539_v52  ;;  %v6440_v6 = vpop.f32.mrb[10].mxu0 }
 0x26e   : > { %v5424_v17 = vadd.f32 %v6471_v42, %v8802_v61  ;;  %v6473_v7 = vadd.f32 %v6440_v6, %v6270_v45  ;;  %v5283_v47 = vpop.f32.mrb[11].mxu0 }
 0x26f   : > { %v5422_v21 = vadd.f32 %v6472_v33, %v8802_v61  ;;  %v6474_v23 = vadd.f32 %v5283_v47, %v2542_v8 }
 0x270   : > { %v5456_v58 = vmax.f32 %v5424_v17, 0.0  ;;  %v5425_v12 = vadd.f32 %v6473_v7, %v8802_v61 }
 0x271   : > { %v5454_v22 = vmax.f32 %v5422_v21, 0.0  ;;  %v5423_v5 = vadd.f32 %v6474_v23, %v8802_v61 }
 0x272   : > { %5489 = vst.msk [vmem:[%s8810_s10 + $0x50] sm:$0xff] %vm5478_vm0, %v5456_v58  ;;  %v5457_v37 = vmax.f32 %v5425_v12, 0.0 }
 0x273   : > { %5487 = vst.msk [vmem:[%s8810_s10 + $0x40] sm:$0xff] %vm5478_vm0, %v5454_v22  ;;  %v5455_v51 = vmax.f32 %v5423_v5, 0.0  ;;  %v6443_v53 = vpop.f32.mrb[12].mxu0 }
 0x274   : > { %5490 = vst.msk [vmem:[%s8810_s10 + $0x58] sm:$0xff] %vm5478_vm0, %v5457_v37  ;;  %v6475_v60 = vadd.f32 %v6443_v53, %v8790_v4  ;;  %v5296_v44 = vpop.f32.mrb[13].mxu0 }
 0x275   : > { %5488 = vst.msk [vmem:[%s8810_s10 + $0x48] sm:$0xff] %vm5478_vm0, %v5455_v51  ;;  %v6476_v27 = vadd.f32 %v5296_v44, %v8792_v3  ;;  %v6444_v24 = vpop.f32.mrb[14].mxu0 }
 0x276   : > { %v5428_v14 = vadd.f32 %v6475_v60, %v8802_v61  ;;  %v6477_v38 = vadd.f32 %v6444_v24, %v8794_v26  ;;  %v5299_v18 = vpop.f32.mrb[15].mxu0 }
 0x277   : > { %v5426_v52 = vadd.f32 %v6476_v27, %v8802_v61  ;;  %v6478_v45 = vadd.f32 %v5299_v18, %v8796_v29 }
 0x278   : > { %v5460_v8 = vmax.f32 %v5428_v14, 0.0  ;;  %v5429_v4 = vadd.f32 %v6477_v38, %v8802_v61 }
 0x279   : > { %v5458_v36 = vmax.f32 %v5426_v52, 0.0  ;;  %v5427_v50 = vadd.f32 %v6478_v45, %v8802_v61 }
 0x27a   : > { %5493 = vst.msk [vmem:[%s8810_s10 + $0x70] sm:$0xff] %vm5478_vm0, %v5460_v8  ;;  %v5461_v3 = vmax.f32 %v5429_v4, 0.0 }
 0x27b   : > { %5491 = vst.msk [vmem:[%s8810_s10 + $0x60] sm:$0xff] %vm5478_vm0, %v5458_v36  ;;  %v5459_v11 = vmax.f32 %v5427_v50, 0.0  ;;  %v6447_v26 = vpop.f32.mrb[16].mxu0 }
 0x27c   : > { %5494 = vst.msk [vmem:[%s8810_s10 + $0x78] sm:$0xff] %vm5478_vm0, %v5461_v3  ;;  %v5312_v29 = vpop.f32.mrb[17].mxu0 }
 0x27d   : > { %5492 = vst.msk [vmem:[%s8810_s10 + $0x68] sm:$0xff] %vm5478_vm0, %v5459_v11  ;;  %v6448_v31 = vpop.f32.mrb[18].mxu0 }
 0x27e   : > { %v5315_v55 = vpop.f32.mrb[19].mxu0 }
 0x27f   : > { %v6311_v34 = vpop.f32.mrb[16].mxu1 }
 0x280   : > { %v3295_v32 = vpop.f32.mrb[17].mxu1  ;;  %v6479_v39 = vadd.f32 %v6447_v26, %v6311_v34 }
 0x281   : > { %v6312_v49 = vpop.f32.mrb[18].mxu1  ;;  %v6480_v57 = vadd.f32 %v5312_v29, %v3295_v32 }
 0x282   : > { %v5432_v2 = vadd.f32 %v6479_v39, %v8802_v61  ;;  %v3298_v59 = vpop.f32.mrb[19].mxu1  ;;  %v6481_v9 = vadd.f32 %v6448_v31, %v6312_v49 }
 0x283   : > { %v5430_v46 = vadd.f32 %v6480_v57, %v8802_v61  ;;  %v6482_v16 = vadd.f32 %v5315_v55, %v3298_v59  ;;  %v6451_v0 = vpop.f32.mrb[20].mxu0 }
 0x284   : > { %v5464_v54 = vmax.f32 %v5432_v2, 0.0  ;;  %v5433_v30 = vadd.f32 %v6481_v9, %v8802_v61  ;;  %v5328_v19 = vpop.f32.mrb[21].mxu0 }
 0x285   : > { %v5462_v62 = vmax.f32 %v5430_v46, 0.0  ;;  %v5431_v13 = vadd.f32 %v6482_v16, %v8802_v61  ;;  %v6452_v28 = vpop.f32.mrb[22].mxu0 }
 0x286   : > { %5497 = vst.msk [vmem:[%s8810_s10 + $0x90] sm:$0xff] %vm5478_vm0, %v5464_v54  ;;  %v5465_v43 = vmax.f32 %v5433_v30, 0.0  ;;  %v5331_v63 = vpop.f32.mrb[23].mxu0 }
 0x287   : > { %5495 = vst.msk [vmem:[%s8810_s10 + $0x80] sm:$0xff] %vm5478_vm0, %v5462_v62  ;;  %v5463_v1 = vmax.f32 %v5431_v13, 0.0  ;;  %v6315_v40 = vpop.f32.mrb[20].mxu1 }
 0x288   : > { %5498 = vst.msk [vmem:[%s8810_s10 + $0x98] sm:$0xff] %vm5478_vm0, %v5465_v43  ;;  %v3311_v41 = vpop.f32.mrb[21].mxu1  ;;  %v6483_v35 = vadd.f32 %v6451_v0, %v6315_v40 }
 0x289   : > { %5496 = vst.msk [vmem:[%s8810_s10 + $0x88] sm:$0xff] %vm5478_vm0, %v5463_v1  ;;  %v6316_v15 = vpop.f32.mrb[22].mxu1  ;;  %v6484_v56 = vadd.f32 %v5328_v19, %v3311_v41 }
 0x28a   : > { %v5436_v48 = vadd.f32 %v6483_v35, %v8802_v61  ;;  %v3314_v20 = vpop.f32.mrb[23].mxu1  ;;  %v6485_v10 = vadd.f32 %v6452_v28, %v6316_v15 }
 0x28b   : > { %v5434_v42 = vadd.f32 %v6484_v56, %v8802_v61  ;;  %v6486_v25 = vadd.f32 %v5331_v63, %v3314_v20  ;;  %v6455_v58 = vpop.f32.mrb[24].mxu0 }
 0x28c   : > { %v5468_v33 = vmax.f32 %v5436_v48, 0.0  ;;  %v5437_v6 = vadd.f32 %v6485_v10, %v8802_v61  ;;  %v5344_v5 = vpop.f32.mrb[25].mxu0 }
 0x28d   : > { %v5466_v17 = vmax.f32 %v5434_v42, 0.0  ;;  %v5435_v7 = vadd.f32 %v6486_v25, %v8802_v61  ;;  %v6456_v53 = vpop.f32.mrb[26].mxu0 }
 0x28e   : > { %5501 = vst.msk [vmem:[%s8810_s10 + $0xb0] sm:$0xff] %vm5478_vm0, %v5468_v33  ;;  %v5469_v47 = vmax.f32 %v5437_v6, 0.0  ;;  %v5347_v24 = vpop.f32.mrb[27].mxu0 }
 0x28f   : > { %5499 = vst.msk [vmem:[%s8810_s10 + $0xa0] sm:$0xff] %vm5478_vm0, %v5466_v17  ;;  %v5467_v21 = vmax.f32 %v5435_v7, 0.0  ;;  %v6319_v23 = vpop.f32.mrb[24].mxu1 }
 0x290   : > { %5502 = vst.msk [vmem:[%s8810_s10 + $0xb8] sm:$0xff] %vm5478_vm0, %v5469_v47  ;;  %v3327_v12 = vpop.f32.mrb[25].mxu1  ;;  %v6487_v22 = vadd.f32 %v6455_v58, %v6319_v23 }
 0x291   : > { %5500 = vst.msk [vmem:[%s8810_s10 + $0xa8] sm:$0xff] %vm5478_vm0, %v5467_v21  ;;  %v6320_v37 = vpop.f32.mrb[26].mxu1  ;;  %v6488_v51 = vadd.f32 %v5344_v5, %v3327_v12 }
 0x292   : > { %v5440_v60 = vadd.f32 %v6487_v22, %v8802_v61  ;;  %v3330_v44 = vpop.f32.mrb[27].mxu1  ;;  %v6489_v27 = vadd.f32 %v6456_v53, %v6320_v37 }
 0x293   : > { %v5438_v14 = vadd.f32 %v6488_v51, %v8802_v61  ;;  %v6490_v38 = vadd.f32 %v5347_v24, %v3330_v44  ;;  %v6459_v3 = vpop.f32.mrb[28].mxu0 }
 0x294   : > { %v5472_v18 = vmax.f32 %v5440_v60, 0.0  ;;  %v5441_v52 = vadd.f32 %v6489_v27, %v8802_v61  ;;  %v5360_v26 = vpop.f32.mrb[29].mxu0 }
 0x295   : > { %v5470_v45 = vmax.f32 %v5438_v14, 0.0  ;;  %v5439_v8 = vadd.f32 %v6490_v38, %v8802_v61  ;;  %v6460_v29 = vpop.f32.mrb[30].mxu0 }
 0x296   : > { %5505 = vst.msk [vmem:[%s8810_s10 + $0xd0] sm:$0xff] %vm5478_vm0, %v5472_v18  ;;  %v5473_v4 = vmax.f32 %v5441_v52, 0.0  ;;  %v5363_v2 = vpop.f32.mrb[31].mxu0 }
 0x297   : > { %5503 = vst.msk [vmem:[%s8810_s10 + $0xc0] sm:$0xff] %vm5478_vm0, %v5470_v45  ;;  %v5471_v36 = vmax.f32 %v5439_v8, 0.0  ;;  %v6323_v50 = vpop.f32.mrb[28].mxu1 }
 0x298   : > { %5506 = vst.msk [vmem:[%s8810_s10 + $0xd8] sm:$0xff] %vm5478_vm0, %v5473_v4  ;;  %v3343_v11 = vpop.f32.mrb[29].mxu1  ;;  %v6491_v34 = vadd.f32 %v6459_v3, %v6323_v50 }
 0x299   : > { %5504 = vst.msk [vmem:[%s8810_s10 + $0xc8] sm:$0xff] %vm5478_vm0, %v5471_v36  ;;  %v6324_v32 = vpop.f32.mrb[30].mxu1  ;;  %v6492_v39 = vadd.f32 %v5360_v26, %v3343_v11 }
 0x29a   : > { %v5444_v49 = vadd.f32 %v6491_v34, %v8802_v61  ;;  %v3346_v57 = vpop.f32.mrb[31].mxu1  ;;  %v6493_v31 = vadd.f32 %v6460_v29, %v6324_v32 }
 0x29b   : > { %v5442_v59 = vadd.f32 %v6492_v39, %v8802_v61  ;;  %v6494_v9 = vadd.f32 %v5363_v2, %v3346_v57 }
 0x29c   : > { %v5476_v55 = vmax.f32 %v5444_v49, 0.0  ;;  %v5445_v46 = vadd.f32 %v6493_v31, %v8802_v61 }
 0x29d   : > { %v5474_v16 = vmax.f32 %v5442_v59, 0.0  ;;  %v5443_v54 = vadd.f32 %v6494_v9, %v8802_v61 }
 0x29e   : > { %5509 = vst.msk [vmem:[%s8810_s10 + $0xf0] sm:$0xff] %vm5478_vm0, %v5476_v55  ;;  %v5477_v30 = vmax.f32 %v5445_v46, 0.0 }
 0x29f   : > { %5507 = vst.msk [vmem:[%s8810_s10 + $0xe0] sm:$0xff] %vm5478_vm0, %v5474_v16  ;;  %v5475_v62 = vmax.f32 %v5443_v54, 0.0 }
 0x2a0   : > { %5510 = vst.msk [vmem:[%s8810_s10 + $0xf8] sm:$0xff] %vm5478_vm0, %v5477_v30 }
 0x2a1   : > { %5508 = vst.msk [vmem:[%s8810_s10 + $0xe8] sm:$0xff] %vm5478_vm0, %v5475_v62 }
 0x2a2   : > { %6874 = shalt.err (!%p6871_p3)
}
 0x2a3   : > { %s6875_s29 = scalar_lea.hbm %s8907_s24, 4096  ;;  %s6879_s5 = scalar_lea.hbm %s8963_s3, 8192 }
 0x2a4   : > { %p6876_p4 = scmp.ne.s32.totalorder %s8907_s24, %s6875_s29  ;;  %p6880_p9 = scmp.lt.u32.totalorder %s8907_s24, %s8963_s3 }
 0x2a5   : > { %p6881_p10 = scmp.lt.u32.totalorder %s6879_s5, %s6875_s29  ;;  %p6883_p12 = scmp.lt.u32.totalorder %s6875_s29, %s8907_s24 }
 0x2a6   : > { %p6877_p7 = pnand %p6876_p4, %p6987_p5 }
 0x2a7   : > { %p6882_p11 = por %p6881_p10, %p6880_p9 }
 0x2a8   : > { %p6878_p8 = pneg %p6877_p7 }
 0x2a9   : > { %p6884_p13 = por %p6883_p12, %p6882_p11 }
 0x2ab   : > { %p6885_p0 = pnand %p6884_p13, %p6878_p8 }
 0x2ad   : > { %6888 = shalt.err (!%p6885_p0)
}
 0x2ae   : > { %s6927_s8 = smov 128   ;;  %s6928_s9 = smov 8  }
 0x2af   : > { %6729 = dma.vmem_to_hbm [thread:$0]  (%p6987_p5), %s8909_s17, 4096, %s8907_s24, %s8919_s16, %s6927_s8, %s6927_s8, %s6928_s9  }
 0x2b0 PF: > { %p6735_p1 = scmp.ge.s32.totalorder %s6923_s15, 2  ;;  %s5540_s10 = sand.u32 1, %s6911_s12  }
 0x2b1   : > { %s5541_s11 = scalar_lea.sflag [#allocation4], %s5540_s10 }
 0x2b2   : > { %p6732_p2 = pnand %p6735_p1, %p6991_p6 }
 0x2b4   : > { %6906 = dma.done.wait (!%p6732_p2), %s5541_s11, 4096  }
 0x2b5   : > { %6908 = vsyncadd (!%p6732_p2), %s5541_s11, 4294963200  ;;  %p13_p3 = scmp.ge.s32.totalorder %s6974_s18, 4   ;;  %s9046_s12 = smov %s6915_s13 }
 0x2b6   : > { %s9047_s13 = smov %s6919_s14  ;;  %s9048_s14 = smov %s6985_s21 }
 0x2b7   : > { %s9049_s15 = smov %s6974_s18  ;;  %15 = sbr.rel (!%p13_p3) target bundleno = 3 (0x3), region = 70 }
 0x2be   :  { %5546 = vsyncpa [#allocation4], 1 }
 0x2bf   :  { %5548 = vsyncpa [#allocation4 + $0x1], 1 }

</bundles_post_ra>
